<compile_context>
chip_gen: v7x
topology: tpu7x:2x2x1
jax: 0.10.0
libtpu: 0.0.40
codegen_flags: <defaults>
</compile_context>

<pallas_src>
import math

import jax
import jax.numpy as jnp
from jax.experimental import pallas as pl
from jax.experimental.pallas import tpu as pltpu

C_OUT = 128                     # conv out_channels per branch
KW = 56                         # conv kernel width (hardcoded in the module)
KS = (3, 4, 5)                  # conv kernel heights
K_MAX = max(KS)                 # all branches padded to this many kh slabs
N_CONV = C_OUT * len(KS)        # 384 fused conv out-channels
D_FEAT = N_CONV                 # 384 MLP width
N_HEAD = 128                    # lane-dense packed width of the 7 output heads
# (start, stop) lanes of out1..out7 inside the packed (B, 128) head output
HEAD_SLICES = ((0, 2), (2, 5), (5, 8), (8, 11), (11, 14), (14, 16), (16, 18))


# -----------------------------------------------------------------------------
# Fused kernel: conv branches + pooling + MLP head for one batch element
# -----------------------------------------------------------------------------
def _make_bert_cnn_kernel(S, H):
    S_ROWS = S + 2 - 3 + 1       # rows computed per w0 block (= K=3 branch extent)
    W_OUT = H + 2 - KW + 1       # conv output width (same for every branch)
    SP = S + 4                   # padded rows: 1 top (padding=1), 3 bottom (K_MAX)
    HP = H + 2                   # padded cols (padding=1)

    def kernel(x_ref, wcv_ref, bcv_ref,
               w1_ref, b1_ref, s1_ref, t1_ref,
               w2_ref, b2_ref, s2_ref, t2_ref,
               w3_ref, b3_ref, s3_ref, t3_ref,
               wha_ref, whb_ref, bh_ref,
               out_ref, xp_scr):
        # ------------- in-kernel zero padding (no padded HBM round-trip) ---------
        xp_scr[...] = jnp.zeros_like(xp_scr)
        xp_scr[1:S + 1, 1:H + 1] = x_ref[0]
        xp = xp_scr[...]                                     # (SP, HP) f32

        # ------------- fused conv3/conv4/conv5 (N = 384) --------------------------
        # Hoist the misaligned lane slice (one per w0); per-kh slices touch
        # sublanes only.  Patches for all w0 are stacked along sublanes so every
        # MXU push is a (W_OUT*S_ROWS, 56) @ (56, 384) bf16 matmul, f32 accumulate.
        cols = [xp[:, w0:w0 + KW] for w0 in range(W_OUT)]    # W_OUT x (SP, KW)
        acc = jnp.zeros((W_OUT * S_ROWS, N_CONV), jnp.float32)
        for kh in range(K_MAX):
            patch = jnp.concatenate([c[kh:kh + S_ROWS, :] for c in cols], axis=0)
            acc = acc + jnp.dot(patch.astype(jnp.bfloat16), wcv_ref[kh],
                                preferred_element_type=jnp.float32)
        act = jnp.maximum(acc + bcv_ref[...], 0.0)           # conv bias + ReLU

        # ------------- per-branch MaxPool2d((56-K+1, 1)) + mean over (2, 3) -------
        # TODO(synk): for production-sized S/H (large W_OUT, n_pool) convert these
        # unrolled Python loops to lax.fori_loop over dynamic sublane slices.
        feats = []
        for i, K in enumerate(KS):
            P = KW - K + 1                    # pool kernel == stride (height)
            S_out = S + 2 - K + 1             # valid conv rows for this branch
            n_pool = S_out // P               # floor (ceil_mode=False)
            lo, hi = i * C_OUT, (i + 1) * C_OUT
            total = jnp.zeros((1, C_OUT), jnp.float32)
            for w0 in range(W_OUT):
                for pidx in range(n_pool):
                    r0 = w0 * S_ROWS + pidx * P
                    total = total + jnp.max(act[r0:r0 + P, lo:hi],
                                            axis=0, keepdims=True)
            feats.append(total * (1.0 / float(n_pool * W_OUT)))
        feat = jnp.concatenate(feats, axis=1)                # (1, 384) f32

        # ------------- MLP head ----------------------------------------------------
        # dropout_common(p=0.1) is identity in eval mode.
        def linear_bn_relu(h, w_r, b_r, s_r, t_r):
            y = jnp.dot(h.astype(jnp.bfloat16), w_r[...],
                        preferred_element_type=jnp.float32) + b_r[...]
            return jnp.maximum(y * s_r[...] + t_r[...], 0.0)  # BN (eval) + ReLU

        h1 = linear_bn_relu(feat, w1_ref, b1_ref, s1_ref, t1_ref)   # fc1
        h2 = linear_bn_relu(h1, w2_ref, b2_ref, s2_ref, t2_ref)     # fc2
        sh = linear_bn_relu(h2, w3_ref, b3_ref, s3_ref, t3_ref)     # out_shared
        # out1..out5 (from shared) and out6/out7 (from h2) packed into one
        # lane-dense (1, 128) row: lanes 0:14 -> out1..5, 14:18 -> out6/out7.
        head = (jnp.dot(sh.astype(jnp.bfloat16), wha_ref[...],
                        preferred_element_type=jnp.float32)
                + jnp.dot(h2.astype(jnp.bfloat16), whb_ref[...],
                          preferred_element_type=jnp.float32)
                + bh_ref[...])
        out_ref[0] = head

    return kernel


def bert_cnn_forward(sequence_output, p):
    B, S, H = sequence_output.shape
    kernel = _make_bert_cnn_kernel(S, H)

    weights = (p["conv_w"], p["conv_b"],
               p["fc1_w"], p["fc1_b"], p["fc1_s"], p["fc1_t"],
               p["fc2_w"], p["fc2_b"], p["fc2_s"], p["fc2_t"],
               p["sh_w"], p["sh_b"], p["sh_s"], p["sh_t"],
               p["wha"], p["whb"], p["bh"])

    def full_spec(a):
        nd = a.ndim
        return pl.BlockSpec(a.shape, lambda b, _nd=nd: (0,) * _nd)

    out = pl.pallas_call(
        kernel,
        out_shape=jax.ShapeDtypeStruct((B, 1, N_HEAD), jnp.float32),
        grid=(B,),
        in_specs=[pl.BlockSpec((1, S, H), lambda b: (b, 0, 0))]
                 + [full_spec(a) for a in weights],
        out_specs=pl.BlockSpec((1, 1, N_HEAD), lambda b: (b, 0, 0)),
        scratch_shapes=[pltpu.VMEM((S + 4, H + 2), jnp.float32)],
        compiler_params=pltpu.CompilerParams(
            dimension_semantics=("parallel",),
            vmem_limit_bytes=32 * 1024 * 1024),
    )(sequence_output, *weights)

    packed = out[:, 0, :]                                    # (B, 128)
    return [packed[:, a:b] for (a, b) in HEAD_SLICES]


# -----------------------------------------------------------------------------
# Deterministic parameter construction (shapes from BERTCNN.__init__)
# -----------------------------------------------------------------------------
def init_params(key):
    ks = iter(jax.random.split(key, 64))

    def uni(shape, bound):
        return jax.random.uniform(next(ks), shape, jnp.float32, -bound, bound)

    p = {}
    # Conv2d(1, 128, (K, 56), padding=1), K=3/4/5, fused along out-channels:
    # conv_w[kh, kw, i*128:(i+1)*128] = torch_weight_K[c, 0, kh, kw], kh slabs
    # beyond K zero-padded so every branch shares the same 5-slab contraction.
    w_slabs, b_slabs = [], []
    for K in KS:
        bound = 1.0 / math.sqrt(1 * K * KW)
        w = uni((K, KW, C_OUT), bound)
        w_slabs.append(jnp.pad(w, ((0, K_MAX - K), (0, 0), (0, 0))))
        b_slabs.append(uni((1, C_OUT), bound))
    p["conv_w"] = jnp.concatenate(w_slabs, axis=2).astype(jnp.bfloat16)  # (5,56,384)
    p["conv_b"] = jnp.concatenate(b_slabs, axis=1)                       # (1,384) f32

    def linear(fan_in, fan_out):
        bound = 1.0 / math.sqrt(fan_in)
        return uni((fan_in, fan_out), bound), uni((1, fan_out), bound)

    def bn_affine(n):
        # eval-mode BatchNorm1d: y = (x - mean)/sqrt(var+eps)*gamma + beta
        gamma = 1.0 + 0.1 * jax.random.uniform(next(ks), (1, n), jnp.float32)
        beta = 0.1 * jax.random.uniform(next(ks), (1, n), jnp.float32)
        mean = 0.1 * jax.random.uniform(next(ks), (1, n), jnp.float32)
        var = 1.0 + 0.1 * jax.random.uniform(next(ks), (1, n), jnp.float32)
        scale = gamma / jnp.sqrt(var + 1e-5)
        shift = beta - mean * scale
        return scale, shift

    D = D_FEAT
    w, b = linear(D, D); p["fc1_w"] = w.astype(jnp.bfloat16); p["fc1_b"] = b
    p["fc1_s"], p["fc1_t"] = bn_affine(D)
    w, b = linear(D, D); p["fc2_w"] = w.astype(jnp.bfloat16); p["fc2_b"] = b
    p["fc2_s"], p["fc2_t"] = bn_affine(D)
    w, b = linear(D, 192); p["sh_w"] = w.astype(jnp.bfloat16); p["sh_b"] = b
    p["sh_s"], p["sh_t"] = bn_affine(192)

    # out1..out5 (192 -> 2,3,3,3,3) and out6/out7 (384 -> 2,2), packed lane-dense
    heads_shared = [linear(192, n) for n in (2, 3, 3, 3, 3)]
    heads_wide = [linear(D, 2) for _ in range(2)]
    wa = jnp.concatenate([w for w, _ in heads_shared], axis=1)   # (192, 14)
    ba = jnp.concatenate([b for _, b in heads_shared], axis=1)   # (1, 14)
    wb = jnp.concatenate([w for w, _ in heads_wide], axis=1)     # (384, 4)
    bb = jnp.concatenate([b for _, b in heads_wide], axis=1)     # (1, 4)
    p["wha"] = jnp.pad(wa, ((0, 0), (0, N_HEAD - 14))).astype(jnp.bfloat16)   # (192,128)
    p["whb"] = jnp.pad(wb, ((0, 0), (14, N_HEAD - 18))).astype(jnp.bfloat16)  # (384,128)
    p["bh"] = jnp.pad(jnp.concatenate([ba, bb], axis=1), ((0, 0), (0, N_HEAD - 18)))
    return p


if __name__ == "__main__":
    # small shapes consistent with the module: conv kernel width is 56, so the
    # embed dim must be >= 54; seq_len must be >= 54 for the max-pool window.
    B, S, H = 2, 56, 56
    key = jax.random.PRNGKey(0)
    k_par, k_ids, k_seq = jax.random.split(key, 3)
    params = init_params(k_par)

    sent_id = jax.random.randint(k_ids, (B, S), 0, 30522)   # unused (see TODO)
    mask = jnp.ones((B, S), jnp.int32)                       # unused (see TODO)
    sequence_output = jax.random.normal(k_seq, (B, S, H), jnp.float32)

    outs = bert_cnn_forward(sequence_output, params)
    outs = jax.block_until_ready(outs)

    expected = [(B, 2), (B, 3), (B, 3), (B, 3), (B, 3), (B, 2), (B, 2)]
    assert [tuple(o.shape) for o in outs] == expected
    assert all(bool(jnp.all(jnp.isfinite(o))) for o in outs)
    print("KERNEL_OK")
</pallas_src>

<mosaic_0001>
module attributes {stable_mosaic.version = 11 : i64} {
  func.func @kernel(%arg0: i32, %arg1: memref<1x56x56xf32, #tpu.memory_space<vmem>>, %arg2: memref<5x56x384xbf16, #tpu.memory_space<vmem>>, %arg3: memref<1x384xf32, #tpu.memory_space<vmem>>, %arg4: memref<384x384xbf16, #tpu.memory_space<vmem>>, %arg5: memref<1x384xf32, #tpu.memory_space<vmem>>, %arg6: memref<1x384xf32, #tpu.memory_space<vmem>>, %arg7: memref<1x384xf32, #tpu.memory_space<vmem>>, %arg8: memref<384x384xbf16, #tpu.memory_space<vmem>>, %arg9: memref<1x384xf32, #tpu.memory_space<vmem>>, %arg10: memref<1x384xf32, #tpu.memory_space<vmem>>, %arg11: memref<1x384xf32, #tpu.memory_space<vmem>>, %arg12: memref<384x192xbf16, #tpu.memory_space<vmem>>, %arg13: memref<1x192xf32, #tpu.memory_space<vmem>>, %arg14: memref<1x192xf32, #tpu.memory_space<vmem>>, %arg15: memref<1x192xf32, #tpu.memory_space<vmem>>, %arg16: memref<192x128xbf16, #tpu.memory_space<vmem>>, %arg17: memref<384x128xbf16, #tpu.memory_space<vmem>>, %arg18: memref<1x128xf32, #tpu.memory_space<vmem>>, %arg19: memref<1x1x128xf32, #tpu.memory_space<vmem>>, %arg20: memref<60x58xf32, #tpu.memory_space<vmem>>) attributes {dimension_semantics = [#tpu.dimension_semantics<parallel>], iteration_bounds = array<i64: 2>, scalar_prefetch = 0 : i64, scratch_operands = 1 : i64, tpu.core_type = #tpu.core_type<tc>, window_params = [{transform_indices = @transform_0, window_bounds = array<i64: 1, 56, 56>}, {pipeline_mode = #tpu.pipeline_mode<synchronous>, transform_indices = @transform_1, window_bounds = array<i64: 5, 56, 384>}, {pipeline_mode = #tpu.pipeline_mode<synchronous>, transform_indices = @transform_2, window_bounds = array<i64: 1, 384>}, {pipeline_mode = #tpu.pipeline_mode<synchronous>, transform_indices = @transform_3, window_bounds = array<i64: 384, 384>}, {pipeline_mode = #tpu.pipeline_mode<synchronous>, transform_indices = @transform_4, window_bounds = array<i64: 1, 384>}, {pipeline_mode = #tpu.pipeline_mode<synchronous>, transform_indices = @transform_5, window_bounds = array<i64: 1, 384>}, {pipeline_mode = #tpu.pipeline_mode<synchronous>, transform_indices = @transform_6, window_bounds = array<i64: 1, 384>}, {pipeline_mode = #tpu.pipeline_mode<synchronous>, transform_indices = @transform_7, window_bounds = array<i64: 384, 384>}, {pipeline_mode = #tpu.pipeline_mode<synchronous>, transform_indices = @transform_8, window_bounds = array<i64: 1, 384>}, {pipeline_mode = #tpu.pipeline_mode<synchronous>, transform_indices = @transform_9, window_bounds = array<i64: 1, 384>}, {pipeline_mode = #tpu.pipeline_mode<synchronous>, transform_indices = @transform_10, window_bounds = array<i64: 1, 384>}, {pipeline_mode = #tpu.pipeline_mode<synchronous>, transform_indices = @transform_11, window_bounds = array<i64: 384, 192>}, {pipeline_mode = #tpu.pipeline_mode<synchronous>, transform_indices = @transform_12, window_bounds = array<i64: 1, 192>}, {pipeline_mode = #tpu.pipeline_mode<synchronous>, transform_indices = @transform_13, window_bounds = array<i64: 1, 192>}, {pipeline_mode = #tpu.pipeline_mode<synchronous>, transform_indices = @transform_14, window_bounds = array<i64: 1, 192>}, {pipeline_mode = #tpu.pipeline_mode<synchronous>, transform_indices = @transform_15, window_bounds = array<i64: 192, 128>}, {pipeline_mode = #tpu.pipeline_mode<synchronous>, transform_indices = @transform_16, window_bounds = array<i64: 384, 128>}, {pipeline_mode = #tpu.pipeline_mode<synchronous>, transform_indices = @transform_17, window_bounds = array<i64: 1, 128>}, {transform_indices = @transform_18, window_bounds = array<i64: 1, 1, 128>}]} {
    %cst = arith.constant 0.000000e+00 : f32
    %0 = vector.broadcast %cst : f32 to vector<60x58xf32>
    %c0 = arith.constant 0 : index
    %c0_0 = arith.constant 0 : index
    %1 = vector.load %arg20[%c0, %c0_0] : memref<60x58xf32, #tpu.memory_space<vmem>>, vector<60x58xf32>
    tpu.vector_store %arg20[%c0, %c0_0], %0 {strides = array<i32>} : memref<60x58xf32, #tpu.memory_space<vmem>>, vector<60x58xf32>,
    %c0_1 = arith.constant 0 : index
    %c0_2 = arith.constant 0 : index
    %c0_3 = arith.constant 0 : index
    %2 = vector.load %arg1[%c0_1, %c0_2, %c0_3] : memref<1x56x56xf32, #tpu.memory_space<vmem>>, vector<1x56x56xf32>
    %3 = vector.shape_cast %2 : vector<1x56x56xf32> to vector<56x56xf32>
    %c1 = arith.constant 1 : index
    %c1_4 = arith.constant 1 : index
    %4 = vector.load %arg20[%c1, %c1_4] : memref<60x58xf32, #tpu.memory_space<vmem>>, vector<56x56xf32>
    tpu.vector_store %arg20[%c1, %c1_4], %3 {strides = array<i32>} : memref<60x58xf32, #tpu.memory_space<vmem>>, vector<56x56xf32>,
    %c0_5 = arith.constant 0 : index
    %c0_6 = arith.constant 0 : index
    %5 = vector.load %arg20[%c0_5, %c0_6] : memref<60x58xf32, #tpu.memory_space<vmem>>, vector<60x58xf32>
    %6 = vector.extract_strided_slice %5 {offsets = [0, 0], sizes = [60, 56], strides = [1, 1]} : vector<60x58xf32> to vector<60x56xf32>
    %7 = vector.extract_strided_slice %5 {offsets = [0, 1], sizes = [60, 56], strides = [1, 1]} : vector<60x58xf32> to vector<60x56xf32>
    %8 = vector.extract_strided_slice %5 {offsets = [0, 2], sizes = [60, 56], strides = [1, 1]} : vector<60x58xf32> to vector<60x56xf32>
    %cst_7 = arith.constant 0.000000e+00 : f32
    %9 = vector.broadcast %cst_7 : f32 to vector<168x384xf32>
    %10 = vector.extract_strided_slice %6 {offsets = [0, 0], sizes = [56, 56], strides = [1, 1]} : vector<60x56xf32> to vector<56x56xf32>
    %11 = vector.extract_strided_slice %7 {offsets = [0, 0], sizes = [56, 56], strides = [1, 1]} : vector<60x56xf32> to vector<56x56xf32>
    %12 = vector.extract_strided_slice %8 {offsets = [0, 0], sizes = [56, 56], strides = [1, 1]} : vector<60x56xf32> to vector<56x56xf32>
    %13 = tpu.concatenate %10, %11, %12 in 0 : vector<56x56xf32>, vector<56x56xf32>, vector<56x56xf32> -> vector<168x56xf32>
    %14 = arith.truncf %13 : vector<168x56xf32> to vector<168x56xbf16>
    %c0_8 = arith.constant 0 : index
    %c0_9 = arith.constant 0 : index
    %c0_10 = arith.constant 0 : index
    %15 = vector.load %arg2[%c0_8, %c0_9, %c0_10] : memref<5x56x384xbf16, #tpu.memory_space<vmem>>, vector<1x56x384xbf16>
    %16 = vector.shape_cast %15 : vector<1x56x384xbf16> to vector<56x384xbf16>
    %cst_11 = arith.constant dense<0.000000e+00> : vector<168x384xf32>
    %17 = tpu.matmul %14, %16, %cst_11 {dimension_numbers = #tpu.dot_dimension_numbers<[1], [0], [0], [1], [0, 0, 1, 1], [], []>} : vector<168x56xbf16>, vector<56x384xbf16>, vector<168x384xf32> -> vector<168x384xf32>
    %18 = arith.addf %9, %17 : vector<168x384xf32>
    %19 = vector.extract_strided_slice %6 {offsets = [1, 0], sizes = [56, 56], strides = [1, 1]} : vector<60x56xf32> to vector<56x56xf32>
    %20 = vector.extract_strided_slice %7 {offsets = [1, 0], sizes = [56, 56], strides = [1, 1]} : vector<60x56xf32> to vector<56x56xf32>
    %21 = vector.extract_strided_slice %8 {offsets = [1, 0], sizes = [56, 56], strides = [1, 1]} : vector<60x56xf32> to vector<56x56xf32>
    %22 = tpu.concatenate %19, %20, %21 in 0 : vector<56x56xf32>, vector<56x56xf32>, vector<56x56xf32> -> vector<168x56xf32>
    %23 = arith.truncf %22 : vector<168x56xf32> to vector<168x56xbf16>
    %c1_12 = arith.constant 1 : index
    %c0_13 = arith.constant 0 : index
    %c0_14 = arith.constant 0 : index
    %24 = vector.load %arg2[%c1_12, %c0_13, %c0_14] : memref<5x56x384xbf16, #tpu.memory_space<vmem>>, vector<1x56x384xbf16>
    %25 = vector.shape_cast %24 : vector<1x56x384xbf16> to vector<56x384xbf16>
    %cst_15 = arith.constant dense<0.000000e+00> : vector<168x384xf32>
    %26 = tpu.matmul %23, %25, %cst_15 {dimension_numbers = #tpu.dot_dimension_numbers<[1], [0], [0], [1], [0, 0, 1, 1], [], []>} : vector<168x56xbf16>, vector<56x384xbf16>, vector<168x384xf32> -> vector<168x384xf32>
    %27 = arith.addf %18, %26 : vector<168x384xf32>
    %28 = vector.extract_strided_slice %6 {offsets = [2, 0], sizes = [56, 56], strides = [1, 1]} : vector<60x56xf32> to vector<56x56xf32>
    %29 = vector.extract_strided_slice %7 {offsets = [2, 0], sizes = [56, 56], strides = [1, 1]} : vector<60x56xf32> to vector<56x56xf32>
    %30 = vector.extract_strided_slice %8 {offsets = [2, 0], sizes = [56, 56], strides = [1, 1]} : vector<60x56xf32> to vector<56x56xf32>
    %31 = tpu.concatenate %28, %29, %30 in 0 : vector<56x56xf32>, vector<56x56xf32>, vector<56x56xf32> -> vector<168x56xf32>
    %32 = arith.truncf %31 : vector<168x56xf32> to vector<168x56xbf16>
    %c2 = arith.constant 2 : index
    %c0_16 = arith.constant 0 : index
    %c0_17 = arith.constant 0 : index
    %33 = vector.load %arg2[%c2, %c0_16, %c0_17] : memref<5x56x384xbf16, #tpu.memory_space<vmem>>, vector<1x56x384xbf16>
    %34 = vector.shape_cast %33 : vector<1x56x384xbf16> to vector<56x384xbf16>
    %cst_18 = arith.constant dense<0.000000e+00> : vector<168x384xf32>
    %35 = tpu.matmul %32, %34, %cst_18 {dimension_numbers = #tpu.dot_dimension_numbers<[1], [0], [0], [1], [0, 0, 1, 1], [], []>} : vector<168x56xbf16>, vector<56x384xbf16>, vector<168x384xf32> -> vector<168x384xf32>
    %36 = arith.addf %27, %35 : vector<168x384xf32>
    %37 = vector.extract_strided_slice %6 {offsets = [3, 0], sizes = [56, 56], strides = [1, 1]} : vector<60x56xf32> to vector<56x56xf32>
    %38 = vector.extract_strided_slice %7 {offsets = [3, 0], sizes = [56, 56], strides = [1, 1]} : vector<60x56xf32> to vector<56x56xf32>
    %39 = vector.extract_strided_slice %8 {offsets = [3, 0], sizes = [56, 56], strides = [1, 1]} : vector<60x56xf32> to vector<56x56xf32>
    %40 = tpu.concatenate %37, %38, %39 in 0 : vector<56x56xf32>, vector<56x56xf32>, vector<56x56xf32> -> vector<168x56xf32>
    %41 = arith.truncf %40 : vector<168x56xf32> to vector<168x56xbf16>
    %c3 = arith.constant 3 : index
    %c0_19 = arith.constant 0 : index
    %c0_20 = arith.constant 0 : index
    %42 = vector.load %arg2[%c3, %c0_19, %c0_20] : memref<5x56x384xbf16, #tpu.memory_space<vmem>>, vector<1x56x384xbf16>
    %43 = vector.shape_cast %42 : vector<1x56x384xbf16> to vector<56x384xbf16>
    %cst_21 = arith.constant dense<0.000000e+00> : vector<168x384xf32>
    %44 = tpu.matmul %41, %43, %cst_21 {dimension_numbers = #tpu.dot_dimension_numbers<[1], [0], [0], [1], [0, 0, 1, 1], [], []>} : vector<168x56xbf16>, vector<56x384xbf16>, vector<168x384xf32> -> vector<168x384xf32>
    %45 = arith.addf %36, %44 : vector<168x384xf32>
    %46 = vector.extract_strided_slice %6 {offsets = [4, 0], sizes = [56, 56], strides = [1, 1]} : vector<60x56xf32> to vector<56x56xf32>
    %47 = vector.extract_strided_slice %7 {offsets = [4, 0], sizes = [56, 56], strides = [1, 1]} : vector<60x56xf32> to vector<56x56xf32>
    %48 = vector.extract_strided_slice %8 {offsets = [4, 0], sizes = [56, 56], strides = [1, 1]} : vector<60x56xf32> to vector<56x56xf32>
    %49 = tpu.concatenate %46, %47, %48 in 0 : vector<56x56xf32>, vector<56x56xf32>, vector<56x56xf32> -> vector<168x56xf32>
    %50 = arith.truncf %49 : vector<168x56xf32> to vector<168x56xbf16>
    %c4 = arith.constant 4 : index
    %c0_22 = arith.constant 0 : index
    %c0_23 = arith.constant 0 : index
    %51 = vector.load %arg2[%c4, %c0_22, %c0_23] : memref<5x56x384xbf16, #tpu.memory_space<vmem>>, vector<1x56x384xbf16>
    %52 = vector.shape_cast %51 : vector<1x56x384xbf16> to vector<56x384xbf16>
    %cst_24 = arith.constant dense<0.000000e+00> : vector<168x384xf32>
    %53 = tpu.matmul %50, %52, %cst_24 {dimension_numbers = #tpu.dot_dimension_numbers<[1], [0], [0], [1], [0, 0, 1, 1], [], []>} : vector<168x56xbf16>, vector<56x384xbf16>, vector<168x384xf32> -> vector<168x384xf32>
    %54 = arith.addf %45, %53 : vector<168x384xf32>
    %c0_25 = arith.constant 0 : index
    %c0_26 = arith.constant 0 : index
    %55 = vector.load %arg3[%c0_25, %c0_26] : memref<1x384xf32, #tpu.memory_space<vmem>>, vector<1x384xf32>
    %56 = vector.broadcast %55 : vector<1x384xf32> to vector<168x384xf32>
    %57 = arith.addf %54, %56 : vector<168x384xf32>
    %cst_27 = arith.constant 0.000000e+00 : f32
    %58 = vector.broadcast %cst_27 : f32 to vector<168x384xf32>
    %59 = arith.maximumf %57, %58 : vector<168x384xf32>
    %cst_28 = arith.constant 0.000000e+00 : f32
    %60 = vector.broadcast %cst_28 : f32 to vector<1x128xf32>
    %61 = vector.extract_strided_slice %59 {offsets = [0, 0], sizes = [54, 128], strides = [1, 1]} : vector<168x384xf32> to vector<54x128xf32>
    %cst_29 = arith.constant dense<0xFF800000> : vector<128xf32>
    %62 = vector.multi_reduction <maximumf>, %61, %cst_29 [0] : vector<54x128xf32> to vector<128xf32>
    %63 = vector.shape_cast %62 : vector<128xf32> to vector<1x128xf32>
    %64 = arith.addf %60, %63 : vector<1x128xf32>
    %65 = vector.extract_strided_slice %59 {offsets = [56, 0], sizes = [54, 128], strides = [1, 1]} : vector<168x384xf32> to vector<54x128xf32>
    %cst_30 = arith.constant dense<0xFF800000> : vector<128xf32>
    %66 = vector.multi_reduction <maximumf>, %65, %cst_30 [0] : vector<54x128xf32> to vector<128xf32>
    %67 = vector.shape_cast %66 : vector<128xf32> to vector<1x128xf32>
    %68 = arith.addf %64, %67 : vector<1x128xf32>
    %69 = vector.extract_strided_slice %59 {offsets = [112, 0], sizes = [54, 128], strides = [1, 1]} : vector<168x384xf32> to vector<54x128xf32>
    %cst_31 = arith.constant dense<0xFF800000> : vector<128xf32>
    %70 = vector.multi_reduction <maximumf>, %69, %cst_31 [0] : vector<54x128xf32> to vector<128xf32>
    %71 = vector.shape_cast %70 : vector<128xf32> to vector<1x128xf32>
    %72 = arith.addf %68, %71 : vector<1x128xf32>
    %cst_32 = arith.constant 0.333333343 : f32
    %73 = vector.broadcast %cst_32 : f32 to vector<1x128xf32>
    %74 = arith.mulf %72, %73 : vector<1x128xf32>
    %cst_33 = arith.constant 0.000000e+00 : f32
    %75 = vector.broadcast %cst_33 : f32 to vector<1x128xf32>
    %76 = vector.extract_strided_slice %59 {offsets = [0, 128], sizes = [53, 128], strides = [1, 1]} : vector<168x384xf32> to vector<53x128xf32>
    %cst_34 = arith.constant dense<0xFF800000> : vector<128xf32>
    %77 = vector.multi_reduction <maximumf>, %76, %cst_34 [0] : vector<53x128xf32> to vector<128xf32>
    %78 = vector.shape_cast %77 : vector<128xf32> to vector<1x128xf32>
    %79 = arith.addf %75, %78 : vector<1x128xf32>
    %80 = vector.extract_strided_slice %59 {offsets = [56, 128], sizes = [53, 128], strides = [1, 1]} : vector<168x384xf32> to vector<53x128xf32>
    %cst_35 = arith.constant dense<0xFF800000> : vector<128xf32>
    %81 = vector.multi_reduction <maximumf>, %80, %cst_35 [0] : vector<53x128xf32> to vector<128xf32>
    %82 = vector.shape_cast %81 : vector<128xf32> to vector<1x128xf32>
    %83 = arith.addf %79, %82 : vector<1x128xf32>
    %84 = vector.extract_strided_slice %59 {offsets = [112, 128], sizes = [53, 128], strides = [1, 1]} : vector<168x384xf32> to vector<53x128xf32>
    %cst_36 = arith.constant dense<0xFF800000> : vector<128xf32>
    %85 = vector.multi_reduction <maximumf>, %84, %cst_36 [0] : vector<53x128xf32> to vector<128xf32>
    %86 = vector.shape_cast %85 : vector<128xf32> to vector<1x128xf32>
    %87 = arith.addf %83, %86 : vector<1x128xf32>
    %cst_37 = arith.constant 0.333333343 : f32
    %88 = vector.broadcast %cst_37 : f32 to vector<1x128xf32>
    %89 = arith.mulf %87, %88 : vector<1x128xf32>
    %cst_38 = arith.constant 0.000000e+00 : f32
    %90 = vector.broadcast %cst_38 : f32 to vector<1x128xf32>
    %91 = vector.extract_strided_slice %59 {offsets = [0, 256], sizes = [52, 128], strides = [1, 1]} : vector<168x384xf32> to vector<52x128xf32>
    %cst_39 = arith.constant dense<0xFF800000> : vector<128xf32>
    %92 = vector.multi_reduction <maximumf>, %91, %cst_39 [0] : vector<52x128xf32> to vector<128xf32>
    %93 = vector.shape_cast %92 : vector<128xf32> to vector<1x128xf32>
    %94 = arith.addf %90, %93 : vector<1x128xf32>
    %95 = vector.extract_strided_slice %59 {offsets = [56, 256], sizes = [52, 128], strides = [1, 1]} : vector<168x384xf32> to vector<52x128xf32>
    %cst_40 = arith.constant dense<0xFF800000> : vector<128xf32>
    %96 = vector.multi_reduction <maximumf>, %95, %cst_40 [0] : vector<52x128xf32> to vector<128xf32>
    %97 = vector.shape_cast %96 : vector<128xf32> to vector<1x128xf32>
    %98 = arith.addf %94, %97 : vector<1x128xf32>
    %99 = vector.extract_strided_slice %59 {offsets = [112, 256], sizes = [52, 128], strides = [1, 1]} : vector<168x384xf32> to vector<52x128xf32>
    %cst_41 = arith.constant dense<0xFF800000> : vector<128xf32>
    %100 = vector.multi_reduction <maximumf>, %99, %cst_41 [0] : vector<52x128xf32> to vector<128xf32>
    %101 = vector.shape_cast %100 : vector<128xf32> to vector<1x128xf32>
    %102 = arith.addf %98, %101 : vector<1x128xf32>
    %cst_42 = arith.constant 0.333333343 : f32
    %103 = vector.broadcast %cst_42 : f32 to vector<1x128xf32>
    %104 = arith.mulf %102, %103 : vector<1x128xf32>
    %105 = tpu.concatenate %74, %89, %104 in 1 : vector<1x128xf32>, vector<1x128xf32>, vector<1x128xf32> -> vector<1x384xf32>
    %106 = arith.truncf %105 : vector<1x384xf32> to vector<1x384xbf16>
    %c0_43 = arith.constant 0 : index
    %c0_44 = arith.constant 0 : index
    %107 = vector.load %arg4[%c0_43, %c0_44] : memref<384x384xbf16, #tpu.memory_space<vmem>>, vector<384x384xbf16>
    %cst_45 = arith.constant dense<0.000000e+00> : vector<1x384xf32>
    %108 = tpu.matmul %106, %107, %cst_45 {dimension_numbers = #tpu.dot_dimension_numbers<[1], [0], [0], [1], [0, 0, 1, 1], [], []>} : vector<1x384xbf16>, vector<384x384xbf16>, vector<1x384xf32> -> vector<1x384xf32>
    %c0_46 = arith.constant 0 : index
    %c0_47 = arith.constant 0 : index
    %109 = vector.load %arg5[%c0_46, %c0_47] : memref<1x384xf32, #tpu.memory_space<vmem>>, vector<1x384xf32>
    %110 = arith.addf %108, %109 : vector<1x384xf32>
    %c0_48 = arith.constant 0 : index
    %c0_49 = arith.constant 0 : index
    %111 = vector.load %arg6[%c0_48, %c0_49] : memref<1x384xf32, #tpu.memory_space<vmem>>, vector<1x384xf32>
    %112 = arith.mulf %110, %111 : vector<1x384xf32>
    %c0_50 = arith.constant 0 : index
    %c0_51 = arith.constant 0 : index
    %113 = vector.load %arg7[%c0_50, %c0_51] : memref<1x384xf32, #tpu.memory_space<vmem>>, vector<1x384xf32>
    %114 = arith.addf %112, %113 : vector<1x384xf32>
    %cst_52 = arith.constant 0.000000e+00 : f32
    %115 = vector.broadcast %cst_52 : f32 to vector<1x384xf32>
    %116 = arith.maximumf %114, %115 : vector<1x384xf32>
    %117 = arith.truncf %116 : vector<1x384xf32> to vector<1x384xbf16>
    %c0_53 = arith.constant 0 : index
    %c0_54 = arith.constant 0 : index
    %118 = vector.load %arg8[%c0_53, %c0_54] : memref<384x384xbf16, #tpu.memory_space<vmem>>, vector<384x384xbf16>
    %cst_55 = arith.constant dense<0.000000e+00> : vector<1x384xf32>
    %119 = tpu.matmul %117, %118, %cst_55 {dimension_numbers = #tpu.dot_dimension_numbers<[1], [0], [0], [1], [0, 0, 1, 1], [], []>} : vector<1x384xbf16>, vector<384x384xbf16>, vector<1x384xf32> -> vector<1x384xf32>
    %c0_56 = arith.constant 0 : index
    %c0_57 = arith.constant 0 : index
    %120 = vector.load %arg9[%c0_56, %c0_57] : memref<1x384xf32, #tpu.memory_space<vmem>>, vector<1x384xf32>
    %121 = arith.addf %119, %120 : vector<1x384xf32>
    %c0_58 = arith.constant 0 : index
    %c0_59 = arith.constant 0 : index
    %122 = vector.load %arg10[%c0_58, %c0_59] : memref<1x384xf32, #tpu.memory_space<vmem>>, vector<1x384xf32>
    %123 = arith.mulf %121, %122 : vector<1x384xf32>
    %c0_60 = arith.constant 0 : index
    %c0_61 = arith.constant 0 : index
    %124 = vector.load %arg11[%c0_60, %c0_61] : memref<1x384xf32, #tpu.memory_space<vmem>>, vector<1x384xf32>
    %125 = arith.addf %123, %124 : vector<1x384xf32>
    %cst_62 = arith.constant 0.000000e+00 : f32
    %126 = vector.broadcast %cst_62 : f32 to vector<1x384xf32>
    %127 = arith.maximumf %125, %126 : vector<1x384xf32>
    %128 = arith.truncf %127 : vector<1x384xf32> to vector<1x384xbf16>
    %c0_63 = arith.constant 0 : index
    %c0_64 = arith.constant 0 : index
    %129 = vector.load %arg12[%c0_63, %c0_64] : memref<384x192xbf16, #tpu.memory_space<vmem>>, vector<384x192xbf16>
    %cst_65 = arith.constant dense<0.000000e+00> : vector<1x192xf32>
    %130 = tpu.matmul %128, %129, %cst_65 {dimension_numbers = #tpu.dot_dimension_numbers<[1], [0], [0], [1], [0, 0, 1, 1], [], []>} : vector<1x384xbf16>, vector<384x192xbf16>, vector<1x192xf32> -> vector<1x192xf32>
    %c0_66 = arith.constant 0 : index
    %c0_67 = arith.constant 0 : index
    %131 = vector.load %arg13[%c0_66, %c0_67] : memref<1x192xf32, #tpu.memory_space<vmem>>, vector<1x192xf32>
    %132 = arith.addf %130, %131 : vector<1x192xf32>
    %c0_68 = arith.constant 0 : index
    %c0_69 = arith.constant 0 : index
    %133 = vector.load %arg14[%c0_68, %c0_69] : memref<1x192xf32, #tpu.memory_space<vmem>>, vector<1x192xf32>
    %134 = arith.mulf %132, %133 : vector<1x192xf32>
    %c0_70 = arith.constant 0 : index
    %c0_71 = arith.constant 0 : index
    %135 = vector.load %arg15[%c0_70, %c0_71] : memref<1x192xf32, #tpu.memory_space<vmem>>, vector<1x192xf32>
    %136 = arith.addf %134, %135 : vector<1x192xf32>
    %cst_72 = arith.constant 0.000000e+00 : f32
    %137 = vector.broadcast %cst_72 : f32 to vector<1x192xf32>
    %138 = arith.maximumf %136, %137 : vector<1x192xf32>
    %139 = arith.truncf %138 : vector<1x192xf32> to vector<1x192xbf16>
    %c0_73 = arith.constant 0 : index
    %c0_74 = arith.constant 0 : index
    %140 = vector.load %arg16[%c0_73, %c0_74] : memref<192x128xbf16, #tpu.memory_space<vmem>>, vector<192x128xbf16>
    %cst_75 = arith.constant dense<0.000000e+00> : vector<1x128xf32>
    %141 = tpu.matmul %139, %140, %cst_75 {dimension_numbers = #tpu.dot_dimension_numbers<[1], [0], [0], [1], [0, 0, 1, 1], [], []>} : vector<1x192xbf16>, vector<192x128xbf16>, vector<1x128xf32> -> vector<1x128xf32>
    %142 = arith.truncf %127 : vector<1x384xf32> to vector<1x384xbf16>
    %c0_76 = arith.constant 0 : index
    %c0_77 = arith.constant 0 : index
    %143 = vector.load %arg17[%c0_76, %c0_77] : memref<384x128xbf16, #tpu.memory_space<vmem>>, vector<384x128xbf16>
    %cst_78 = arith.constant dense<0.000000e+00> : vector<1x128xf32>
    %144 = tpu.matmul %142, %143, %cst_78 {dimension_numbers = #tpu.dot_dimension_numbers<[1], [0], [0], [1], [0, 0, 1, 1], [], []>} : vector<1x384xbf16>, vector<384x128xbf16>, vector<1x128xf32> -> vector<1x128xf32>
    %145 = arith.addf %141, %144 : vector<1x128xf32>
    %c0_79 = arith.constant 0 : index
    %c0_80 = arith.constant 0 : index
    %146 = vector.load %arg18[%c0_79, %c0_80] : memref<1x128xf32, #tpu.memory_space<vmem>>, vector<1x128xf32>
    %147 = arith.addf %145, %146 : vector<1x128xf32>
    %c0_81 = arith.constant 0 : index
    %c0_82 = arith.constant 0 : index
    %c0_83 = arith.constant 0 : index
    %148 = vector.load %arg19[%c0_81, %c0_82, %c0_83] : memref<1x1x128xf32, #tpu.memory_space<vmem>>, vector<1x1x128xf32>
    %149 = vector.shape_cast %148 : vector<1x1x128xf32> to vector<1x128xf32>
    %150 = vector.shape_cast %147 : vector<1x128xf32> to vector<1x1x128xf32>
    tpu.vector_store %arg19[%c0_81, %c0_82, %c0_83], %150 {strides = array<i32>} : memref<1x1x128xf32, #tpu.memory_space<vmem>>, vector<1x1x128xf32>,
    return
  }
  func.func @transform_0(%arg0: i32) -> (i32, i32, i32) {
    %c0_i32 = arith.constant 0 : i32
    %c0_i32_0 = arith.constant 0 : i32
    %c0_i32_1 = arith.constant 0 : i32
    return %arg0, %c0_i32, %c0_i32_0 : i32, i32, i32
  }
  func.func @transform_1(%arg0: i32) -> (i32, i32, i32) {
    %c0_i32 = arith.constant 0 : i32
    %c0_i32_0 = arith.constant 0 : i32
    %c0_i32_1 = arith.constant 0 : i32
    %c0_i32_2 = arith.constant 0 : i32
    return %c0_i32, %c0_i32_0, %c0_i32_1 : i32, i32, i32
  }
  func.func @transform_2(%arg0: i32) -> (i32, i32) {
    %c0_i32 = arith.constant 0 : i32
    %c0_i32_0 = arith.constant 0 : i32
    %c0_i32_1 = arith.constant 0 : i32
    return %c0_i32, %c0_i32_0 : i32, i32
  }
  func.func @transform_3(%arg0: i32) -> (i32, i32) {
    %c0_i32 = arith.constant 0 : i32
    %c0_i32_0 = arith.constant 0 : i32
    %c0_i32_1 = arith.constant 0 : i32
    return %c0_i32, %c0_i32_0 : i32, i32
  }
  func.func @transform_4(%arg0: i32) -> (i32, i32) {
    %c0_i32 = arith.constant 0 : i32
    %c0_i32_0 = arith.constant 0 : i32
    %c0_i32_1 = arith.constant 0 : i32
    return %c0_i32, %c0_i32_0 : i32, i32
  }
  func.func @transform_5(%arg0: i32) -> (i32, i32) {
    %c0_i32 = arith.constant 0 : i32
    %c0_i32_0 = arith.constant 0 : i32
    %c0_i32_1 = arith.constant 0 : i32
    return %c0_i32, %c0_i32_0 : i32, i32
  }
  func.func @transform_6(%arg0: i32) -> (i32, i32) {
    %c0_i32 = arith.constant 0 : i32
    %c0_i32_0 = arith.constant 0 : i32
    %c0_i32_1 = arith.constant 0 : i32
    return %c0_i32, %c0_i32_0 : i32, i32
  }
  func.func @transform_7(%arg0: i32) -> (i32, i32) {
    %c0_i32 = arith.constant 0 : i32
    %c0_i32_0 = arith.constant 0 : i32
    %c0_i32_1 = arith.constant 0 : i32
    return %c0_i32, %c0_i32_0 : i32, i32
  }
  func.func @transform_8(%arg0: i32) -> (i32, i32) {
    %c0_i32 = arith.constant 0 : i32
    %c0_i32_0 = arith.constant 0 : i32
    %c0_i32_1 = arith.constant 0 : i32
    return %c0_i32, %c0_i32_0 : i32, i32
  }
  func.func @transform_9(%arg0: i32) -> (i32, i32) {
    %c0_i32 = arith.constant 0 : i32
    %c0_i32_0 = arith.constant 0 : i32
    %c0_i32_1 = arith.constant 0 : i32
    return %c0_i32, %c0_i32_0 : i32, i32
  }
  func.func @transform_10(%arg0: i32) -> (i32, i32) {
    %c0_i32 = arith.constant 0 : i32
    %c0_i32_0 = arith.constant 0 : i32
    %c0_i32_1 = arith.constant 0 : i32
    return %c0_i32, %c0_i32_0 : i32, i32
  }
  func.func @transform_11(%arg0: i32) -> (i32, i32) {
    %c0_i32 = arith.constant 0 : i32
    %c0_i32_0 = arith.constant 0 : i32
    %c0_i32_1 = arith.constant 0 : i32
    return %c0_i32, %c0_i32_0 : i32, i32
  }
  func.func @transform_12(%arg0: i32) -> (i32, i32) {
    %c0_i32 = arith.constant 0 : i32
    %c0_i32_0 = arith.constant 0 : i32
    %c0_i32_1 = arith.constant 0 : i32
    return %c0_i32, %c0_i32_0 : i32, i32
  }
  func.func @transform_13(%arg0: i32) -> (i32, i32) {
    %c0_i32 = arith.constant 0 : i32
    %c0_i32_0 = arith.constant 0 : i32
    %c0_i32_1 = arith.constant 0 : i32
    return %c0_i32, %c0_i32_0 : i32, i32
  }
  func.func @transform_14(%arg0: i32) -> (i32, i32) {
    %c0_i32 = arith.constant 0 : i32
    %c0_i32_0 = arith.constant 0 : i32
    %c0_i32_1 = arith.constant 0 : i32
    return %c0_i32, %c0_i32_0 : i32, i32
  }
  func.func @transform_15(%arg0: i32) -> (i32, i32) {
    %c0_i32 = arith.constant 0 : i32
    %c0_i32_0 = arith.constant 0 : i32
    %c0_i32_1 = arith.constant 0 : i32
    return %c0_i32, %c0_i32_0 : i32, i32
  }
  func.func @transform_16(%arg0: i32) -> (i32, i32) {
    %c0_i32 = arith.constant 0 : i32
    %c0_i32_0 = arith.constant 0 : i32
    %c0_i32_1 = arith.constant 0 : i32
    return %c0_i32, %c0_i32_0 : i32, i32
  }
  func.func @transform_17(%arg0: i32) -> (i32, i32) {
    %c0_i32 = arith.constant 0 : i32
    %c0_i32_0 = arith.constant 0 : i32
    %c0_i32_1 = arith.constant 0 : i32
    return %c0_i32, %c0_i32_0 : i32, i32
  }
  func.func @transform_18(%arg0: i32) -> (i32, i32, i32) {
    %c0_i32 = arith.constant 0 : i32
    %c0_i32_0 = arith.constant 0 : i32
    %c0_i32_1 = arith.constant 0 : i32
    return %arg0, %c0_i32, %c0_i32_0 : i32, i32, i32
  }
}

</mosaic_0001>

<bundles_post_ra>
// kernel: tpu_custom_call.1
= control target key start
LH: loop header
LB: loop body
LE: loop exit
PB: predicated region body
PF: predicated region fallthrough
CT: control target
= control target key end

     0   :  { %s9802_s0 = inlined_call_operand.hbm [shape: f32[2,56,56], index: 0, kind: input, shape index: {}]   ;;  %s9803_s1 = inlined_call_operand.hbm [shape: bf16[5,56,384], index: 1, kind: input, shape index: {}]   ;;  %s9804_s2 = inlined_call_operand.vmem [shape: f32[1,384], index: 2, kind: input, shape index: {}]   ;;  %s9805_s3 = inlined_call_operand.vmem [shape: bf16[384,384], index: 3, kind: input, shape index: {}]   ;;  %s9806_s4 = inlined_call_operand.vmem [shape: f32[1,384], index: 4, kind: input, shape index: {}]   ;;  %s9807_s5 = inlined_call_operand.vmem [shape: f32[1,384], index: 5, kind: input, shape index: {}]   ;;  %s9808_s6 = inlined_call_operand.vmem [shape: f32[1,384], index: 6, kind: input, shape index: {}]   ;;  %s9809_s7 = inlined_call_operand.hbm [shape: bf16[384,384], index: 7, kind: input, shape index: {}]   ;;  %s9810_s8 = inlined_call_operand.vmem [shape: f32[1,384], index: 8, kind: input, shape index: {}]   ;;  %s9811_s9 = inlined_call_operand.vmem [shape: f32[1,384], index: 9, kind: input, shape index: {}]   ;;  %s9812_s10 = inlined_call_operand.vmem [shape: f32[1,384], index: 10, kind: input, shape index: {}]   ;;  %s9813_s11 = inlined_call_operand.vmem [shape: bf16[384,192], index: 11, kind: input, shape index: {}]   ;;  %s9814_s12 = inlined_call_operand.vmem [shape: f32[1,192], index: 12, kind: input, shape index: {}]   ;;  %s9815_s13 = inlined_call_operand.vmem [shape: f32[1,192], index: 13, kind: input, shape index: {}]   ;;  %s9816_s14 = inlined_call_operand.vmem [shape: f32[1,192], index: 14, kind: input, shape index: {}]   ;;  %s9817_s15 = inlined_call_operand.vmem [shape: bf16[192,128], index: 15, kind: input, shape index: {}]   ;;  %s9818_s16 = inlined_call_operand.hbm [shape: bf16[384,128], index: 16, kind: input, shape index: {}]   ;;  %s9819_s17 = inlined_call_operand.vmem [shape: f32[1,128], index: 17, kind: input, shape index: {}]   ;;  %s9820_s18 = inlined_call_operand.hbm [shape: f32[2,1,128], index: 18, kind: output, shape index: {}]  }
   0x1   :  { %9838 = sst [smem:[#allocation23_spill]] %s9802_s0 }
   0x2   :  { %9839 = sst [smem:[#allocation24_spill]] %s9803_s1 }
   0x3   :  { %9840 = sst [smem:[#allocation25_spill]] %s9804_s2 }
   0x4   :  { %9841 = sst [smem:[#allocation26_spill]] %s9809_s7 }
   0x5   :  { %9842 = sst [smem:[#allocation27_spill]] %s9811_s9 }
   0x6   :  { %9843 = sst [smem:[#allocation28_spill]] %s9812_s10 }
   0x7   :  { %9844 = sst [smem:[#allocation29_spill]] %s9814_s12 }
   0x8   :  { %9845 = sst [smem:[#allocation30_spill]] %s9815_s13 }
   0x9   :  { %9846 = sst [smem:[#allocation31_spill]] %s9816_s14 }
   0xa   :  { %9847 = sst [smem:[#allocation32_spill]] %s9817_s15 }
   0xb   :  { %9848 = sst [smem:[#allocation33_spill]] %s9819_s17 }
   0xc   :  { %9849 = sst [smem:[#allocation34_spill]] %s9820_s18 }
   0xd   :  { %23 = vsyncpa [#allocation4], 0 }
   0xe   :  { %25 = vsyncpa [#allocation4 + $0x1], 0 }
   0xf   :  { %26 = vsyncpa [#allocation7], 0 }
  0x10   :  { %27 = vsyncpa [#allocation10], 0 }
  0x11   :  { %28 = vsyncpa [#allocation5], 0 }
  0x12   :  { %30 = vsyncpa [#allocation5 + $0x1], 0  ;;  %s7756_s27 = smov 0   ;;  %s7758_s28 = smov 0  }
  0x13   :  { %s7760_s29 = smov 0   ;;  %s7762_s30 = smov 0  }
  0x14 LB: > { %9850 = sst [smem:[#allocation16_spill]] %s7630_s27  ;;  %s7777_s0 = sadd.s32 4294967295, %s7642_s30   ;;  %s7642_s30 = sphi %s7762_s30, %s9899_s30   ;;  %s7638_s29 = sphi %s7760_s29, %s9898_s29   ;;  %s7634_s28 = sphi %s7758_s28, %s9897_s28   ;;  %s7630_s27 = sphi %s7756_s27, %s9896_s27  }
  0x15   : > { %s5745_s19 = sadd.s32 4294967294, %s7642_s30   ;;  %p56_p0 = scmp.ne.s32.totalorder %s7634_s28, %s7630_s27 }
  0x16   : > { %p9826_p1 = scmp.eq.s32.totalorder %s7777_s0, 0  ;;  %p443_p3 = scmp.eq.s32.totalorder %s5745_s19, 1 }
  0x17   : > { %p5746_p5 = scmp.ge.s32.totalorder %s7642_s30, 1  ;;  %p450_p7 = scmp.lt.s32.totalorder %s7642_s30, 3 }
  0x18   : > { %p7786_p4 = por %p9826_p1, %p56_p0  ;;  %p7791_p6 = por %p443_p3, %p56_p0 }
  0x19   : > { %p7796_p8 = pnand %p5746_p5, %p450_p7  ;;  %s7644_s22 = smov [#allocation6]  }
  0x1a   : > { %s9851_s1 = scalar_select %p7786_p4, 1, 0 }
  0x1b   : > { %s9852_s20 = scalar_select %p7791_p6, 1, 0 }
  0x1c   : > { %s9854_s21 = scalar_select %p7796_p8, 1, 0 }
  0x1d   : > { %9853 = sst [smem:[#allocation17_spill]] %s9852_s20  ;;  %s462_s2 = sshll.u32 %s7644_s22, 4  ;;  %s7800_s2 = int_to_ptr.vmem [resolvable:$true] %s462_s2 }
  0x1e   : > { %p6856_p9 = pneg %p7796_p8  ;;  %s7645_s24 = smov [#allocation8]  }
  0x1f   : > { %s490_s25 = sshll.u32 %s7645_s24, 4  ;;  %s7646_s26 = smov [#allocation9]   ;;  %s7811_s25 = int_to_ptr.vmem [resolvable:$true] %s490_s25 }
  0x20   : > { %p7807_p11 = pnand %p6856_p9, %p9826_p1  ;;  %s7813_s19 = sshll.u32 %s7646_s26, 4  ;;  %s528_s19 = int_to_ptr.vmem [resolvable:$true] %s7813_s19 }
  0x21   : > { %s9856_s27 = sld [smem:[#allocation24_spill]] }
  0x22   : > { %p7823_p13 = pneg %p7807_p11 }
  0x27   : > { %s9857_s18 = smov %s9856_s27  ;;  %s7454_s17 = scalar_lea.hbm %s9856_s27, 6720 }
  0x28   : > { %p7455_p12 = scmp.ne.s32.totalorder %s9857_s18, %s7454_s17  ;;  %p7461_p5 = scmp.lt.u32.totalorder %s7454_s17, %s9857_s18 }
  0x2a   : > { %p7457_p0 = pnand %p7823_p13, %p7455_p12 }
  0x2c   : > { %p7458_p3 = pneg %p7457_p0 }
  0x2e   : > { %p7463_p7 = pnand %p7461_p5, %p7458_p3 }
  0x30   : > { %7466 = shalt.err (!%p7463_p7)
}
  0x31   : > { %s7467_s13 = scalar_lea.vmem %s7800_s2, 6720  ;;  %p7475_p2 = scmp.lt.s32.totalorder %s7800_s2, %s7800_s2 }
  0x32   : > { %p7468_p9 = scmp.ne.s32.totalorder %s7800_s2, %s7467_s13  ;;  %p7476_p6 = scmp.lt.s32.totalorder %s7467_s13, %s7467_s13 }
  0x34   : > { %p7470_p10 = pnand %p7468_p9, %p7823_p13  ;;  %p7477_p12 = por %p7476_p6, %p7475_p2 }
  0x36   : > { %p7471_p1 = pneg %p7470_p10 }
  0x38   : > { %p7478_p0 = pnand %p7477_p12, %p7471_p1 }
  0x3a   : > { %7481 = shalt.err (!%p7478_p0)
}
  0x3b   : > { %s7647_s14 = smov 192   ;;  %s7648_s17 = smov 12  }
  0x3c   : > { %6859 = dma.hbm_to_vmem [thread:$0]  (!%p7807_p11), %s9857_s18, 6720, %s7800_s2, [#allocation7], %s7647_s14, %s7647_s14, %s7648_s17  }
  0x3d   : > { %s9859_s7 = sld [smem:[#allocation26_spill]] }
  0x43   : > { %s7482_s26 = scalar_lea.hbm %s9859_s7, 9216 }
  0x44   : > { %p7483_p2 = scmp.ne.s32.totalorder %s9859_s7, %s7482_s26  ;;  %p7489_p10 = scmp.lt.u32.totalorder %s7482_s26, %s9859_s7 }
  0x46   : > { %p7485_p1 = pnand %p7483_p2, %p7823_p13 }
  0x48   : > { %p7486_p6 = pneg %p7485_p1 }
  0x4a   : > { %p7491_p3 = pnand %p7489_p10, %p7486_p6 }
  0x4c   : > { %7494 = shalt.err (!%p7491_p3)
}
  0x4d   : > { %s7495_s2 = scalar_lea.vmem %s7811_s25, 9216  ;;  %p7503_p12 = scmp.lt.s32.totalorder %s7811_s25, %s7811_s25 }
  0x4e   : > { %p7496_p5 = scmp.ne.s32.totalorder %s7811_s25, %s7495_s2  ;;  %p7504_p0 = scmp.lt.s32.totalorder %s7495_s2, %s7495_s2 }
  0x50   : > { %p7498_p7 = pnand %p7496_p5, %p7823_p13  ;;  %p7505_p2 = por %p7504_p0, %p7503_p12 }
  0x52   : > { %p7499_p9 = pneg %p7498_p7 }
  0x54   : > { %p7506_p1 = pnand %p7505_p2, %p7499_p9 }
  0x56   : > { %7509 = shalt.err (!%p7506_p1)
}
  0x57   : > { %6862 = dma.hbm_to_vmem [thread:$0]  (!%p7807_p11), %s9859_s7, 9216, %s7811_s25, [#allocation7], %s7647_s14, %s7647_s14, %s7648_s17  }
  0x58   : > { %s7510_s20 = scalar_lea.hbm %s9818_s16, 3072 }
  0x59   : > { %p7511_p6 = scmp.ne.s32.totalorder %s9818_s16, %s7510_s20  ;;  %p7517_p5 = scmp.lt.u32.totalorder %s7510_s20, %s9818_s16 }
  0x5b   : > { %p7513_p10 = pnand %p7511_p6, %p7823_p13 }
  0x5d   : > { %p7514_p3 = pneg %p7513_p10 }
  0x5f   : > { %p7519_p7 = pnand %p7517_p5, %p7514_p3 }
  0x61   : > { %7522 = shalt.err (!%p7519_p7)
}
  0x62   : > { %s7523_s2 = scalar_lea.vmem %s528_s19, 3072  ;;  %p7531_p2 = scmp.lt.s32.totalorder %s528_s19, %s528_s19 }
  0x63   : > { %p7524_p9 = scmp.ne.s32.totalorder %s528_s19, %s7523_s2  ;;  %p7532_p1 = scmp.lt.s32.totalorder %s7523_s2, %s7523_s2 }
  0x65   : > { %p7526_p12 = pnand %p7524_p9, %p7823_p13  ;;  %p7533_p4 = por %p7532_p1, %p7531_p2 }
  0x67   : > { %p7527_p0 = pneg %p7526_p12 }
  0x69   : > { %p7534_p8 = pnand %p7533_p4, %p7527_p0 }
  0x6b   : > { %7537 = shalt.err (!%p7534_p8)
}
  0x6c   : > { %s7649_s25 = smov 64   ;;  %s7650_s12 = smov 4  }
  0x6d   : > { %6865 = dma.hbm_to_vmem [thread:$0]  (!%p7807_p11), %s9818_s16, 3072, %s528_s19, [#allocation10], %s7649_s25, %s7649_s25, %s7650_s12  }
  0x6e   : > { %s7887_s9 = sadd.s32 1, %s7642_s30   ;;  %s43_s15 = sadd.s32 1, %s7638_s29 }
  0x6f   : > { %s40_s10 = ssub.s32 %s7642_s30, %s7887_s9  ;;  %p50_p8 = scmp.ne.s32.totalorder %s7638_s29, %s7634_s28 }
  0x70   : > { %p41_p4 = scmp.eq.s32.totalorder %s40_s10, 0  ;;  %p51_p13 = scmp.eq.s32.totalorder %s7642_s30, 0 }
  0x71   : > { %p6877_p6 = scmp.lt.s32.totalorder %s7642_s30, 2  ;;  %p9860_p3 = scmp.eq.s32.totalorder %s7777_s0, 1 }
  0x72   : > { %s7897_s27 = scalar_select %p41_p4, %s7638_s29, %s43_s15  }
  0x73   : > { %p52_p10 = por %p51_p13, %p50_p8  ;;  %p7901_p5 = por %p9860_p3, %p50_p8 }
  0x74   : > { %s544_s23 = sand.u32 1, %s7638_s29   ;;  %s6838_s22 = smul.u32 896, %s7642_s30 }
  0x75   : > { %s6837_s19 = smul.u32 56, %s544_s23  ;;  %s9862_s13 = sld [smem:[#allocation23_spill]] }
  0x76   : > { %p7912_p11 = pnand %p6877_p6, %p52_p10  ;;  %s7918_s17 = scalar_lea.sflag [#allocation4], %s544_s23 }
  0x77   : > { %s548_s12 = scalar_lea.vmem [#allocation3], %s6837_s19 }
  0x78   : > { %s555_s14 = sshll.u32 %s548_s12, 4  ;;  %p7540_p9 = pneg %p7912_p11  ;;  %s7916_s14 = int_to_ptr.vmem [resolvable:$true] %s555_s14 }
  0x7b   : > { %s7910_s2 = scalar_lea.hbm %s9862_s13, %s6838_s22  ;;  %s7543_s24 = scalar_lea.hbm %s9862_s13, 1792 }
  0x7c   : > { %s7538_s10 = scalar_lea.hbm %s7910_s2, 896  ;;  %p7544_p2 = scmp.lt.u32.totalorder %s7910_s2, %s9862_s13 }
  0x7d   : > { %p7539_p7 = scmp.ne.s32.totalorder %s7910_s2, %s7538_s10  ;;  %p7545_p1 = scmp.lt.u32.totalorder %s7543_s24, %s7538_s10 }
  0x7e   : > { %p7547_p8 = scmp.lt.u32.totalorder %s7538_s10, %s7910_s2 }
  0x7f   : > { %p7541_p12 = pnand %p7540_p9, %p7539_p7  ;;  %p7546_p4 = por %p7545_p1, %p7544_p2 }
  0x81   : > { %p7542_p0 = pneg %p7541_p12  ;;  %p7548_p13 = por %p7547_p8, %p7546_p4 }
  0x83   : > { %p7549_p6 = pnand %p7548_p13, %p7542_p0 }
  0x85   : > { %7552 = shalt.err (!%p7549_p6)
}
  0x86   : > { %s7553_s23 = scalar_lea.vmem %s7916_s14, 896  ;;  %s7651_s19 = smov [#allocation3]  }
  0x87   : > { %p7554_p10 = scmp.ne.s32.totalorder %s7916_s14, %s7553_s23  ;;  %s7558_s12 = sshll.u32 %s7651_s19, 4  ;;  %s7559_s12 = int_to_ptr.vmem [resolvable:$false] %s7558_s12 }
  0x88   : > { %s7560_s7 = scalar_lea.vmem %s7559_s12, 1792  ;;  %p7561_p12 = scmp.lt.s32.totalorder %s7916_s14, %s7559_s12 }
  0x89   : > { %p7556_p3 = pnand %p7554_p10, %p7540_p9  ;;  %p7562_p2 = scmp.lt.s32.totalorder %s7560_s7, %s7553_s23 }
  0x8b   : > { %p7557_p7 = pneg %p7556_p3  ;;  %p7563_p1 = por %p7562_p2, %p7561_p12 }
  0x8d   : > { %p7564_p4 = pnand %p7563_p1, %p7557_p7 }
  0x8f   : > { %7567 = shalt.err (!%p7564_p4)
}
  0x90   : > { %s7652_s10 = smov 128   ;;  %s7653_s15 = smov 8  }
  0x91   : > { %6869 = dma.hbm_to_vmem [thread:$0]  (!%p7912_p11), %s7910_s2, 896, %s7916_s14, %s7918_s17, %s7652_s10, %s7652_s10, %s7653_s15  }
  0x92   : > { %p9864_p9 = scmp.ne.s32.totalorder %s9854_s21, 0 }
  0x94   : > { %567 = sbr.rel (%p9864_p9) target bundleno = 2085 (0x825), region = 92 }
  0x9b   : > { %s7949_s22 = sand.u32 1, %s7634_s28   ;;  %p9865_p0 = scmp.ne.s32.totalorder %s9851_s1, 0 }
  0x9c   : > { %s6839_s24 = smul.u32 56, %s7949_s22  ;;  %s570_s26 = scalar_lea.sflag [#allocation4], %s7949_s22 }
  0x9e   : > { %s7953_s23 = scalar_lea.vmem [#allocation3], %s6839_s24 }
  0x9f   : > { %7613 = dma.done.wait (%p9865_p0), %s570_s26, 896  }
  0xa0   : > { %7615 = vsyncadd (%p9865_p0), %s570_s26, 4294966400  ;;  %p9866_p11 = scmp.eq.s32.totalorder %s7777_s0, 0 }
  0xa2   : > { %7617 = dma.done.wait (%p9866_p11), [#allocation7], 15936   ;;  %p9867_p8 = pmov %p9866_p11 }
  0xa4   : > { %7619 = vsyncadd (%p9867_p8), [#allocation7], 4294951360  ;;  %p9868_p13 = pmov %p9867_p8 }
  0xa5   : > { %p9869_p6 = pmov %p9867_p8 }
  0xa6   : > { %7621 = dma.done.wait (%p9868_p13), [#allocation10], 3072  }
  0xa7   : > { %7623 = vsyncadd (%p9869_p6), [#allocation10], 4294964224  ;;  %vm638_vm0 = vcmask 474112   ;;  %v9832_v0 = vmov 0.0   ;;  %vm646_vm1 = vcmask 470016   ;;  %v651_v1 = vld [vmem:[%s7953_s23 + $0x18] sm:$0xff] }
  0xa8   : > { %642 = vst.msk [vmem:[#allocation2 + $0x18] sm:$0xff] %vm638_vm0, %v9832_v0  ;;  %643 = vst.msk [vmem:[#allocation2 + $0x20] sm:$0xff] %vm638_vm0, %v9832_v0  ;;  %v649_v2 = vld [vmem:[%s7953_s23 + $0x8] sm:$0xff]  ;;  %s7655_s1 = smov 1   ;;  %v652_v3 = vld [vmem:[%s7953_s23 + $0x20] sm:$0xff]  ;;  %v9830_v15 = vmov 0  }
  0xa9   : > { %639 = vst.msk [vmem:[#allocation2] sm:$0xff] %vm638_vm0, %v9832_v0  ;;  %640 = vst.msk [vmem:[#allocation2 + $0x8] sm:$0xff] %vm638_vm0, %v9832_v0  ;;  %668 = vrot.lane.b32.xlu1 %v651_v1, %s7655_s1  ;;  %664 = vrot.lane.b32.xlu0 %v649_v2, %s7655_s1  ;;  %v650_v4 = vld [vmem:[%s7953_s23 + $0x10] sm:$0xff]  ;;  %v653_v9 = vld [vmem:[%s7953_s23 + $0x28] sm:$0xff]  ;;  %vm955_vm2 = vcmask 1043456   ;;  %vm683_vm3 = vcmask 465928  }
  0xaa   : > { %641 = vst.msk [vmem:[#allocation2 + $0x10] sm:$0xff] %vm638_vm0, %v9832_v0  ;;  %644 = vst.msk [vmem:[#allocation2 + $0x28] sm:$0xff] %vm638_vm0, %v9832_v0  ;;  %v7079_v5 = vld [vmem:[#allocation6 + $0x58] ss:$12 sps:$4 sm:$0xff]   ;;  %v7081_v6 = vld [vmem:[#allocation6 + $0x54] ss:$12 sps:$4 sm:$0xff]   ;;  %997 = vmatprep.mubr.bf16.mxu0 %v9830_v15  ;;  %1077 = vmatprep.mubr.bf16.mxu1 %v9830_v15 }
  0xab   : > { %645 = vst.msk [vmem:[#allocation2 + $0x30] sm:$0xff] %vm638_vm0, %v9832_v0  ;;  %v654_v7 = vld [vmem:[%s7953_s23 + $0x30] sm:$0xff]  ;;  %965 = vmatprep.subr.bf16.mxu0 %v7079_v5  ;;  %v7085_v11 = vld [vmem:[#allocation6 + $0x88] ss:$12 sps:$4 sm:$0xff]   ;;  %6651 = vmatprep.subr.bf16.mxu1 %v7079_v5  ;;  %vm774_vm4 = vcmask 1046528   ;;  %s7657_s21 = smov 126  }
  0xac   : > { %647 = vst.msk [vmem:[#allocation2 + $0x38] sm:$0xf] %vm646_vm1, %v9832_v0  ;;  %v7082_v8 = vld [vmem:[#allocation6 + $0x70] ss:$12 sps:$4 sm:$0xff]   ;;  %v7084_v10 = vld [vmem:[#allocation6 + $0x6c] ss:$12 sps:$4 sm:$0xff]   ;;  %966 = vmatpush1.bf16.msra.mxu0 %v7081_v6  ;;  %6655 = vmatpush1.bf16.msra.mxu1 %v7081_v6 }
  0xad   : > { %670 = vrot.lane.b32.xlu1 %v652_v3, %s7655_s1  ;;  %666 = vrot.lane.b32.xlu0 %v650_v4, %s7655_s1  ;;  %v648_v12 = vld [vmem:[%s7953_s23] sm:$0xff]  ;;  %v863_v14 = vld [vmem:[#allocation6 + $0x9c] sm:$0xff]  ;;  %vm1585_vm5 = vcmask 1045504   ;;  %vm2098_vm6 = vcmask 1044480   ;;  %vm921_vm7 = vcmask 457728   ;;  %s7658_s2 = smov 127  }
  0xae   : > { %967 = vmatprep.subr.bf16.mxu0 %v7082_v8  ;;  %6652 = vmatprep.subr.bf16.mxu1 %v7082_v8  ;;  %v7087_v13 = vld [vmem:[#allocation6 + $0x84] ss:$12 sps:$4 sm:$0xff]   ;;  %v5766_v16 = vcombine.high %v863_v14, %v863_v14  ;;  %v5765_v17 = vcombine.low %v863_v14, %v863_v14  ;;  %v7093_v59 = vld [vmem:[#allocation6] ss:$12 sps:$4 sm:$0xff]   ;;  %vm7659_vm8 = vmmov 0   ;;  %s9871_s25 = sld [smem:[#allocation25_spill]] }
  0xaf   : > { %v7095_v54 = vld [vmem:[#allocation6 + $0x4] ss:$12 sps:$4 sm:$0xff]   ;;  %s9884_s17 = sld [smem:[#allocation28_spill]]  ;;  %s9885_s15 = sld [smem:[#allocation32_spill]]  ;;  %vm5590_vm9 = vcmask 523264  }
  0xb0   : > { %968 = vmatpush1.bf16.msra.mxu0 %v7084_v10  ;;  %6656 = vmatpush1.bf16.msra.mxu1 %v7084_v10  ;;  %v957_v18 = vsel %vm955_vm2, %v5765_v17, 0  ;;  %s9886_s7 = sld [smem:[#allocation29_spill]]  ;;  %s9887_s26 = sld [smem:[#allocation30_spill]] }
  0xb1   : > { %674 = vrot.lane.b32.xlu1 %v654_v7, %s7655_s1  ;;  %672 = vrot.lane.b32.xlu0 %v653_v9, %s7655_s1  ;;  %s9889_s14 = sld [smem:[#allocation33_spill]]  ;;  %s636_s19 = scalar_lea.vmem [#allocation11], %s7949_s22 }
  0xb2   : > { %969 = vmatprep.subr.bf16.mxu0 %v7085_v11  ;;  %6653 = vmatprep.subr.bf16.mxu1 %v7085_v11  ;;  %s5650_s12 = sshll.u32 %s636_s19, 4  ;;  %s9890_s24 = sld [smem:[#allocation34_spill]]  ;;  %s9760_s12 = int_to_ptr.vmem [resolvable:$true] %s5650_s12 }
  0xb3   : > { %s5638_s23 = scalar_lea.sflag [#allocation5], %s7949_s22 }
  0xb4   : > { %970 = vmatpush1.bf16.msra.mxu0 %v7087_v13  ;;  %6657 = vmatpush1.bf16.msra.mxu1 %v7087_v13 }
  0xb5   : > { %662 = vrot.lane.b32.xlu0 %v648_v12, %s7655_s1  ;;  %5768 = vmatprep.subr.msk.bf16.mxu0 %vm955_vm2, %v5766_v16  ;;  %s7660_s1 = smov [#allocation11]  }
  0xb6   : > { %6654 = vmatprep.subr.msk.bf16.mxu1 %vm955_vm2, %v5766_v16 }
  0xb8   : > { %972 = vmatpush1.bf16.msra.mxu0 %v957_v18  ;;  %6658 = vmatpush1.bf16.msra.mxu1 %v957_v18 }
  0xb9   : > { %6331 = vmatprep.subr.bf16.mxu1 %v9832_v0  ;;  %1324 = vmatprep.subr.bf16.mxu0 %v7095_v54 }
 0x11b   : > { %v669_v19 = vpop.permute.xlu1 %668  ;;  %v665_v20 = vpop.permute.xlu0 %664 }
 0x11c   : > { %687 = vst.msk [vmem:[#allocation2 + $0x19] sm:$0xff] %vm683_vm3, %v669_v19  ;;  %685 = vst.msk [vmem:[#allocation2 + $0x9] sm:$0xff] %vm683_vm3, %v665_v20 }
 0x11f   : > { %v671_v21 = vpop.permute.xlu1 %670  ;;  %v667_v22 = vpop.permute.xlu0 %666 }
 0x120   : > { %688 = vst.msk [vmem:[#allocation2 + $0x21] sm:$0xff] %vm683_vm3, %v671_v21  ;;  %686 = vst.msk [vmem:[#allocation2 + $0x11] sm:$0xff] %vm683_vm3, %v667_v22 }
 0x123   : > { %v675_v23 = vpop.permute.xlu1 %674  ;;  %v673_v24 = vpop.permute.xlu0 %672 }
 0x124   : > { %690 = vst.msk [vmem:[#allocation2 + $0x31] sm:$0xff] %vm683_vm3, %v675_v23  ;;  %689 = vst.msk [vmem:[#allocation2 + $0x29] sm:$0xff] %vm683_vm3, %v673_v24 }
 0x127   : > { %v663_v25 = vpop.permute.xlu0 %662  ;;  %v8001_v26 = vld [vmem:[#allocation2 + $0x10] sm:$0xff]  ;;  %v8003_v27 = vld [vmem:[#allocation2 + $0x18] sm:$0xff]  ;;  %v8005_v28 = vld [vmem:[#allocation2 + $0x20] sm:$0xff] }
 0x128   : > { %684 = vst.msk [vmem:[#allocation2 + $0x1] sm:$0xff] %vm683_vm3, %v663_v25  ;;  %v778_v29 = vrot.slane %v8001_v26, 1  ;;  %v780_v30 = vrot.slane %v8003_v27, 1  ;;  %v782_v31 = vrot.slane %v8005_v28, 1  ;;  %v1589_v53 = vrot.slane %v8001_v26, 2 }
 0x129   : > { %v1591_v58 = vrot.slane %v8003_v27, 2  ;;  %v1593_v61 = vrot.slane %v8005_v28, 2  ;;  %v2102_v63 = vrot.slane %v8001_v26, 3  ;;  %v6964_v7 = vpack.i.bf16 %v8005_v28, %v8003_v27 }
 0x12a   : > { %v781_v32 = vsel %vm774_vm4, %v778_v29, %v780_v30  ;;  %v783_v33 = vsel %vm774_vm4, %v780_v30, %v782_v31  ;;  %v2104_v8 = vrot.slane %v8003_v27, 3  ;;  %v2106_v17 = vrot.slane %v8005_v28, 3 }
 0x12b   : > { %v6929_v34 = vpack.i.bf16 %v783_v33, %v781_v32  ;;  %v8013_v35 = vld [vmem:[#allocation2 + $0x28] sm:$0xff]  ;;  %v8015_v36 = vld [vmem:[#allocation2 + $0x30] sm:$0xff]  ;;  %v8017_v37 = vld [vmem:[#allocation2 + $0x38] sm:$0xf]  ;;  %v8073_v6 = vpack.c.bf16 %v783_v33, %v781_v32  ;;  %v8088_v13 = vsel %vm1585_vm5, %v1591_v58, %v1593_v61  ;;  %v8091_v14 = vsel %vm1585_vm5, %v1589_v53, %v1591_v58 }
 0x12c   : > { %v784_v38 = vrot.slane %v8013_v35, 1  ;;  %v786_v39 = vrot.slane %v8015_v36, 1  ;;  %v788_v40 = vrot.slane %v8017_v37, 1  ;;  %v1595_v2 = vrot.slane %v8013_v35, 2 }
 0x12d   : > { %6930 = vrot.lane.b32.xlu1 %v6929_v34, %s7657_s21  ;;  %v1597_v3 = vrot.slane %v8015_v36, 2  ;;  %v2108_v23 = vrot.slane %v8013_v35, 3  ;;  %v8113_v24 = vsel %vm2098_vm6, %v2102_v63, %v2104_v8  ;;  %v2614_v25 = vrot.slane %v8001_v26, 4 }
 0x12e   : > { %v8024_v41 = vsel %vm774_vm4, %v782_v31, %v784_v38  ;;  %v8027_v42 = vsel %vm774_vm4, %v784_v38, %v786_v39  ;;  %v8036_v46 = vsel %vm774_vm4, %v786_v39, %v788_v40  ;;  %v8103_v19 = vsel %vm1585_vm5, %v1593_v61, %v1595_v2 }
 0x12f   : > { %v6934_v43 = vpack.i.bf16 %v8027_v42, %v8024_v41  ;;  %v8031_v44 = vld [vmem:[#allocation2 + $0x8] sm:$0xff]  ;;  %v8033_v45 = vld [vmem:[#allocation2] sm:$0xff]  ;;  %v6949_v5 = vpack.i.bf16 %v8036_v46, %v8027_v42  ;;  %v6944_v9 = vpack.i.bf16 %v8024_v41, %v783_v33  ;;  %v8108_v20 = vsel %vm1585_vm5, %v1595_v2, %v1597_v3 }
 0x130   : > { %v776_v47 = vrot.slane %v8031_v44, 1  ;;  %v775_v48 = vrot.slane %v8033_v45, 1  ;;  %v1586_v49 = vrot.slane %v8033_v45, 2  ;;  %v1587_v50 = vrot.slane %v8031_v44, 2  ;;  %v7100_v2 = vld [vmem:[#allocation6 + $0x1c] ss:$12 sps:$4 sm:$0xff]  }
 0x131   : > { %6935 = vrot.lane.b32.xlu0 %v6934_v43, %s7657_s21  ;;  %830 = vrot.lane.b32.xlu1 %v8036_v46, %s7657_s21  ;;  %v2099_v62 = vrot.slane %v8033_v45, 3  ;;  %v2100_v4 = vrot.slane %v8031_v44, 3  ;;  %v2611_v12 = vrot.slane %v8033_v45, 4  ;;  %v6959_v18 = vpack.i.bf16 %v8001_v26, %v8031_v44 }
 0x132   : > { %v779_v51 = vsel %vm774_vm4, %v776_v47, %v778_v29  ;;  %v777_v52 = vsel %vm774_vm4, %v775_v48, %v776_v47  ;;  %v8051_v57 = vsel %vm1585_vm5, %v1586_v49, %v1587_v50  ;;  %v8055_v60 = vsel %vm1585_vm5, %v1587_v50, %v1589_v53 }
 0x133   : > { %v6939_v55 = vpack.i.bf16 %v781_v32, %v779_v51  ;;  %v8048_v56 = vpack.c.bf16 %v779_v51, %v777_v52  ;;  %v8064_v1 = vpack.c.bf16 %v8055_v60, %v8051_v57  ;;  %v8081_v10 = vsel %vm2098_vm6, %v2099_v62, %v2100_v4 }
 0x134   : > { %v8084_v11 = vsel %vm2098_vm6, %v2100_v4, %v2102_v63  ;;  %v2612_v21 = vrot.slane %v8031_v44, 4  ;;  %v6954_v22 = vpack.i.bf16 %v779_v51, %v777_v52  ;;  %v2110_v29 = vrot.slane %v8015_v36, 3 }
 0x135   : > { %6940 = vrot.lane.b32.xlu1 %v6939_v55, %s7658_s2  ;;  %797 = vrot.lane.b32.xlu0 %v777_v52, %s7658_s2  ;;  %v8095_v16 = vpack.c.bf16 %v8084_v11, %v8081_v10  ;;  %v2616_v31 = vrot.slane %v8003_v27, 4  ;;  %v2618_v32 = vrot.slane %v8005_v28, 4  ;;  %v8123_v33 = vsel %vm2098_vm6, %v2104_v8, %v2106_v17 }
 0x136   : > { %5769 = vmatmul.mubr.msk.bf16.vlgmr.msra.gmra.mrb[0].mxu0 %vm921_vm7, %v8048_v56  ;;  %v8118_v30 = vsel %vm955_vm2, %v2611_v12, %v2612_v21  ;;  %v8126_v34 = vsel %vm955_vm2, %v2612_v21, %v2614_v25  ;;  %v2620_v38 = vrot.slane %v8013_v35, 4  ;;  %v2622_v39 = vrot.slane %v8015_v36, 4 }
 0x137   : > { %1007 = vmatprep.mubr.bf16.mxu0 %v9830_v15  ;;  %1325 = vmatpush1.bf16.msra.mxu0 %v7093_v59  ;;  %v8135_v40 = vpack.c.bf16 %v8126_v34, %v8118_v30  ;;  %v8138_v43 = vsel %vm955_vm2, %v2616_v31, %v2618_v32  ;;  %v8141_v47 = vsel %vm955_vm2, %v2614_v25, %v2616_v31 }
 0x138   : > { %v8146_v48 = vsel %vm2098_vm6, %v2106_v17, %v2108_v23  ;;  %v8149_v49 = vsel %vm955_vm2, %v2618_v32, %v2620_v38  ;;  %v7049_v50 = vpack.i.bf16 %v8141_v47, %v8126_v34  ;;  %v8156_v51 = vsel %vm955_vm2, %v2620_v38, %v2622_v39  ;;  %v7098_v17 = vld [vmem:[#allocation6 + $0x18] ss:$12 sps:$4 sm:$0xff]   ;;  %1326 = vmatprep.subr.bf16.mxu0 %v7100_v2 }
 0x139   : > { %6950 = vrot.lane.b32.xlu1 %v6949_v5, %s7658_s2  ;;  %6945 = vrot.lane.b32.xlu0 %v6944_v9, %s7658_s2  ;;  %v8162_v52 = vsel %vm2098_vm6, %v2108_v23, %v2110_v29  ;;  %v7054_v53 = vpack.i.bf16 %v8149_v49, %v8138_v43  ;;  %v7074_v54 = vpack.i.bf16 %v8156_v51, %v8149_v49 }
 0x13a   : > { %v7069_v55 = vpack.i.bf16 %v8138_v43, %v8141_v47  ;;  %v8172_v58 = vpack.c.bf16 %v8031_v44, %v8033_v45  ;;  %v8176_v59 = vpack.c.bf16 %v8003_v27, %v8001_v26  ;;  %v8182_v61 = vpack.c.bf16 %v8013_v35, %v8005_v28 }
 0x13b   : > { %v8186_v62 = vpack.c.bf16 %v8088_v13, %v8091_v14  ;;  %v8190_v63 = vpack.c.bf16 %v8108_v20, %v8103_v19  ;;  %v8194_v4 = vpack.c.bf16 %v8123_v33, %v8113_v24  ;;  %v8198_v5 = vpack.c.bf16 %v8162_v52, %v8146_v48  ;;  %1327 = vmatpush1.bf16.msra.mxu0 %v7098_v17  ;;  %v7096_v17 = vld [vmem:[#allocation6 + $0xa4] ss:$0 sps:$4 sm:$0xff]  }
 0x13c   : > { %v8206_v8 = vpack.c.bf16 %v8156_v51, %v8149_v49  ;;  %v6974_v9 = vpack.i.bf16 %v8031_v44, %v8033_v45  ;;  %v6969_v12 = vpack.i.bf16 %v8015_v36, %v8013_v35  ;;  %v6984_v21 = vpack.i.bf16 %v8013_v35, %v8005_v28  ;;  %v7091_v49 = vld [vmem:[#allocation6 + $0x74] ss:$12 sps:$4 sm:$0xff]  }
 0x13d   : > { %706 = vrot.lane.b32.xlu1 %v8033_v45, %s7658_s2  ;;  %6955 = vrot.lane.b32.xlu0 %v6954_v22, %s7657_s21  ;;  %v6979_v44 = vpack.i.bf16 %v8003_v27, %v8001_v26  ;;  %v1599_v45 = vrot.slane %v8017_v37, 2  ;;  %v771_v26 = vld [vmem:[#allocation6 + $0x48] sm:$0xff]  ;;  %v6994_v27 = vpack.i.bf16 %v8103_v19, %v8088_v13  ;;  %v6989_v28 = vpack.i.bf16 %v8091_v14, %v8055_v60 }
 0x13e   : > { %5770 = vmatmul.mubr.msk.bf16.gmra.mrb[4].mxu0 %vm921_vm7, %v8073_v6  ;;  %v5801_v35 = vcombine.high %v771_v26, %v771_v26  ;;  %v5800_v23 = vcombine.low %v771_v26, %v771_v26  ;;  %v7004_v31 = vpack.i.bf16 %v8055_v60, %v8051_v57  ;;  %v7009_v38 = vpack.i.bf16 %v8088_v13, %v8091_v14 }
 0x13f   : > { %1017 = vmatprep.mubr.bf16.mxu0 %v9830_v15  ;;  %v8239_v22 = vsel %vm1585_vm5, %v1597_v3, %v1599_v45  ;;  %v7014_v3 = vpack.i.bf16 %v8108_v20, %v8103_v19  ;;  %v7024_v60 = vpack.i.bf16 %v8146_v48, %v8123_v33  ;;  %v7019_v19 = vpack.i.bf16 %v8113_v24, %v8084_v11 }
 0x140   : > { %v1316_v25 = vsel %vm955_vm2, %v5800_v23, 0  ;;  %v6999_v32 = vpack.i.bf16 %v8239_v22, %v8108_v20  ;;  %v7034_v14 = vpack.i.bf16 %v8084_v11, %v8081_v10  ;;  %v7044_v2 = vpack.i.bf16 %v8162_v52, %v8146_v48  ;;  %v7097_v23 = vld [vmem:[#allocation6 + $0x8] ss:$12 sps:$4 sm:$0xff]  }
 0x141   : > { %6965 = vrot.lane.b32.xlu1 %v6964_v7, %s7658_s2  ;;  %6960 = vrot.lane.b32.xlu0 %v6959_v18, %s7658_s2  ;;  %v8202_v7 = vpack.c.bf16 %v8138_v43, %v8141_v47  ;;  %v8214_v18 = vpack.c.bf16 %v8027_v42, %v8024_v41  ;;  %v7101_v41 = vld [vmem:[#allocation6 + $0x30] ss:$12 sps:$4 sm:$0xff]   ;;  %v7103_v42 = vld [vmem:[#allocation6 + $0x34] ss:$12 sps:$4 sm:$0xff]   ;;  %v7064_v11 = vpack.i.bf16 %v8126_v34, %v8118_v30 }
 0x142   : > { %1328 = vmatprep.subr.bf16.mxu0 %v7103_v42 }
 0x143   : > { %1329 = vmatpush1.bf16.msra.mxu0 %v7101_v41 }
 0x144   : > { %5803 = vmatprep.subr.msk.bf16.mxu0 %vm955_vm2, %v5801_v35 }
 0x145   : > { %6975 = vrot.lane.b32.xlu1 %v6974_v9, %s7657_s21  ;;  %6970 = vrot.lane.b32.xlu0 %v6969_v12, %s7658_s2  ;;  %v2624_v9 = vrot.slane %v8017_v37, 4 }
 0x146   : > { %5771 = vmatmul.mubr.msk.bf16.gmra.mrb[8].mxu0 %vm921_vm7, %v8214_v18 }
 0x147   : > { %1027 = vmatprep.mubr.bf16.mxu0 %v9830_v15  ;;  %1331 = vmatpush1.bf16.msra.mxu0 %v1316_v25 }
 0x149   : > { %6985 = vrot.lane.b32.xlu1 %v6984_v21, %s7657_s21  ;;  %6980 = vrot.lane.b32.xlu0 %v6979_v44, %s7657_s21 }
 0x14d   : > { %1608 = vrot.lane.b32.xlu1 %v8051_v57, %s7658_s2  ;;  %739 = vrot.lane.b32.xlu0 %v8015_v36, %s7657_s21  ;;  %v2112_v57 = vrot.slane %v8017_v37, 3  ;;  %v7110_v37 = vld [vmem:[#allocation6 + $0xac] ss:$12 sps:$4 sm:$0xff]  }
 0x14e   : > { %1774 = vmatprep.subr.bf16.mxu0 %v7110_v37  ;;  %v7116_v37 = vld [vmem:[#allocation6 + $0xd8] ss:$12 sps:$4 sm:$0xff]  }
 0x14f   : > { %v8269_v13 = vsel %vm2098_vm6, %v2110_v29, %v2112_v57  ;;  %v7039_v29 = vpack.i.bf16 %v8123_v33, %v8113_v24  ;;  %v7107_v57 = vld [vmem:[#allocation6 + $0x38] ss:$12 sps:$4 sm:$0xff]  }
 0x150   : > { %v7029_v20 = vpack.i.bf16 %v8269_v13, %v8162_v52 }
 0x151   : > { %6995 = vrot.lane.b32.xlu1 %v6994_v27, %s7658_s2  ;;  %6990 = vrot.lane.b32.xlu0 %v6989_v28, %s7658_s2 }
 0x155   : > { %7005 = vrot.lane.b32.xlu1 %v7004_v31, %s7657_s21  ;;  %7000 = vrot.lane.b32.xlu0 %v6999_v32, %s7658_s2  ;;  %v7106_v32 = vld [vmem:[#allocation6 + $0x20] ss:$12 sps:$4 sm:$0xff]  }
 0x159   : > { %7015 = vrot.lane.b32.xlu1 %v7014_v3, %s7657_s21  ;;  %7010 = vrot.lane.b32.xlu0 %v7009_v38, %s7657_s21 }
 0x15d   : > { %2121 = vrot.lane.b32.xlu1 %v8081_v10, %s7658_s2  ;;  %1641 = vrot.lane.b32.xlu0 %v8239_v22, %s7657_s21  ;;  %v8293_v10 = vsel %vm955_vm2, %v2622_v39, %v2624_v9  ;;  %v7090_v39 = vld [vmem:[#allocation6 + $0x5c] ss:$12 sps:$4 sm:$0xff]  }
 0x15e   : > { %v7059_v24 = vpack.i.bf16 %v8293_v10, %v8156_v51  ;;  %v7118_v9 = vld [vmem:[#allocation6 + $0xdc] ss:$12 sps:$4 sm:$0xff]  }
 0x161   : > { %7025 = vrot.lane.b32.xlu1 %v7024_v60, %s7658_s2  ;;  %7020 = vrot.lane.b32.xlu0 %v7019_v19, %s7658_s2  ;;  %v7111_v60 = vld [vmem:[#allocation6 + $0x50] ss:$0 sps:$4 sm:$0xff]  }
 0x165   : > { %7035 = vrot.lane.b32.xlu1 %v7034_v14, %s7657_s21  ;;  %7030 = vrot.lane.b32.xlu0 %v7029_v20, %s7658_s2  ;;  %v1322_v14 = vsel %vm955_vm2, %v7111_v60, 0  ;;  %v7129_v60 = vld [vmem:[#allocation6 + $0x118] ss:$12 sps:$4 sm:$0xff]  }
 0x169   : > { %7045 = vrot.lane.b32.xlu1 %v7044_v2, %s7657_s21  ;;  %7040 = vrot.lane.b32.xlu0 %v7039_v29, %s7657_s21  ;;  %v7114_v2 = vld [vmem:[#allocation6 + $0xc4] ss:$12 sps:$4 sm:$0xff]   ;;  %v7112_v29 = vld [vmem:[#allocation6 + $0xc0] ss:$12 sps:$4 sm:$0xff]  }
 0x16d   : > { %2633 = vrot.lane.b32.xlu1 %v8118_v30, %s7658_s2  ;;  %2154 = vrot.lane.b32.xlu0 %v8269_v13, %s7657_s21 }
 0x171   : > { %7055 = vrot.lane.b32.xlu1 %v7054_v53, %s7658_s2  ;;  %7050 = vrot.lane.b32.xlu0 %v7049_v50, %s7658_s2 }
 0x175   : > { %7065 = vrot.lane.b32.xlu1 %v7064_v11, %s7657_s21  ;;  %7060 = vrot.lane.b32.xlu0 %v7059_v24, %s7658_s2  ;;  %s9883_s2 = sld [smem:[#allocation27_spill]] }
 0x179   : > { %7075 = vrot.lane.b32.xlu1 %v7074_v54, %s7657_s21  ;;  %7070 = vrot.lane.b32.xlu0 %v7069_v55, %s7657_s21  ;;  %v7092_v55 = vld [vmem:[#allocation6 + $0x8c] ss:$12 sps:$4 sm:$0xff]  }
 0x17d   : > { %2666 = vrot.lane.b32.xlu0 %v8293_v10, %s7657_s21  ;;  %s9888_s21 = sld [smem:[#allocation31_spill]] }
 0x19f   : > { %v6931_v30 = vpop.permute.xlu1 %6930 }
 0x1a0   : > { %v6933_v33 = vunpack.i.h.bf16 %v6931_v30  ;;  %v6932_v34 = vunpack.i.l.bf16 %v6931_v30 }
 0x1a2   : > { %v8319_v48 = vpack.c.bf16 %v6933_v33, %v6932_v34  ;;  %v7125_v33 = vld [vmem:[#allocation6 + $0x100] ss:$12 sps:$4 sm:$0xff]  }
 0x1a3   : > { %v6936_v50 = vpop.permute.xlu0 %6935  ;;  %v831_v52 = vpop.permute.xlu1 %830 }
 0x1a4   : > { %5777 = vmatmul.mubr.msk.bf16.vlgmr.msra.gmra.mrb[0].mxu1 %vm921_vm7, %v8319_v48  ;;  %v6938_v43 = vunpack.i.h.bf16 %v6936_v50  ;;  %v6937_v47 = vunpack.i.l.bf16 %v6936_v50  ;;  %v8341_v45 = vpack.c.bf16 %v831_v52, %v831_v52 }
 0x1a5   : > { %6332 = vmatpush3.bf16.msra.mxu1 %v7090_v39  ;;  %1087 = vmatprep.mubr.bf16.mxu1 %v9830_v15 }
 0x1a6   : > { %6333 = vmatprep.subr.bf16.mxu1 %v9832_v0  ;;  %v8328_v12 = vpack.c.bf16 %v6938_v43, %v6937_v47 }
 0x1a7   : > { %v798_v51 = vpop.permute.xlu0 %797  ;;  %v6941_v54 = vpop.permute.xlu1 %6940 }
 0x1a8   : > { %v8326_v53 = vpack.c.bf16 %v798_v51, %v8036_v46  ;;  %v6943_v21 = vunpack.i.h.bf16 %v6941_v54  ;;  %v6942_v44 = vunpack.i.l.bf16 %v6941_v54  ;;  %v963_v46 = vsel %vm955_vm2, %v7096_v17, 0 }
 0x1a9   : > { %6334 = vmatpush3.bf16.msra.mxu1 %v7091_v49 }
 0x1aa   : > { %5772 = vmatmul.mubr.msk.bf16.gmra.mrb[12].mxu0 %vm921_vm7, %v8326_v53  ;;  %6335 = vmatprep.subr.bf16.mxu1 %v9832_v0  ;;  %v8339_v41 = vpack.c.bf16 %v6943_v21, %v6942_v44 }
 0x1ab   : > { %1037 = vmatprep.mubr.bf16.mxu0 %v9830_v15  ;;  %v6946_v42 = vpop.permute.xlu0 %6945  ;;  %v6951_v35 = vpop.permute.xlu1 %6950 }
 0x1ac   : > { %5778 = vmatmul.mubr.msk.bf16.gmra.mrb[4].mxu1 %vm921_vm7, %v8328_v12  ;;  %v6948_v26 = vunpack.i.h.bf16 %v6946_v42  ;;  %v6947_v27 = vunpack.i.l.bf16 %v6946_v42  ;;  %v6953_v25 = vunpack.i.h.bf16 %v6951_v35  ;;  %v6952_v31 = vunpack.i.l.bf16 %v6951_v35  ;;  %v7115_v35 = vld [vmem:[#allocation6 + $0xb0] ss:$12 sps:$4 sm:$0xff]  }
 0x1ad   : > { %6336 = vmatpush3.bf16.msra.mxu1 %v7092_v55  ;;  %1097 = vmatprep.mubr.bf16.mxu1 %v9830_v15 }
 0x1ae   : > { %6337 = vmatprep.subr.bf16.mxu1 %v9832_v0  ;;  %v844_v28 = vpack.c.bf16 %v6948_v26, %v6947_v27  ;;  %v845_v3 = vpack.c.bf16 %v6953_v25, %v6952_v31 }
 0x1af   : > { %v6956_v38 = vpop.permute.xlu0 %6955  ;;  %v707_v34 = vpop.permute.xlu1 %706 }
 0x1b0   : > { %v6958_v19 = vunpack.i.h.bf16 %v6956_v38  ;;  %v8397_v39 = vpack.c.bf16 %v707_v34, %v8015_v36 }
 0x1b1   : > { %6338 = vmatpush3.bf16.msra.mxu1 %v963_v46 }
 0x1b2   : > { %5773 = vmatmul.mubr.msk.bf16.gmra.mrb[16].mxu0 %vm921_vm7, %v8339_v41  ;;  %6383 = vmatprep.subr.bf16.mxu1 %v9832_v0 }
 0x1b3   : > { %1047 = vmatprep.mubr.bf16.mxu0 %v9830_v15  ;;  %v6961_v50 = vpop.permute.xlu0 %6960  ;;  %v6966_v47 = vpop.permute.xlu1 %6965 }
 0x1b4   : > { %5779 = vmatmul.mubr.msk.bf16.gmra.mrb[8].mxu1 %vm921_vm7, %v8341_v45  ;;  %v6963_v52 = vunpack.i.h.bf16 %v6961_v50  ;;  %v6962_v49 = vunpack.i.l.bf16 %v6961_v50  ;;  %v6968_v36 = vunpack.i.h.bf16 %v6966_v47  ;;  %v6967_v51 = vunpack.i.l.bf16 %v6966_v47 }
 0x1b5   : > { %6339 = vmatprep.mubr.msk.bf16.mxu1 %vm7659_vm8, %v9832_v0 }
 0x1b6   : > { %v8405_v43 = vpack.c.bf16 %v6963_v52, %v6962_v49 }
 0x1b7   : > { %v6971_v54 = vpop.permute.xlu0 %6970  ;;  %v6976_v44 = vpop.permute.xlu1 %6975 }
 0x1b8   : > { %v6973_v55 = vunpack.i.h.bf16 %v6971_v54  ;;  %v6972_v17 = vunpack.i.l.bf16 %v6971_v54  ;;  %v6978_v46 = vunpack.i.h.bf16 %v6976_v44 }
 0x1ba   : > { %5774 = vmatmul.mubr.msk.bf16.gmra.mrb[20].mxu0 %vm921_vm7, %v844_v28  ;;  %v8422_v21 = vpack.c.bf16 %v6973_v55, %v6972_v17 }
 0x1bb   : > { %1057 = vmatprep.mubr.bf16.mxu0 %v9830_v15  ;;  %v6981_v42 = vpop.permute.xlu0 %6980 }
 0x1bc   : > { %6340 = vmatmul.mubr.msk.bf16.vlgmr.msra.gmra.mrb[12].mxu1 %vm921_vm7, %v8048_v56  ;;  %v6957_v56 = vunpack.i.l.bf16 %v6956_v38  ;;  %v6983_v26 = vunpack.i.h.bf16 %v6981_v42  ;;  %v6982_v27 = vunpack.i.l.bf16 %v6981_v42  ;;  %v7136_v42 = vld [vmem:[#allocation6 + $0x11c] ss:$12 sps:$4 sm:$0xff]  }
 0x1bd   : > { %6384 = vmatpush3.bf16.msra.mxu1 %v7097_v23  ;;  %6343 = vmatprep.mubr.msk.bf16.mxu1 %vm7659_vm8, %v9832_v0 }
 0x1be   : > { %6385 = vmatprep.subr.bf16.mxu1 %v9832_v0  ;;  %v846_v20 = vpack.c.bf16 %v6958_v19, %v6957_v56  ;;  %v7127_v19 = vld [vmem:[#allocation6 + $0x114] ss:$12 sps:$4 sm:$0xff]   ;;  %v7133_v56 = vld [vmem:[#allocation6 + $0x130] ss:$12 sps:$4 sm:$0xff]  }
 0x1c1   : > { %6386 = vmatpush3.bf16.msra.mxu1 %v7106_v32  ;;  %v7122_v32 = vld [vmem:[#allocation6 + $0xe0] ss:$12 sps:$4 sm:$0xff]  }
 0x1c2   : > { %5775 = vmatmul.mubr.msk.bf16.gmra.mrb[24].mxu0 %vm921_vm7, %v845_v3  ;;  %6387 = vmatprep.subr.bf16.mxu1 %v9832_v0 }
 0x1c3   : > { %1067 = vmatprep.mubr.bf16.mxu0 %v9830_v15 }
 0x1c4   : > { %6344 = vmatmul.mubr.msk.bf16.gmra.mrb[16].mxu1 %vm921_vm7, %v8073_v6  ;;  %v7108_v6 = vld [vmem:[#allocation6 + $0xa8] ss:$12 sps:$4 sm:$0xff]  }
 0x1c5   : > { %6347 = vmatprep.mubr.msk.bf16.mxu1 %vm7659_vm8, %v9832_v0  ;;  %6388 = vmatpush3.bf16.msra.mxu1 %v7107_v57 }
 0x1c6   : > { %6389 = vmatprep.subr.bf16.mxu1 %v9832_v0 }
 0x1c9   : > { %6390 = vmatpush3.bf16.msra.mxu1 %v1322_v14  ;;  %v7131_v14 = vld [vmem:[#allocation6 + $0x12c] ss:$12 sps:$4 sm:$0xff]  }
 0x1ca   : > { %5776 = vmatmul.mubr.msk.bf16.gmra.mrb[28].mxu0 %vm921_vm7, %v846_v20  ;;  %6435 = vmatprep.subr.bf16.mxu1 %v9832_v0 }
 0x1cb   : > { %1356 = vmatprep.mubr.bf16.mxu0 %v9830_v15 }
 0x1cc   : > { %6348 = vmatmul.mubr.msk.bf16.gmra.mrb[20].mxu1 %vm921_vm7, %v8214_v18  ;;  %v1674_v18 = vld [vmem:[#allocation6 + $0xf0] sm:$0xff] }
 0x1cd   : > { %6351 = vmatprep.mubr.msk.bf16.mxu1 %vm7659_vm8, %v9832_v0  ;;  %v5836_v11 = vcombine.high %v1674_v18, %v1674_v18  ;;  %v5835_v24 = vcombine.low %v1674_v18, %v1674_v18 }
 0x1cf   : > { %v1766_v30 = vsel %vm955_vm2, %v5835_v24, 0 }
 0x1d2   : > { %5804 = vmatmul.mubr.msk.bf16.vlgmr.msra.gmra.mrb[0].mxu0 %vm921_vm7, %v8172_v58 }
 0x1d3   : > { %1366 = vmatprep.mubr.bf16.mxu0 %v9830_v15  ;;  %1775 = vmatpush1.bf16.msra.mxu0 %v7108_v6 }
 0x1d4   : > { %6352 = vmatmul.mubr.msk.bf16.gmra.mrb[24].mxu1 %vm921_vm7, %v8326_v53  ;;  %1776 = vmatprep.subr.bf16.mxu0 %v7114_v2  ;;  %v8413_v53 = vpack.c.bf16 %v6968_v36, %v6967_v51 }
 0x1d5   : > { %6355 = vmatprep.mubr.msk.bf16.mxu1 %vm7659_vm8, %v9832_v0 }
 0x1d7   : > { %1777 = vmatpush1.bf16.msra.mxu0 %v7112_v29  ;;  %v7140_v29 = vld [vmem:[#allocation6 + $0x154] ss:$12 sps:$4 sm:$0xff]  }
 0x1d8   : > { %1778 = vmatprep.subr.bf16.mxu0 %v7118_v9 }
 0x1da   : > { %5805 = vmatmul.mubr.msk.bf16.gmra.mrb[4].mxu0 %vm921_vm7, %v8176_v59 }
 0x1db   : > { %1376 = vmatprep.mubr.bf16.mxu0 %v9830_v15  ;;  %1779 = vmatpush1.bf16.msra.mxu0 %v7116_v37 }
 0x1dc   : > { %6356 = vmatmul.mubr.msk.bf16.gmra.mrb[28].mxu1 %vm921_vm7, %v8339_v41  ;;  %5838 = vmatprep.subr.msk.bf16.mxu0 %vm955_vm2, %v5836_v11  ;;  %v6977_v41 = vunpack.i.l.bf16 %v6976_v44 }
 0x1dd   : > { %6359 = vmatprep.mubr.msk.bf16.mxu1 %vm7659_vm8, %v9832_v0 }
 0x1df   : > { %1781 = vmatpush1.bf16.msra.mxu0 %v1766_v30 }
 0x1e0   : > { %2287 = vmatprep.subr.bf16.mxu0 %v7125_v33 }
 0x1e2   : > { %5806 = vmatmul.mubr.msk.bf16.gmra.mrb[8].mxu0 %vm921_vm7, %v8182_v61 }
 0x1e3   : > { %1386 = vmatprep.mubr.bf16.mxu0 %v9830_v15 }
 0x1e4   : > { %6360 = vmatmul.mubr.msk.bf16.gmra.mrb[32].mxu1 %vm921_vm7, %v844_v28  ;;  %v6986_v28 = vpop.permute.xlu1 %6985 }
 0x1e5   : > { %6363 = vmatprep.mubr.msk.bf16.mxu1 %vm7659_vm8, %v9832_v0  ;;  %v6988_v23 = vunpack.i.h.bf16 %v6986_v28  ;;  %v6987_v25 = vunpack.i.l.bf16 %v6986_v28 }
 0x1e7   : > { %v8450_v31 = vpack.c.bf16 %v6988_v23, %v6987_v25 }
 0x1e8   : > { %v1609_v9 = vpop.permute.xlu1 %1608 }
 0x1e9   : > { %v8496_v18 = vpack.c.bf16 %v1609_v9, %v8239_v22 }
 0x1ea   : > { %5807 = vmatmul.mubr.msk.bf16.gmra.mrb[12].mxu0 %vm921_vm7, %v8397_v39 }
 0x1eb   : > { %1396 = vmatprep.mubr.bf16.mxu0 %v9830_v15 }
 0x1ec   : > { %6364 = vmatmul.mubr.msk.bf16.gmra.mrb[36].mxu1 %vm921_vm7, %v845_v3  ;;  %v7126_v3 = vld [vmem:[#allocation6 + $0xf8] ss:$0 sps:$4 sm:$0xff]   ;;  %v6996_v33 = vpop.permute.xlu1 %6995 }
 0x1ed   : > { %6367 = vmatprep.mubr.msk.bf16.mxu1 %vm7659_vm8, %v9832_v0  ;;  %v1772_v38 = vsel %vm955_vm2, %v7126_v3, 0  ;;  %v6998_v22 = vunpack.i.h.bf16 %v6996_v33  ;;  %v6997_v34 = vunpack.i.l.bf16 %v6996_v33 }
 0x1f0   : > { %v7006_v47 = vpop.permute.xlu1 %7005 }
 0x1f1   : > { %v7008_v36 = vunpack.i.h.bf16 %v7006_v47  ;;  %v7007_v51 = vunpack.i.l.bf16 %v7006_v47 }
 0x1f2   : > { %5808 = vmatmul.mubr.msk.bf16.gmra.mrb[16].mxu0 %vm921_vm7, %v8405_v43 }
 0x1f3   : > { %1406 = vmatprep.mubr.bf16.mxu0 %v9830_v15 }
 0x1f4   : > { %6368 = vmatmul.mubr.msk.bf16.gmra.mrb[40].mxu1 %vm921_vm7, %v846_v20  ;;  %v7016_v44 = vpop.permute.xlu1 %7015 }
 0x1f5   : > { %6371 = vmatprep.mubr.msk.bf16.mxu1 %vm7659_vm8, %v9832_v0 }
 0x1fa   : > { %5809 = vmatmul.mubr.msk.bf16.gmra.mrb[20].mxu0 %vm921_vm7, %v8413_v53 }
 0x1fb   : > { %1416 = vmatprep.mubr.bf16.mxu0 %v9830_v15 }
 0x1fc   : > { %6372 = vmatmul.mubr.msk.bf16.gmra.mrb[44].mxu1 %vm921_vm7, %v8319_v48  ;;  %v8431_v48 = vpack.c.bf16 %v6978_v46, %v6977_v41  ;;  %v7130_v46 = vld [vmem:[#allocation6 + $0x104] ss:$12 sps:$4 sm:$0xff]   ;;  %v7018_v41 = vunpack.i.h.bf16 %v7016_v44 }
 0x1fd   : > { %6375 = vmatprep.mubr.msk.bf16.mxu1 %vm7659_vm8, %v9832_v0 }
 0x202   : > { %5810 = vmatmul.mubr.msk.bf16.gmra.mrb[24].mxu0 %vm921_vm7, %v8422_v21 }
 0x203   : > { %1426 = vmatprep.mubr.bf16.mxu0 %v9830_v15 }
 0x204   : > { %6376 = vmatmul.mubr.msk.bf16.gmra.mrb[48].mxu1 %vm921_vm7, %v8328_v12  ;;  %v8440_v12 = vpack.c.bf16 %v6983_v26, %v6982_v27  ;;  %v7137_v27 = vld [vmem:[#allocation6 + $0x134] ss:$12 sps:$4 sm:$0xff]  }
 0x205   : > { %6379 = vmatprep.mubr.msk.bf16.mxu1 %vm7659_vm8, %v9832_v0 }
 0x20a   : > { %5811 = vmatmul.mubr.msk.bf16.gmra.mrb[28].mxu0 %vm921_vm7, %v8431_v48 }
 0x20b   : > { %1436 = vmatprep.mubr.bf16.mxu0 %v9830_v15 }
 0x20c   : > { %6380 = vmatmul.mubr.msk.bf16.gmra.mrb[52].mxu1 %vm921_vm7, %v8341_v45  ;;  %v7121_v45 = vld [vmem:[#allocation6 + $0xc8] ss:$12 sps:$4 sm:$0xff]  }
 0x20d   : > { %6391 = vmatprep.mubr.msk.bf16.mxu1 %vm7659_vm8, %v9832_v0 }
 0x212   : > { %5812 = vmatmul.mubr.msk.bf16.gmra.mrb[32].mxu0 %vm921_vm7, %v8440_v12 }
 0x213   : > { %1446 = vmatprep.mubr.bf16.mxu0 %v9830_v15 }
 0x214   : > { %6392 = vmatmul.mubr.msk.bf16.vlgmr.msra.gmra.mrb[56].mxu1 %vm921_vm7, %v8172_v58  ;;  %v740_v58 = vpop.permute.xlu0 %739 }
 0x215   : > { %6436 = vmatpush3.bf16.msra.mxu1 %v7115_v35  ;;  %6395 = vmatprep.mubr.msk.bf16.mxu1 %vm7659_vm8, %v9832_v0  ;;  %v8462_v57 = vpack.c.bf16 %v740_v58, %v740_v58  ;;  %v7144_v58 = vld [vmem:[#allocation6 + $0x16c] ss:$12 sps:$4 sm:$0xff]  }
 0x216   : > { %6437 = vmatprep.subr.bf16.mxu1 %v9832_v0 }
 0x218   : > { %v6991_v37 = vpop.permute.xlu0 %6990 }
 0x219   : > { %6438 = vmatpush3.bf16.msra.mxu1 %v7121_v45  ;;  %v6993_v11 = vunpack.i.h.bf16 %v6991_v37  ;;  %v6992_v24 = vunpack.i.l.bf16 %v6991_v37 }
 0x21a   : > { %5813 = vmatmul.mubr.msk.bf16.gmra.mrb[36].mxu0 %vm921_vm7, %v8450_v31  ;;  %6439 = vmatprep.subr.bf16.mxu1 %v9832_v0 }
 0x21b   : > { %1456 = vmatprep.mubr.bf16.mxu0 %v9830_v15  ;;  %v8505_v30 = vpack.c.bf16 %v6993_v11, %v6992_v24  ;;  %v2122_v24 = vpop.permute.xlu1 %2121 }
 0x21c   : > { %6396 = vmatmul.mubr.msk.bf16.gmra.mrb[60].mxu1 %vm921_vm7, %v8176_v59  ;;  %v7123_v59 = vld [vmem:[#allocation6 + $0xfc] ss:$12 sps:$4 sm:$0xff]   ;;  %v7001_v50 = vpop.permute.xlu0 %7000  ;;  %v8623_v33 = vpack.c.bf16 %v2122_v24, %v8269_v13 }
 0x21d   : > { %6399 = vmatprep.mubr.msk.bf16.mxu1 %vm7659_vm8, %v9832_v0  ;;  %6440 = vmatpush3.bf16.msra.mxu1 %v7122_v32  ;;  %v7003_v52 = vunpack.i.h.bf16 %v7001_v50  ;;  %v7002_v49 = vunpack.i.l.bf16 %v7001_v50  ;;  %v7138_v32 = vld [vmem:[#allocation6 + $0x150] ss:$12 sps:$4 sm:$0xff]  }
 0x21e   : > { %6441 = vmatprep.subr.bf16.mxu1 %v9832_v0 }
 0x220   : > { %v7011_v54 = vpop.permute.xlu0 %7010 }
 0x221   : > { %6442 = vmatpush3.bf16.msra.mxu1 %v1772_v38  ;;  %v7013_v55 = vunpack.i.h.bf16 %v7011_v54  ;;  %v7012_v17 = vunpack.i.l.bf16 %v7011_v54 }
 0x222   : > { %5814 = vmatmul.mubr.msk.bf16.gmra.mrb[40].mxu0 %vm921_vm7, %v8462_v57  ;;  %6487 = vmatprep.subr.bf16.mxu1 %v9832_v0 }
 0x223   : > { %1806 = vmatprep.mubr.bf16.mxu0 %v9830_v15 }
 0x224   : > { %6400 = vmatmul.mubr.msk.bf16.gmra.mrb[64].mxu1 %vm921_vm7, %v8182_v61  ;;  %v2187_v61 = vld [vmem:[#allocation6 + $0x144] sm:$0xff] }
 0x225   : > { %6403 = vmatprep.mubr.msk.bf16.mxu1 %vm7659_vm8, %v9832_v0  ;;  %v5871_v20 = vcombine.high %v2187_v61, %v2187_v61  ;;  %v5870_v6 = vcombine.low %v2187_v61, %v2187_v61 }
 0x227   : > { %v2279_v2 = vsel %vm955_vm2, %v5870_v6, 0 }
 0x22a   : > { %5839 = vmatmul.mubr.msk.bf16.vlgmr.msra.gmra.mrb[0].mxu0 %vm921_vm7, %v8064_v1 }
 0x22b   : > { %1816 = vmatprep.mubr.bf16.mxu0 %v9830_v15  ;;  %2288 = vmatpush1.bf16.msra.mxu0 %v7123_v59  ;;  %v7148_v59 = vld [vmem:[#allocation6 + $0x184] ss:$12 sps:$4 sm:$0xff]  }
 0x22c   : > { %6404 = vmatmul.mubr.msk.bf16.gmra.mrb[68].mxu1 %vm921_vm7, %v8397_v39  ;;  %2289 = vmatprep.subr.bf16.mxu0 %v7129_v60  ;;  %v8514_v39 = vpack.c.bf16 %v6998_v22, %v6997_v34  ;;  %v2699_v60 = vld [vmem:[#allocation6 + $0x198] sm:$0xff] }
 0x22d   : > { %6407 = vmatprep.mubr.msk.bf16.mxu1 %vm7659_vm8, %v9832_v0 }
 0x22f   : > { %2290 = vmatpush1.bf16.msra.mxu0 %v7127_v19 }
 0x230   : > { %2291 = vmatprep.subr.bf16.mxu0 %v7133_v56  ;;  %v7146_v56 = vld [vmem:[#allocation6 + $0x180] ss:$12 sps:$4 sm:$0xff]  }
 0x232   : > { %5840 = vmatmul.mubr.msk.bf16.gmra.mrb[4].mxu0 %vm921_vm7, %v8186_v62 }
 0x233   : > { %1826 = vmatprep.mubr.bf16.mxu0 %v9830_v15  ;;  %2292 = vmatpush1.bf16.msra.mxu0 %v7131_v14  ;;  %v5906_v14 = vcombine.high %v2699_v60, %v2699_v60 }
 0x234   : > { %6408 = vmatmul.mubr.msk.bf16.gmra.mrb[72].mxu1 %vm921_vm7, %v8405_v43  ;;  %5873 = vmatprep.subr.msk.bf16.mxu0 %vm955_vm2, %v5871_v20  ;;  %v8523_v43 = vpack.c.bf16 %v7003_v52, %v7002_v49  ;;  %v5905_v20 = vcombine.low %v2699_v60, %v2699_v60 }
 0x235   : > { %6411 = vmatprep.mubr.msk.bf16.mxu1 %vm7659_vm8, %v9832_v0 }
 0x237   : > { %2294 = vmatpush1.bf16.msra.mxu0 %v2279_v2 }
 0x238   : > { %2799 = vmatprep.subr.bf16.mxu0 %v7140_v29  ;;  %v2791_v29 = vsel %vm955_vm2, %v5905_v20, 0 }
 0x23a   : > { %5841 = vmatmul.mubr.msk.bf16.gmra.mrb[8].mxu0 %vm921_vm7, %v8190_v63 }
 0x23b   : > { %1836 = vmatprep.mubr.bf16.mxu0 %v9830_v15 }
 0x23c   : > { %6412 = vmatmul.mubr.msk.bf16.gmra.mrb[76].mxu1 %vm921_vm7, %v8413_v53  ;;  %v8532_v53 = vpack.c.bf16 %v7008_v36, %v7007_v51  ;;  %v7026_v51 = vpop.permute.xlu1 %7025 }
 0x23d   : > { %6415 = vmatprep.mubr.msk.bf16.mxu1 %vm7659_vm8, %v9832_v0 }
 0x242   : > { %5842 = vmatmul.mubr.msk.bf16.gmra.mrb[12].mxu0 %vm921_vm7, %v8496_v18 }
 0x243   : > { %1846 = vmatprep.mubr.bf16.mxu0 %v9830_v15 }
 0x244   : > { %6416 = vmatmul.mubr.msk.bf16.gmra.mrb[80].mxu1 %vm921_vm7, %v8422_v21  ;;  %v8541_v21 = vpack.c.bf16 %v7013_v55, %v7012_v17  ;;  %v7028_v17 = vunpack.i.h.bf16 %v7026_v51 }
 0x245   : > { %6419 = vmatprep.mubr.msk.bf16.mxu1 %vm7659_vm8, %v9832_v0 }
 0x24a   : > { %5843 = vmatmul.mubr.msk.bf16.gmra.mrb[16].mxu0 %vm921_vm7, %v8505_v30 }
 0x24b   : > { %1856 = vmatprep.mubr.bf16.mxu0 %v9830_v15 }
 0x24c   : > { %6420 = vmatmul.mubr.msk.bf16.gmra.mrb[84].mxu1 %vm921_vm7, %v8431_v48  ;;  %v7017_v48 = vunpack.i.l.bf16 %v7016_v44  ;;  %v7027_v44 = vunpack.i.l.bf16 %v7026_v51  ;;  %v7151_v51 = vld [vmem:[#allocation6 + $0x170] ss:$12 sps:$4 sm:$0xff]  }
 0x24d   : > { %6423 = vmatprep.mubr.msk.bf16.mxu1 %vm7659_vm8, %v9832_v0 }
 0x24e   : > { %v8551_v26 = vpack.c.bf16 %v7018_v41, %v7017_v48 }
 0x252   : > { %5844 = vmatmul.mubr.msk.bf16.gmra.mrb[20].mxu0 %vm921_vm7, %v8514_v39 }
 0x253   : > { %1866 = vmatprep.mubr.bf16.mxu0 %v9830_v15 }
 0x254   : > { %6424 = vmatmul.mubr.msk.bf16.gmra.mrb[88].mxu1 %vm921_vm7, %v8440_v12  ;;  %v7141_v12 = vld [vmem:[#allocation6 + $0x14c] ss:$0 sps:$4 sm:$0xff]  }
 0x255   : > { %6427 = vmatprep.mubr.msk.bf16.mxu1 %vm7659_vm8, %v9832_v0  ;;  %v2285_v28 = vsel %vm955_vm2, %v7141_v12, 0 }
 0x25a   : > { %5845 = vmatmul.mubr.msk.bf16.gmra.mrb[24].mxu0 %vm921_vm7, %v8523_v43 }
 0x25b   : > { %1876 = vmatprep.mubr.bf16.mxu0 %v9830_v15 }
 0x25c   : > { %6428 = vmatmul.mubr.msk.bf16.gmra.mrb[92].mxu1 %vm921_vm7, %v8450_v31 }
 0x25d   : > { %6431 = vmatprep.mubr.msk.bf16.mxu1 %vm7659_vm8, %v9832_v0 }
 0x262   : > { %5846 = vmatmul.mubr.msk.bf16.gmra.mrb[28].mxu0 %vm921_vm7, %v8532_v53 }
 0x263   : > { %1886 = vmatprep.mubr.bf16.mxu0 %v9830_v15 }
 0x264   : > { %6432 = vmatmul.mubr.msk.bf16.gmra.mrb[96].mxu1 %vm921_vm7, %v8462_v57 }
 0x265   : > { %6443 = vmatprep.mubr.msk.bf16.mxu1 %vm7659_vm8, %v9832_v0 }
 0x26a   : > { %5847 = vmatmul.mubr.msk.bf16.gmra.mrb[32].mxu0 %vm921_vm7, %v8541_v21 }
 0x26b   : > { %1896 = vmatprep.mubr.bf16.mxu0 %v9830_v15 }
 0x26c   : > { %6444 = vmatmul.mubr.msk.bf16.vlgmr.msra.gmra.mrb[100].mxu1 %vm921_vm7, %v8064_v1  ;;  %v1642_v1 = vpop.permute.xlu0 %1641 }
 0x26d   : > { %6488 = vmatpush3.bf16.msra.mxu1 %v7130_v46  ;;  %6447 = vmatprep.mubr.msk.bf16.mxu1 %vm7659_vm8, %v9832_v0  ;;  %v8565_v23 = vpack.c.bf16 %v1642_v1, %v1642_v1  ;;  %v8649_v46 = vpack.c.bf16 %v7028_v17, %v7027_v44 }
 0x26e   : > { %6489 = vmatprep.subr.bf16.mxu1 %v9832_v0 }
 0x270   : > { %v7021_v34 = vpop.permute.xlu0 %7020 }
 0x271   : > { %6490 = vmatpush3.bf16.msra.mxu1 %v7136_v42  ;;  %v7022_v49 = vunpack.i.l.bf16 %v7021_v34 }
 0x272   : > { %5848 = vmatmul.mubr.msk.bf16.gmra.mrb[36].mxu0 %vm921_vm7, %v8551_v26  ;;  %6491 = vmatprep.subr.bf16.mxu1 %v9832_v0 }
 0x273   : > { %1906 = vmatprep.mubr.bf16.mxu0 %v9830_v15 }
 0x274   : > { %6448 = vmatmul.mubr.msk.bf16.gmra.mrb[104].mxu1 %vm921_vm7, %v8186_v62  ;;  %v7031_v48 = vpop.permute.xlu0 %7030 }
 0x275   : > { %6451 = vmatprep.mubr.msk.bf16.mxu1 %vm7659_vm8, %v9832_v0  ;;  %6492 = vmatpush3.bf16.msra.mxu1 %v7137_v27  ;;  %v7033_v12 = vunpack.i.h.bf16 %v7031_v48  ;;  %v7032_v1 = vunpack.i.l.bf16 %v7031_v48  ;;  %v7152_v48 = vld [vmem:[#allocation6 + $0x188] ss:$12 sps:$4 sm:$0xff]  }
 0x276   : > { %6493 = vmatprep.subr.bf16.mxu1 %v9832_v0 }
 0x277   : > { %v8563_v35 = vpop.f32.mrb[0].mxu1 }
 0x278   : > { %v8567_v25 = vpop.f32.mrb[1].mxu1 }
 0x279   : > { %v8569_v45 = vpop.f32.mrb[2].mxu1  ;;  %6494 = vmatpush3.bf16.msra.mxu1 %v2285_v28  ;;  %v8662_v28 = vpack.c.bf16 %v7033_v12, %v7032_v1 }
 0x27a   : > { %v8571_v31 = vpop.f32.mrb[3].mxu1  ;;  %5849 = vmatmul.mubr.msk.bf16.gmra.mrb[44].mxu0 %vm921_vm7, %v8565_v23  ;;  %6539 = vmatprep.subr.bf16.mxu1 %v9832_v0 }
 0x27b   : > { %2319 = vmatprep.mubr.bf16.mxu0 %v9830_v15 }
 0x27c   : > { %6452 = vmatmul.mubr.msk.bf16.gmra.mrb[108].mxu1 %vm921_vm7, %v8190_v63  ;;  %v7142_v63 = vld [vmem:[#allocation6 + $0x168] ss:$12 sps:$4 sm:$0xff]  }
 0x27d   : > { %6455 = vmatprep.mubr.msk.bf16.mxu1 %vm7659_vm8, %v9832_v0 }
 0x27f   : > { %v8581_v62 = vpop.f32.mrb[4].mxu1 }
 0x280   : > { %v8583_v3 = vpop.f32.mrb[5].mxu1 }
 0x281   : > { %v8585_v38 = vpop.f32.mrb[6].mxu1 }
 0x282   : > { %v8587_v57 = vpop.f32.mrb[7].mxu1  ;;  %5874 = vmatmul.mubr.msk.bf16.vlgmr.msra.gmra.mrb[0].mxu0 %vm921_vm7, %v8095_v16 }
 0x283   : > { %2329 = vmatprep.mubr.bf16.mxu0 %v9830_v15  ;;  %2800 = vmatpush1.bf16.msra.mxu0 %v7138_v32 }
 0x284   : > { %6456 = vmatmul.mubr.msk.bf16.gmra.mrb[112].mxu1 %vm921_vm7, %v8496_v18  ;;  %2801 = vmatprep.subr.bf16.mxu0 %v7144_v58  ;;  %v7036_v58 = vpop.permute.xlu1 %7035 }
 0x285   : > { %6459 = vmatprep.mubr.msk.bf16.mxu1 %vm7659_vm8, %v9832_v0  ;;  %v7038_v60 = vunpack.i.h.bf16 %v7036_v58 }
 0x287   : > { %v8596_v19 = vpop.f32.mrb[8].mxu1  ;;  %2802 = vmatpush1.bf16.msra.mxu0 %v7142_v63 }
 0x288   : > { %v8598_v61 = vpop.f32.mrb[9].mxu1  ;;  %2803 = vmatprep.subr.bf16.mxu0 %v7148_v59 }
 0x289   : > { %v1103_v6 = vpop.f32.mrb[10].mxu1 }
 0x28a   : > { %v1104_v2 = vpop.f32.mrb[11].mxu1  ;;  %5875 = vmatmul.mubr.msk.bf16.gmra.mrb[4].mxu0 %vm921_vm7, %v8194_v4  ;;  %v7041_v6 = vpop.permute.xlu0 %7040 }
 0x28b   : > { %2339 = vmatprep.mubr.bf16.mxu0 %v9830_v15  ;;  %2804 = vmatpush1.bf16.msra.mxu0 %v7146_v56  ;;  %v7037_v56 = vunpack.i.l.bf16 %v7036_v58 }
 0x28c   : > { %6460 = vmatmul.mubr.msk.bf16.gmra.mrb[116].mxu1 %vm921_vm7, %v8505_v30  ;;  %5908 = vmatprep.subr.msk.bf16.mxu0 %vm955_vm2, %v5906_v14 }
 0x28d   : > { %6463 = vmatprep.mubr.msk.bf16.mxu1 %vm7659_vm8, %v9832_v0  ;;  %v8675_v14 = vpack.c.bf16 %v7038_v60, %v7037_v56 }
 0x28e   : > { %v2155_v12 = vpop.permute.xlu0 %2154 }
 0x28f   : > { %v8609_v9 = vpop.f32.mrb[12].mxu1  ;;  %2806 = vmatpush1.bf16.msra.mxu0 %v2791_v29  ;;  %v8718_v58 = vpack.c.bf16 %v2155_v12, %v2155_v12 }
 0x290   : > { %v6341_v18 = vpop.f32.mrb[13].mxu1 }
 0x291   : > { %v8611_v37 = vpop.f32.mrb[14].mxu1  ;;  %v7043_v18 = vunpack.i.h.bf16 %v7041_v6 }
 0x292   : > { %v6342_v11 = vpop.f32.mrb[15].mxu1  ;;  %5876 = vmatmul.mubr.msk.bf16.gmra.mrb[8].mxu0 %vm921_vm7, %v8198_v5 }
 0x293   : > { %2349 = vmatprep.mubr.bf16.mxu0 %v9830_v15  ;;  %v7042_v11 = vunpack.i.l.bf16 %v7041_v6 }
 0x294   : > { %6464 = vmatmul.mubr.msk.bf16.gmra.mrb[120].mxu1 %vm921_vm7, %v8514_v39  ;;  %v7023_v39 = vunpack.i.h.bf16 %v7021_v34  ;;  %v7046_v34 = vpop.permute.xlu1 %7045 }
 0x295   : > { %6467 = vmatprep.mubr.msk.bf16.mxu1 %vm7659_vm8, %v9832_v0  ;;  %v8688_v24 = vpack.c.bf16 %v7043_v18, %v7042_v11 }
 0x296   : > { %v8636_v47 = vpack.c.bf16 %v7023_v39, %v7022_v49  ;;  %v7145_v39 = vld [vmem:[#allocation6 + $0x158] ss:$12 sps:$4 sm:$0xff]  }
 0x297   : > { %v8620_v30 = vpop.f32.mrb[16].mxu1 }
 0x298   : > { %v6345_v22 = vpop.f32.mrb[17].mxu1 }
 0x299   : > { %v8625_v50 = vpop.f32.mrb[18].mxu1 }
 0x29a   : > { %v6346_v52 = vpop.f32.mrb[19].mxu1  ;;  %5877 = vmatmul.mubr.msk.bf16.gmra.mrb[12].mxu0 %vm921_vm7, %v8623_v33 }
 0x29b   : > { %2359 = vmatprep.mubr.bf16.mxu0 %v9830_v15 }
 0x29c   : > { %6468 = vmatmul.mubr.msk.bf16.gmra.mrb[124].mxu1 %vm921_vm7, %v8523_v43 }
 0x29d   : > { %6471 = vmatprep.mubr.msk.bf16.mxu1 %vm7659_vm8, %v9832_v0 }
 0x29f   : > { %v8634_v13 = vpop.f32.mrb[20].mxu1 }
 0x2a0   : > { %v6349_v36 = vpop.f32.mrb[21].mxu1 }
 0x2a1   : > { %v8638_v54 = vpop.f32.mrb[22].mxu1  ;;  %v7048_v36 = vunpack.i.h.bf16 %v7046_v34 }
 0x2a2   : > { %v6350_v55 = vpop.f32.mrb[23].mxu1  ;;  %5878 = vmatmul.mubr.msk.bf16.gmra.mrb[16].mxu0 %vm921_vm7, %v8636_v47 }
 0x2a3   : > { %2369 = vmatprep.mubr.bf16.mxu0 %v9830_v15 }
 0x2a4   : > { %6472 = vmatmul.mubr.msk.bf16.gmra.mrb[128].mxu1 %vm921_vm7, %v8532_v53 }
 0x2a5   : > { %6475 = vmatprep.mubr.msk.bf16.mxu1 %vm7659_vm8, %v9832_v0 }
 0x2a7   : > { %v8647_v43 = vpop.f32.mrb[24].mxu1 }
 0x2a8   : > { %v6353_v41 = vpop.f32.mrb[25].mxu1 }
 0x2a9   : > { %v8651_v42 = vpop.f32.mrb[26].mxu1 }
 0x2aa   : > { %v6354_v27 = vpop.f32.mrb[27].mxu1  ;;  %5879 = vmatmul.mubr.msk.bf16.gmra.mrb[20].mxu0 %vm921_vm7, %v8649_v46 }
 0x2ab   : > { %2379 = vmatprep.mubr.bf16.mxu0 %v9830_v15 }
 0x2ac   : > { %6476 = vmatmul.mubr.msk.bf16.gmra.mrb[132].mxu1 %vm921_vm7, %v8541_v21 }
 0x2ad   : > { %6479 = vmatprep.mubr.msk.bf16.mxu1 %vm7659_vm8, %v9832_v0 }
 0x2af   : > { %v8660_v53 = vpop.f32.mrb[28].mxu1 }
 0x2b0   : > { %v6357_v32 = vpop.f32.mrb[29].mxu1 }
 0x2b1   : > { %v8664_v63 = vpop.f32.mrb[30].mxu1 }
 0x2b2   : > { %v6358_v59 = vpop.f32.mrb[31].mxu1  ;;  %5880 = vmatmul.mubr.msk.bf16.gmra.mrb[24].mxu0 %vm921_vm7, %v8662_v28 }
 0x2b3   : > { %2389 = vmatprep.mubr.bf16.mxu0 %v9830_v15 }
 0x2b4   : > { %6480 = vmatmul.mubr.msk.bf16.gmra.mrb[136].mxu1 %vm921_vm7, %v8551_v26 }
 0x2b5   : > { %6483 = vmatprep.mubr.msk.bf16.mxu1 %vm7659_vm8, %v9832_v0 }
 0x2b7   : > { %v8673_v21 = vpop.f32.mrb[32].mxu1 }
 0x2b8   : > { %v6361_v20 = vpop.f32.mrb[33].mxu1 }
 0x2b9   : > { %v8677_v2 = vpop.f32.mrb[34].mxu1 }
 0x2ba   : > { %v6362_v29 = vpop.f32.mrb[35].mxu1  ;;  %5881 = vmatmul.mubr.msk.bf16.gmra.mrb[28].mxu0 %vm921_vm7, %v8675_v14 }
 0x2bb   : > { %2399 = vmatprep.mubr.bf16.mxu0 %v9830_v15 }
 0x2bc   : > { %6484 = vmatmul.mubr.msk.bf16.gmra.mrb[140].mxu1 %vm921_vm7, %v8565_v23  ;;  %v7047_v23 = vunpack.i.l.bf16 %v7046_v34 }
 0x2bd   : > { %6495 = vmatprep.mubr.msk.bf16.mxu1 %vm7659_vm8, %v9832_v0 }
 0x2be   : > { %v8702_v17 = vpack.c.bf16 %v7048_v36, %v7047_v23 }
 0x2bf   : > { %v8686_v26 = vpop.f32.mrb[36].mxu1 }
 0x2c0   : > { %v6365_v22 = vpop.f32.mrb[37].mxu1 }
 0x2c1   : > { %v8690_v52 = vpop.f32.mrb[38].mxu1 }
 0x2c2   : > { %v6366_v49 = vpop.f32.mrb[39].mxu1  ;;  %5882 = vmatmul.mubr.msk.bf16.gmra.mrb[32].mxu0 %vm921_vm7, %v8688_v24 }
 0x2c3   : > { %2409 = vmatprep.mubr.bf16.mxu0 %v9830_v15 }
 0x2c4   : > { %6496 = vmatmul.mubr.msk.bf16.vlgmr.msra.gmra.mrb[144].mxu1 %vm921_vm7, %v8095_v16  ;;  %v7153_v16 = vld [vmem:[#allocation6 + $0x1a0] ss:$0 sps:$4 sm:$0xff]  }
 0x2c5   : > { %6540 = vmatpush3.bf16.msra.mxu1 %v7145_v39  ;;  %6499 = vmatprep.mubr.msk.bf16.mxu1 %vm7659_vm8, %v9832_v0  ;;  %v2797_v1 = vsel %vm955_vm2, %v7153_v16, 0 }
 0x2c6   : > { %6541 = vmatprep.subr.bf16.mxu1 %v9832_v0 }
 0x2c7   : > { %v8700_v55 = vpop.f32.mrb[40].mxu1 }
 0x2c8   : > { %v6369_v44 = vpop.f32.mrb[41].mxu1 }
 0x2c9   : > { %v8704_v41 = vpop.f32.mrb[42].mxu1  ;;  %6542 = vmatpush3.bf16.msra.mxu1 %v7151_v51 }
 0x2ca   : > { %v6370_v27 = vpop.f32.mrb[43].mxu1  ;;  %5883 = vmatmul.mubr.msk.bf16.gmra.mrb[36].mxu0 %vm921_vm7, %v8702_v17  ;;  %6543 = vmatprep.subr.bf16.mxu1 %v9832_v0 }
 0x2cb   : > { %2419 = vmatprep.mubr.bf16.mxu0 %v9830_v15 }
 0x2cc   : > { %6500 = vmatmul.mubr.msk.bf16.gmra.mrb[148].mxu1 %vm921_vm7, %v8194_v4 }
 0x2cd   : > { %6503 = vmatprep.mubr.msk.bf16.mxu1 %vm7659_vm8, %v9832_v0  ;;  %6544 = vmatpush3.bf16.msra.mxu1 %v7152_v48  ;;  %v7051_v48 = vpop.permute.xlu0 %7050 }
 0x2ce   : > { %6545 = vmatprep.subr.bf16.mxu1 %v9832_v0 }
 0x2cf   : > { %v8716_v32 = vpop.f32.mrb[44].mxu1 }
 0x2d0   : > { %v6373_v59 = vpop.f32.mrb[45].mxu1 }
 0x2d1   : > { %v8720_v60 = vpop.f32.mrb[46].mxu1  ;;  %6546 = vmatpush3.bf16.msra.mxu1 %v2797_v1  ;;  %v7052_v1 = vunpack.i.l.bf16 %v7051_v48 }
 0x2d2   : > { %v6374_v56 = vpop.f32.mrb[47].mxu1  ;;  %5884 = vmatmul.mubr.msk.bf16.gmra.mrb[48].mxu0 %vm921_vm7, %v8718_v58 }
 0x2d3   : > { %2831 = vmatprep.mubr.bf16.mxu0 %v9830_v15 }
 0x2d4   : > { %6504 = vmatmul.mubr.msk.bf16.gmra.mrb[152].mxu1 %vm921_vm7, %v8198_v5 }
 0x2d5   : > { %6507 = vmatprep.mubr.msk.bf16.mxu1 %vm7659_vm8, %v9832_v0 }
 0x2d7   : > { %v8729_v4 = vpop.f32.mrb[48].mxu1 }
 0x2d8   : > { %v6377_v20 = vpop.f32.mrb[49].mxu1 }
 0x2d9   : > { %v8731_v6 = vpop.f32.mrb[50].mxu1 }
 0x2da   : > { %v6378_v29 = vpop.f32.mrb[51].mxu1  ;;  %5909 = vmatmul.mubr.msk.bf16.vlgmr.msra.gmra.mrb[0].mxu0 %vm921_vm7, %v8135_v40 }
 0x2db   : > { %2841 = vmatprep.mubr.bf16.mxu0 %v9830_v15 }
 0x2dc   : > { %6508 = vmatmul.mubr.msk.bf16.gmra.mrb[156].mxu1 %vm921_vm7, %v8623_v33 }
 0x2dd   : > { %6511 = vmatprep.mubr.msk.bf16.mxu1 %vm7659_vm8, %v9832_v0 }
 0x2df   : > { %v8740_v5 = vpop.f32.mrb[52].mxu1 }
 0x2e0   : > { %v6381_v18 = vpop.f32.mrb[53].mxu1 }
 0x2e1   : > { %v1223_v11 = vpop.f32.mrb[54].mxu1 }
 0x2e2   : > { %v6382_v22 = vpop.f32.mrb[55].mxu1  ;;  %5910 = vmatmul.mubr.msk.bf16.gmra.mrb[4].mxu0 %vm921_vm7, %v8202_v7 }
 0x2e3   : > { %2851 = vmatprep.mubr.bf16.mxu0 %v9830_v15 }
 0x2e4   : > { %6512 = vmatmul.mubr.msk.bf16.gmra.mrb[160].mxu1 %vm921_vm7, %v8636_v47  ;;  %v2634_v47 = vpop.permute.xlu1 %2633 }
 0x2e5   : > { %6515 = vmatprep.mubr.msk.bf16.mxu1 %vm7659_vm8, %v9832_v0  ;;  %v8763_v51 = vpack.c.bf16 %v2634_v47, %v8293_v10 }
 0x2e7   : > { %v1499_v33 = vpop.f32.mrb[56].mxu1 }
 0x2e8   : > { %v8750_v34 = vadd.f32 %v1499_v33, %v8609_v9  ;;  %v6393_v39 = vpop.f32.mrb[57].mxu1  ;;  %v7056_v22 = vpop.permute.xlu1 %7055 }
 0x2e9   : > { %v1502_v49 = vpop.f32.mrb[58].mxu1 }
 0x2ea   : > { %v8753_v36 = vadd.f32 %v1502_v49, %v8611_v37  ;;  %v6394_v23 = vpop.f32.mrb[59].mxu1  ;;  %5911 = vmatmul.mubr.msk.bf16.gmra.mrb[8].mxu0 %vm921_vm7, %v8206_v8  ;;  %v7057_v49 = vunpack.i.l.bf16 %v7056_v22 }
 0x2eb   : > { %2861 = vmatprep.mubr.bf16.mxu0 %v9830_v15 }
 0x2ec   : > { %6516 = vmatmul.mubr.msk.bf16.gmra.mrb[164].mxu1 %vm921_vm7, %v8649_v46  ;;  %v7053_v46 = vunpack.i.h.bf16 %v7051_v48 }
 0x2ed   : > { %6519 = vmatprep.mubr.msk.bf16.mxu1 %vm7659_vm8, %v9832_v0 }
 0x2ee   : > { %v8784_v29 = vpack.c.bf16 %v7053_v46, %v7052_v1 }
 0x2ef   : > { %v1507_v9 = vpop.f32.mrb[60].mxu1 }
 0x2f0   : > { %v8766_v37 = vadd.f32 %v1507_v9, %v8620_v30  ;;  %v6397_v44 = vpop.f32.mrb[61].mxu1  ;;  %v7061_v9 = vpop.permute.xlu0 %7060 }
 0x2f1   : > { %v1510_v27 = vpop.f32.mrb[62].mxu1 }
 0x2f2   : > { %v8769_v16 = vadd.f32 %v1510_v27, %v8625_v50  ;;  %v6398_v12 = vpop.f32.mrb[63].mxu1  ;;  %5912 = vmatmul.mubr.msk.bf16.gmra.mrb[12].mxu0 %vm921_vm7, %v8763_v51 }
 0x2f3   : > { %2871 = vmatprep.mubr.bf16.mxu0 %v9830_v15  ;;  %v7062_v12 = vunpack.i.l.bf16 %v7061_v9 }
 0x2f4   : > { %6520 = vmatmul.mubr.msk.bf16.gmra.mrb[168].mxu1 %vm921_vm7, %v8662_v28 }
 0x2f5   : > { %v1458_v10 = vpop.f32.mrb[40].mxu0  ;;  %6523 = vmatprep.mubr.msk.bf16.mxu1 %vm7659_vm8, %v9832_v0 }
 0x2f6   : > { %v8779_v30 = vadd.f32 %v1458_v10, %v8596_v19  ;;  %v1460_v50 = vpop.f32.mrb[41].mxu0  ;;  %v7066_v10 = vpop.permute.xlu1 %7065 }
 0x2f7   : > { %v8782_v59 = vadd.f32 %v1460_v50, %v8598_v61  ;;  %v1462_v56 = vpop.f32.mrb[42].mxu0  ;;  %v1515_v20 = vpop.f32.mrb[64].mxu1  ;;  %v7058_v61 = vunpack.i.h.bf16 %v7056_v22 }
 0x2f8   : > { %v8787_v18 = vadd.f32 %v1515_v20, %v8634_v13  ;;  %v1463_v11 = vpop.f32.mrb[43].mxu0  ;;  %v6401_v28 = vpop.f32.mrb[65].mxu1 }
 0x2f9   : > { %v1518_v33 = vpop.f32.mrb[66].mxu1  ;;  %v8799_v23 = vpack.c.bf16 %v7058_v61, %v7057_v49  ;;  %v7067_v11 = vunpack.i.l.bf16 %v7066_v10 }
 0x2fa   : > { %v8790_v39 = vadd.f32 %v1518_v33, %v8638_v54  ;;  %v6402_v19 = vpop.f32.mrb[67].mxu1  ;;  %5913 = vmatmul.mubr.msk.bf16.gmra.mrb[16].mxu0 %vm921_vm7, %v8784_v29  ;;  %v7071_v33 = vpop.permute.xlu0 %7070 }
 0x2fb   : > { %2881 = vmatprep.mubr.bf16.mxu0 %v9830_v15 }
 0x2fc   : > { %6524 = vmatmul.mubr.msk.bf16.gmra.mrb[172].mxu1 %vm921_vm7, %v8675_v14  ;;  %v7063_v14 = vunpack.i.h.bf16 %v7061_v9 }
 0x2fd   : > { %6527 = vmatprep.mubr.msk.bf16.mxu1 %vm7659_vm8, %v9832_v0 }
 0x2fe   : > { %v8814_v46 = vpack.c.bf16 %v7063_v14, %v7062_v12 }
 0x2ff   : > { %v1523_v13 = vpop.f32.mrb[68].mxu1 }
 0x300   : > { %v8802_v54 = vadd.f32 %v1523_v13, %v8647_v43  ;;  %v6405_v47 = vpop.f32.mrb[69].mxu1  ;;  %v7072_v13 = vunpack.i.l.bf16 %v7071_v33 }
 0x301   : > { %v1526_v44 = vpop.f32.mrb[70].mxu1 }
 0x302   : > { %v8805_v48 = vadd.f32 %v1526_v44, %v8651_v42  ;;  %v6406_v27 = vpop.f32.mrb[71].mxu1  ;;  %5914 = vmatmul.mubr.msk.bf16.gmra.mrb[20].mxu0 %vm921_vm7, %v8799_v23  ;;  %v7076_v44 = vpop.permute.xlu1 %7075 }
 0x303   : > { %2891 = vmatprep.mubr.bf16.mxu0 %v9830_v15 }
 0x304   : > { %6528 = vmatmul.mubr.msk.bf16.gmra.mrb[176].mxu1 %vm921_vm7, %v8688_v24  ;;  %v7068_v24 = vunpack.i.h.bf16 %v7066_v10 }
 0x305   : > { %6531 = vmatprep.mubr.msk.bf16.mxu1 %vm7659_vm8, %v9832_v0 }
 0x306   : > { %v8829_v28 = vpack.c.bf16 %v7068_v24, %v7067_v11 }
 0x307   : > { %v1531_v43 = vpop.f32.mrb[72].mxu1 }
 0x308   : > { %v8817_v42 = vadd.f32 %v1531_v43, %v8660_v53  ;;  %v6409_v1 = vpop.f32.mrb[73].mxu1  ;;  %v7077_v43 = vunpack.i.l.bf16 %v7076_v44 }
 0x309   : > { %v1534_v50 = vpop.f32.mrb[74].mxu1 }
 0x30a   : > { %v8820_v56 = vadd.f32 %v1534_v50, %v8664_v63  ;;  %v6410_v20 = vpop.f32.mrb[75].mxu1  ;;  %5915 = vmatmul.mubr.msk.bf16.gmra.mrb[24].mxu0 %vm921_vm7, %v8814_v46 }
 0x30b   : > { %2901 = vmatprep.mubr.bf16.mxu0 %v9830_v15 }
 0x30c   : > { %6532 = vmatmul.mubr.msk.bf16.gmra.mrb[180].mxu1 %vm921_vm7, %v8702_v17  ;;  %v7073_v17 = vunpack.i.h.bf16 %v7071_v33 }
 0x30d   : > { %6535 = vmatprep.mubr.msk.bf16.mxu1 %vm7659_vm8, %v9832_v0 }
 0x30e   : > { %v8844_v47 = vpack.c.bf16 %v7073_v17, %v7072_v13 }
 0x30f   : > { %v1539_v53 = vpop.f32.mrb[76].mxu1 }
 0x310   : > { %v8832_v63 = vadd.f32 %v1539_v53, %v8673_v21  ;;  %v6413_v22 = vpop.f32.mrb[77].mxu1 }
 0x311   : > { %v1542_v19 = vpop.f32.mrb[78].mxu1 }
 0x312   : > { %v8835_v61 = vadd.f32 %v1542_v19, %v8677_v2  ;;  %v6414_v49 = vpop.f32.mrb[79].mxu1  ;;  %5916 = vmatmul.mubr.msk.bf16.gmra.mrb[28].mxu0 %vm921_vm7, %v8829_v28 }
 0x313   : > { %2911 = vmatprep.mubr.bf16.mxu0 %v9830_v15 }
 0x314   : > { %6536 = vmatmul.mubr.msk.bf16.gmra.mrb[184].mxu1 %vm921_vm7, %v8718_v58  ;;  %v7078_v58 = vunpack.i.h.bf16 %v7076_v44 }
 0x315   : > { %6547 = vmatprep.mubr.msk.bf16.mxu1 %vm7659_vm8, %v9832_v0 }
 0x316   : > { %v8859_v1 = vpack.c.bf16 %v7078_v58, %v7077_v43 }
 0x317   : > { %v1547_v21 = vpop.f32.mrb[80].mxu1 }
 0x318   : > { %v8847_v2 = vadd.f32 %v1547_v21, %v8686_v26  ;;  %v6417_v9 = vpop.f32.mrb[81].mxu1 }
 0x319   : > { %v1550_v27 = vpop.f32.mrb[82].mxu1 }
 0x31a   : > { %v8850_v14 = vadd.f32 %v1550_v27, %v8690_v52  ;;  %v6418_v12 = vpop.f32.mrb[83].mxu1  ;;  %5917 = vmatmul.mubr.msk.bf16.gmra.mrb[32].mxu0 %vm921_vm7, %v8844_v47 }
 0x31b   : > { %2921 = vmatprep.mubr.bf16.mxu0 %v9830_v15 }
 0x31c   : > { %6548 = vmatmul.mubr.msk.bf16.vlgmr.msra.gmra.mrb[188].mxu1 %vm921_vm7, %v8135_v40  ;;  %v2667_v40 = vpop.permute.xlu0 %2666 }
 0x31d   : > { %6551 = vmatprep.mubr.msk.bf16.mxu1 %vm7659_vm8, %v9832_v0  ;;  %v8874_v11 = vpack.c.bf16 %v2667_v40, %v2667_v40 }
 0x31f   : > { %v1555_v26 = vpop.f32.mrb[84].mxu1 }
 0x320   : > { %v8862_v52 = vadd.f32 %v1555_v26, %v8700_v55  ;;  %v6421_v10 = vpop.f32.mrb[85].mxu1 }
 0x321   : > { %v1558_v50 = vpop.f32.mrb[86].mxu1 }
 0x322   : > { %v8865_v20 = vadd.f32 %v1558_v50, %v8704_v41  ;;  %v6422_v24 = vpop.f32.mrb[87].mxu1  ;;  %5918 = vmatmul.mubr.msk.bf16.gmra.mrb[36].mxu0 %vm921_vm7, %v8859_v1 }
 0x323   : > { %2931 = vmatprep.mubr.bf16.mxu0 %v9830_v15 }
 0x324   : > { %6552 = vmatmul.mubr.msk.bf16.gmra.mrb[192].mxu1 %vm921_vm7, %v8202_v7 }
 0x325   : > { %6555 = vmatprep.mubr.msk.bf16.mxu1 %vm7659_vm8, %v9832_v0 }
 0x327   : > { %v1563_v55 = vpop.f32.mrb[88].mxu1 }
 0x328   : > { %v8877_v53 = vadd.f32 %v1563_v55, %v8716_v32  ;;  %v6425_v41 = vpop.f32.mrb[89].mxu1 }
 0x329   : > { %v1566_v22 = vpop.f32.mrb[90].mxu1 }
 0x32a   : > { %v8880_v33 = vadd.f32 %v1566_v22, %v8720_v60  ;;  %v6426_v19 = vpop.f32.mrb[91].mxu1  ;;  %5919 = vmatmul.mubr.msk.bf16.gmra.mrb[52].mxu0 %vm921_vm7, %v8874_v11 }
 0x32c   : > { %6556 = vmatmul.mubr.msk.bf16.gmra.mrb[196].mxu1 %vm921_vm7, %v8206_v8 }
 0x32d   : > { %6559 = vmatprep.mubr.msk.bf16.mxu1 %vm7659_vm8, %v9832_v0 }
 0x32f   : > { %v1571_v7 = vpop.f32.mrb[92].mxu1 }
 0x330   : > { %v8889_v49 = vadd.f32 %v1571_v7, %v8729_v4  ;;  %v6429_v32 = vpop.f32.mrb[93].mxu1 }
 0x331   : > { %v1574_v17 = vpop.f32.mrb[94].mxu1 }
 0x332   : > { %v8892_v13 = vadd.f32 %v1574_v17, %v8731_v6  ;;  %v6430_v60 = vpop.f32.mrb[95].mxu1 }
 0x334   : > { %6560 = vmatmul.mubr.msk.bf16.gmra.mrb[200].mxu1 %vm921_vm7, %v8763_v51 }
 0x335   : > { %6563 = vmatprep.mubr.msk.bf16.mxu1 %vm7659_vm8, %v9832_v0 }
 0x337   : > { %v1579_v8 = vpop.f32.mrb[96].mxu1 }
 0x338   : > { %v8899_v21 = vadd.f32 %v1579_v8, %v8740_v5  ;;  %v6433_v9 = vpop.f32.mrb[97].mxu1 }
 0x339   : > { %v1582_v44 = vpop.f32.mrb[98].mxu1 }
 0x33a   : > { %v6434_v4 = vpop.f32.mrb[99].mxu1 }
 0x33c   : > { %6564 = vmatmul.mubr.msk.bf16.gmra.mrb[204].mxu1 %vm921_vm7, %v8784_v29 }
 0x33d   : > { %6567 = vmatprep.mubr.msk.bf16.mxu1 %vm7659_vm8, %v9832_v0 }
 0x33f   : > { %v1949_v6 = vpop.f32.mrb[100].mxu1 }
 0x340   : > { %v8906_v27 = vadd.f32 %v1949_v6, %v8750_v34  ;;  %v6445_v51 = vpop.f32.mrb[101].mxu1 }
 0x341   : > { %v1952_v12 = vpop.f32.mrb[102].mxu1 }
 0x342   : > { %v8909_v58 = vadd.f32 %v1952_v12, %v8753_v36  ;;  %v6446_v5 = vpop.f32.mrb[103].mxu1 }
 0x344   : > { %6568 = vmatmul.mubr.msk.bf16.gmra.mrb[208].mxu1 %vm921_vm7, %v8799_v23 }
 0x345   : > { %6571 = vmatprep.mubr.msk.bf16.mxu1 %vm7659_vm8, %v9832_v0 }
 0x347   : > { %v1957_v29 = vpop.f32.mrb[104].mxu1 }
 0x348   : > { %v8916_v43 = vadd.f32 %v1957_v29, %v8766_v37  ;;  %v6449_v26 = vpop.f32.mrb[105].mxu1 }
 0x349   : > { %v1960_v10 = vpop.f32.mrb[106].mxu1  ;;  %v7154_v26 = vld [vmem:[%s9805_s3] ss:$12 sps:$4 sm:$0xff]  }
 0x34a   : > { %v8919_v34 = vadd.f32 %v1960_v10, %v8769_v16  ;;  %v6450_v50 = vpop.f32.mrb[107].mxu1 }
 0x34b   : > { %v7157_v50 = vld [vmem:[%s9805_s3 + $0x18] ss:$12 sps:$4 sm:$0xff]  }
 0x34c   : > { %6572 = vmatmul.mubr.msk.bf16.gmra.mrb[212].mxu1 %vm921_vm7, %v8814_v46 }
 0x34d   : > { %v1908_v36 = vpop.f32.mrb[44].mxu0  ;;  %6575 = vmatprep.mubr.msk.bf16.mxu1 %vm7659_vm8, %v9832_v0 }
 0x34e   : > { %v8926_v23 = vadd.f32 %v1908_v36, %v8779_v30  ;;  %v1910_v24 = vpop.f32.mrb[45].mxu0 }
 0x34f   : > { %v8929_v37 = vadd.f32 %v1910_v24, %v8782_v59  ;;  %v1912_v40 = vpop.f32.mrb[46].mxu0  ;;  %v1965_v55 = vpop.f32.mrb[108].mxu1  ;;  %v7162_v24 = vld [vmem:[%s9805_s3 + $0x34] ss:$12 sps:$4 sm:$0xff]  }
 0x350   : > { %v8932_v16 = vadd.f32 %v1965_v55, %v8787_v18  ;;  %v1913_v41 = vpop.f32.mrb[47].mxu0  ;;  %v6453_v22 = vpop.f32.mrb[109].mxu1 }
 0x351   : > { %v1968_v19 = vpop.f32.mrb[110].mxu1  ;;  %v7165_v41 = vld [vmem:[%s9805_s3 + $0x4c] ss:$12 sps:$4 sm:$0xff]  }
 0x352   : > { %v8935_v46 = vadd.f32 %v1968_v19, %v8790_v39  ;;  %v6454_v7 = vpop.f32.mrb[111].mxu1 }
 0x354   : > { %6576 = vmatmul.mubr.msk.bf16.gmra.mrb[216].mxu1 %vm921_vm7, %v8829_v28 }
 0x355   : > { %6579 = vmatprep.mubr.msk.bf16.mxu1 %vm7659_vm8, %v9832_v0 }
 0x357   : > { %v1973_v30 = vpop.f32.mrb[112].mxu1 }
 0x358   : > { %v8942_v59 = vadd.f32 %v1973_v30, %v8802_v54  ;;  %v6457_v32 = vpop.f32.mrb[113].mxu1 }
 0x359   : > { %v1976_v18 = vpop.f32.mrb[114].mxu1  ;;  %v7168_v32 = vld [vmem:[%s9805_s3 + $0x64] ss:$12 sps:$4 sm:$0xff]  }
 0x35a   : > { %v8945_v17 = vadd.f32 %v1976_v18, %v8805_v48  ;;  %v6458_v60 = vpop.f32.mrb[115].mxu1 }
 0x35c   : > { %6580 = vmatmul.mubr.msk.bf16.gmra.mrb[220].mxu1 %vm921_vm7, %v8844_v47 }
 0x35d   : > { %6583 = vmatprep.mubr.msk.bf16.mxu1 %vm7659_vm8, %v9832_v0 }
 0x35f   : > { %v1981_v39 = vpop.f32.mrb[116].mxu1 }
 0x360   : > { %v8952_v28 = vadd.f32 %v1981_v39, %v8817_v42  ;;  %v6461_v8 = vpop.f32.mrb[117].mxu1  ;;  %v7171_v39 = vld [vmem:[%s9805_s3 + $0x7c] ss:$12 sps:$4 sm:$0xff]  }
 0x361   : > { %v1984_v9 = vpop.f32.mrb[118].mxu1 }
 0x362   : > { %v8955_v54 = vadd.f32 %v1984_v9, %v8820_v56  ;;  %v6462_v44 = vpop.f32.mrb[119].mxu1 }
 0x364   : > { %6584 = vmatmul.mubr.msk.bf16.gmra.mrb[224].mxu1 %vm921_vm7, %v8859_v1 }
 0x365   : > { %6587 = vmatprep.mubr.msk.bf16.mxu1 %vm7659_vm8, %v9832_v0 }
 0x367   : > { %v1989_v48 = vpop.f32.mrb[120].mxu1 }
 0x368   : > { %v8962_v47 = vadd.f32 %v1989_v48, %v8832_v63  ;;  %v6465_v4 = vpop.f32.mrb[121].mxu1 }
 0x369   : > { %v1992_v6 = vpop.f32.mrb[122].mxu1  ;;  %v7174_v4 = vld [vmem:[%s9805_s3 + $0x94] ss:$12 sps:$4 sm:$0xff]  }
 0x36a   : > { %v8965_v42 = vadd.f32 %v1992_v6, %v8835_v61  ;;  %v6466_v51 = vpop.f32.mrb[123].mxu1  ;;  %v7156_v61 = vld [vmem:[%s9805_s3 + $0x4] ss:$12 sps:$4 sm:$0xff]  }
 0x36b   : > { %3895 = vmatprep.subr.bf16.mxu0 %v7156_v61 }
 0x36c   : > { %6588 = vmatmul.mubr.msk.bf16.gmra.mrb[228].mxu1 %vm921_vm7, %v8874_v11  ;;  %v7159_v11 = vld [vmem:[%s9805_s3 + $0x1c] ss:$12 sps:$4 sm:$0xff]   ;;  %3896 = vmatpush1.bf16.msra.mxu0 %v7154_v26 }
 0x36d   : > { %3897 = vmatprep.subr.bf16.mxu0 %v7159_v11  ;;  %v7180_v11 = vld [vmem:[%s9805_s3 + $0xc4] ss:$12 sps:$4 sm:$0xff]  }
 0x36f   : > { %v1997_v56 = vpop.f32.mrb[124].mxu1 }
 0x370   : > { %v8970_v12 = vadd.f32 %v1997_v56, %v8847_v2  ;;  %v6469_v1 = vpop.f32.mrb[125].mxu1  ;;  %3898 = vmatpush1.bf16.msra.mxu0 %v7157_v50  ;;  %v7177_v56 = vld [vmem:[%s9805_s3 + $0xac] ss:$12 sps:$4 sm:$0xff]   ;;  %v7185_v50 = vld [vmem:[%s9805_s3 + $0xdc] ss:$12 sps:$4 sm:$0xff]  }
 0x371   : > { %v2000_v5 = vpop.f32.mrb[126].mxu1  ;;  %3899 = vmatprep.subr.bf16.mxu0 %v7162_v24  ;;  %v7187_v24 = vld [vmem:[%s9805_s3 + $0x20] ss:$12 sps:$4 sm:$0xff]  }
 0x372   : > { %v8973_v29 = vadd.f32 %v2000_v5, %v8850_v14  ;;  %v6470_v63 = vpop.f32.mrb[127].mxu1 }
 0x377   : > { %v2005_v2 = vpop.f32.mrb[128].mxu1 }
 0x378   : > { %v8985_v10 = vadd.f32 %v2005_v2, %v8862_v52  ;;  %v6473_v14 = vpop.f32.mrb[129].mxu1  ;;  %v7160_v52 = vld [vmem:[%s9805_s3 + $0x30] ss:$12 sps:$4 sm:$0xff]   ;;  %v7181_v2 = vld [vmem:[%s9805_s3 + $0xc8] ss:$12 sps:$4 sm:$0xff]  }
 0x379   : > { %v2008_v36 = vpop.f32.mrb[130].mxu1  ;;  %3900 = vmatpush1.bf16.msra.mxu0 %v7160_v52  ;;  %v7182_v14 = vld [vmem:[%s9805_s3 + $0x8] ss:$12 sps:$4 sm:$0xff]   ;;  %6238 = vmatprep.subr.bf16.mxu1 %v7181_v2 }
 0x37a   : > { %v8994_v40 = vadd.f32 %v2008_v36, %v8865_v20  ;;  %v6474_v55 = vpop.f32.mrb[131].mxu1  ;;  %v7163_v20 = vld [vmem:[%s9805_s3 + $0x48] ss:$12 sps:$4 sm:$0xff]   ;;  %3901 = vmatprep.subr.bf16.mxu0 %v7165_v41  ;;  %v7186_v36 = vld [vmem:[%s9805_s3 + $0xe0] ss:$12 sps:$4 sm:$0xff]   ;;  %6239 = vmatpush3.bf16.msra.mxu1 %v7182_v14 }
 0x37b   : > { %6240 = vmatprep.subr.bf16.mxu1 %v7186_v36 }
 0x37d   : > { %3902 = vmatpush1.bf16.msra.mxu0 %v7163_v20 }
 0x37e   : > { %3903 = vmatprep.subr.bf16.mxu0 %v7168_v32  ;;  %6241 = vmatpush3.bf16.msra.mxu1 %v7187_v24  ;;  %v7190_v32 = vld [vmem:[%s9805_s3 + $0xf4] ss:$12 sps:$4 sm:$0xff]   ;;  %v7211_v24 = vld [vmem:[%s9805_s3 + $0x158] ss:$12 sps:$4 sm:$0xff]  }
 0x37f   : > { %v2013_v22 = vpop.f32.mrb[132].mxu1 }
 0x380   : > { %v9003_v19 = vadd.f32 %v2013_v22, %v8877_v53  ;;  %v6477_v7 = vpop.f32.mrb[133].mxu1  ;;  %v7166_v53 = vld [vmem:[%s9805_s3 + $0x60] ss:$12 sps:$4 sm:$0xff]   ;;  %v7183_v22 = vld [vmem:[%s9805_s3 + $0xd8] ss:$12 sps:$4 sm:$0xff]  }
 0x381   : > { %v2016_v30 = vpop.f32.mrb[134].mxu1  ;;  %3904 = vmatpush1.bf16.msra.mxu0 %v7166_v53  ;;  %v7195_v53 = vld [vmem:[%s9805_s3 + $0x10c] ss:$12 sps:$4 sm:$0xff]  }
 0x382   : > { %v9012_v18 = vadd.f32 %v2016_v30, %v8880_v33  ;;  %v6478_v60 = vpop.f32.mrb[135].mxu1  ;;  %v7169_v33 = vld [vmem:[%s9805_s3 + $0x78] ss:$12 sps:$4 sm:$0xff]   ;;  %3905 = vmatprep.subr.bf16.mxu0 %v7171_v39  ;;  %v7196_v39 = vld [vmem:[%s9805_s3 + $0x110] ss:$12 sps:$4 sm:$0xff]  }
 0x383   : > { %v7188_v60 = vld [vmem:[%s9805_s3 + $0xf0] ss:$12 sps:$4 sm:$0xff]  }
 0x385   : > { %3906 = vmatpush1.bf16.msra.mxu0 %v7169_v33  ;;  %v7201_v33 = vld [vmem:[%s9805_s3 + $0x128] ss:$12 sps:$4 sm:$0xff]  }
 0x386   : > { %3907 = vmatprep.subr.bf16.mxu0 %v7174_v4 }
 0x387   : > { %v2021_v8 = vpop.f32.mrb[136].mxu1 }
 0x388   : > { %v9021_v9 = vadd.f32 %v2021_v8, %v8889_v49  ;;  %v6481_v44 = vpop.f32.mrb[137].mxu1  ;;  %v7172_v49 = vld [vmem:[%s9805_s3 + $0x90] ss:$12 sps:$4 sm:$0xff]  }
 0x389   : > { %v2024_v48 = vpop.f32.mrb[138].mxu1  ;;  %3908 = vmatpush1.bf16.msra.mxu0 %v7172_v49  ;;  %v7197_v8 = vld [vmem:[%s9805_s3 + $0x50] ss:$12 sps:$4 sm:$0xff]  }
 0x38a   : > { %v9030_v6 = vadd.f32 %v2024_v48, %v8892_v13  ;;  %v6482_v51 = vpop.f32.mrb[139].mxu1  ;;  %v7175_v13 = vld [vmem:[%s9805_s3 + $0xa8] ss:$12 sps:$4 sm:$0xff]   ;;  %3909 = vmatprep.subr.bf16.mxu0 %v7177_v56  ;;  %v7200_v56 = vld [vmem:[%s9805_s3 + $0x124] ss:$12 sps:$4 sm:$0xff]  }
 0x38b   : > { %v7193_v51 = vld [vmem:[%s9805_s3 + $0x108] ss:$12 sps:$4 sm:$0xff]  }
 0x38d   : > { %3910 = vmatpush1.bf16.msra.mxu0 %v7175_v13  ;;  %v7206_v13 = vld [vmem:[%s9805_s3 + $0x140] ss:$12 sps:$4 sm:$0xff]  }
 0x38e   : > { %3911 = vmatprep.subr.bf16.mxu0 %v7180_v11 }
 0x38f   : > { %v2029_v1 = vpop.f32.mrb[140].mxu1 }
 0x390   : > { %v9039_v5 = vadd.f32 %v2029_v1, %v8899_v21  ;;  %v6485_v63 = vpop.f32.mrb[141].mxu1  ;;  %v7178_v21 = vld [vmem:[%s9805_s3 + $0xc0] ss:$12 sps:$4 sm:$0xff]  }
 0x391   : > { %v2032_v26 = vpop.f32.mrb[142].mxu1  ;;  %3912 = vmatpush1.bf16.msra.mxu0 %v7178_v21  ;;  %v7207_v21 = vld [vmem:[%s9805_s3 + $0x80] ss:$12 sps:$4 sm:$0xff]  }
 0x392   : > { %v6486_v61 = vpop.f32.mrb[143].mxu1  ;;  %3913 = vmatprep.subr.bf16.mxu0 %v7185_v50  ;;  %v7198_v26 = vld [vmem:[%s9805_s3 + $0x120] ss:$12 sps:$4 sm:$0xff]  }
 0x395   : > { %3914 = vmatpush1.bf16.msra.mxu0 %v7183_v22  ;;  %v7203_v22 = vld [vmem:[%s9805_s3 + $0x138] ss:$12 sps:$4 sm:$0xff]  }
 0x396   : > { %3915 = vmatprep.subr.bf16.mxu0 %v7190_v32 }
 0x397   : > { %v2462_v55 = vpop.f32.mrb[144].mxu1 }
 0x398   : > { %v9066_v52 = vadd.f32 %v2462_v55, %v8906_v27  ;;  %v6497_v41 = vpop.f32.mrb[145].mxu1  ;;  %v7191_v27 = vld [vmem:[%s9805_s3 + $0xf8] ss:$12 sps:$4 sm:$0xff]  }
 0x399   : > { %v2465_v7 = vpop.f32.mrb[146].mxu1  ;;  %6242 = vmatprep.subr.bf16.mxu1 %v7191_v27  ;;  %3916 = vmatpush1.bf16.msra.mxu0 %v7188_v60  ;;  %v7216_v27 = vld [vmem:[%s9805_s3 + $0x170] ss:$12 sps:$4 sm:$0xff]   ;;  %v3125_v60 = vlaneseq }
 0x39a   : > { %v9072_v20 = vadd.f32 %v2465_v7, %v8909_v58  ;;  %v6498_v30 = vpop.f32.mrb[147].mxu1  ;;  %v7192_v58 = vld [vmem:[%s9805_s3 + $0x38] ss:$12 sps:$4 sm:$0xff]   ;;  %3917 = vmatprep.subr.bf16.mxu0 %v7195_v53 }
 0x39b   : > { %6243 = vmatpush3.bf16.msra.mxu1 %v7192_v58  ;;  %v7208_v58 = vld [vmem:[%s9805_s3 + $0x150] ss:$12 sps:$4 sm:$0xff]  }
 0x39c   : > { %6244 = vmatprep.subr.bf16.mxu1 %v7196_v39 }
 0x39d   : > { %3918 = vmatpush1.bf16.msra.mxu0 %v7193_v51 }
 0x39e   : > { %3919 = vmatprep.subr.bf16.mxu0 %v7200_v56 }
 0x39f   : > { %v2470_v44 = vpop.f32.mrb[148].mxu1  ;;  %6245 = vmatpush3.bf16.msra.mxu1 %v7197_v8  ;;  %v7217_v8 = vld [vmem:[%s9805_s3 + $0xb0] ss:$12 sps:$4 sm:$0xff]  }
 0x3a0   : > { %v9099_v48 = vadd.f32 %v2470_v44, %v8916_v43  ;;  %v6501_v4 = vpop.f32.mrb[149].mxu1  ;;  %v7202_v43 = vld [vmem:[%s9805_s3 + $0x68] ss:$12 sps:$4 sm:$0xff]   ;;  %6246 = vmatprep.subr.bf16.mxu1 %v7201_v33 }
 0x3a1   : > { %v2473_v49 = vpop.f32.mrb[150].mxu1  ;;  %3920 = vmatpush1.bf16.msra.mxu0 %v7198_v26  ;;  %v9161_v4 = vshrl.u32 %v3125_v60, 7 }
 0x3a2   : > { %v9108_v1 = vadd.f32 %v2473_v49, %v8919_v34  ;;  %v6502_v63 = vpop.f32.mrb[151].mxu1  ;;  %v7205_v34 = vld [vmem:[%s9805_s3 + $0x13c] ss:$12 sps:$4 sm:$0xff]  }
 0x3a3   : > { %6247 = vmatpush3.bf16.msra.mxu1 %v7202_v43  ;;  %3921 = vmatprep.subr.bf16.mxu0 %v7205_v34  ;;  %v7213_v63 = vld [vmem:[%s9805_s3 + $0x168] ss:$12 sps:$4 sm:$0xff]   ;;  %v9182_v34 = vsub.s32 1, %v9161_v4 }
 0x3a4   : > { %6248 = vmatprep.subr.bf16.mxu1 %v7206_v13 }
 0x3a5   : > { %v2421_v61 = vpop.f32.mrb[48].mxu0  ;;  %3922 = vmatpush1.bf16.msra.mxu0 %v7203_v22  ;;  %9872 = vst [vmem:[#allocation19_spill] sm:$0xff] %v9182_v34 }
 0x3a6   : > { %v9123_v11 = vadd.f32 %v2421_v61, %v8926_v23  ;;  %v2423_v2 = vpop.f32.mrb[49].mxu0  ;;  %v9174_v61 = vsub.s32 0, %v9161_v4 }
 0x3a7   : > { %v9129_v14 = vadd.f32 %v2423_v2, %v8929_v37  ;;  %v2425_v50 = vpop.f32.mrb[50].mxu0  ;;  %v2478_v36 = vpop.f32.mrb[152].mxu1  ;;  %v7210_v37 = vld [vmem:[%s9805_s3 + $0x154] ss:$12 sps:$4 sm:$0xff]   ;;  %6249 = vmatpush3.bf16.msra.mxu1 %v7207_v21 }
 0x3a8   : > { %v9135_v55 = vadd.f32 %v2478_v36, %v8932_v16  ;;  %v2426_v23 = vpop.f32.mrb[51].mxu0  ;;  %v6505_v41 = vpop.f32.mrb[153].mxu1  ;;  %v7212_v16 = vld [vmem:[%s9805_s3 + $0x98] ss:$12 sps:$4 sm:$0xff]   ;;  %6250 = vmatprep.subr.bf16.mxu1 %v7211_v24  ;;  %3923 = vmatprep.subr.bf16.mxu0 %v7210_v37  ;;  %9870 = vst [vmem:[#allocation18_spill] sm:$0xff] %v9174_v61 }
 0x3a9   : > { %v2481_v7 = vpop.f32.mrb[154].mxu1  ;;  %3924 = vmatpush1.bf16.msra.mxu0 %v7208_v58 }
 0x3aa   : > { %v9144_v30 = vadd.f32 %v2481_v7, %v8935_v46  ;;  %v6506_v32 = vpop.f32.mrb[155].mxu1  ;;  %v7215_v46 = vld [vmem:[%s9805_s3 + $0x16c] ss:$12 sps:$4 sm:$0xff]  }
 0x3ab   : > { %6251 = vmatpush3.bf16.msra.mxu1 %v7212_v16  ;;  %3925 = vmatprep.subr.bf16.mxu0 %v7215_v46 }
 0x3ac   : > { %6252 = vmatprep.subr.bf16.mxu1 %v7216_v27 }
 0x3ad   : > { %v2833_v53 = vpop.f32.mrb[0].mxu0  ;;  %3926 = vmatpush1.bf16.msra.mxu0 %v7213_v63 }
 0x3ae   : > { %v2835_v39 = vpop.f32.mrb[1].mxu0 }
 0x3af   : > { %v2486_v44 = vpop.f32.mrb[156].mxu1  ;;  %v2837_v33 = vpop.f32.mrb[2].mxu0  ;;  %6253 = vmatpush3.bf16.msra.mxu1 %v7217_v8 }
 0x3b0   : > { %v9164_v51 = vadd.f32 %v2486_v44, %v8942_v59  ;;  %v6509_v49 = vpop.f32.mrb[157].mxu1  ;;  %v2839_v56 = vpop.f32.mrb[3].mxu0  ;;  %6591 = vmatprep.subr.bf16.mxu1 %v9832_v0  ;;  %v9179_v59 = vld [vmem:[%s9871_s25] sm:$0x7] }
 0x3b1   : > { %v2489_v43 = vpop.f32.mrb[158].mxu1  ;;  %v9186_v36 = vrot.slane %v9179_v59, %v9174_v61  ;;  %v9193_v22 = vrot.slane %v9179_v59, %v9182_v34 }
 0x3b2   : > { %v9170_v13 = vadd.f32 %v2489_v43, %v8945_v17  ;;  %v6510_v26 = vpop.f32.mrb[159].mxu1 }
 0x3b3   : > { %v3140_v16 = vadd.f32 %v9186_v36, %v2833_v53  ;;  %v3141_v27 = vadd.f32 %v9193_v22, %v2835_v39  ;;  %v3143_v58 = vadd.f32 %v9186_v36, %v2837_v33  ;;  %v3144_v8 = vadd.f32 %v9193_v22, %v2839_v56 }
 0x3b5   : > { %v2843_v2 = vpop.f32.mrb[4].mxu0  ;;  %v3203_v43 = vmax.f32 %v3140_v16, 0.0 }
 0x3b6   : > { %v2845_v21 = vpop.f32.mrb[5].mxu0 }
 0x3b7   : > { %v2494_v17 = vpop.f32.mrb[160].mxu1  ;;  %v2847_v50 = vpop.f32.mrb[6].mxu0 }
 0x3b8   : > { %v9189_v24 = vadd.f32 %v2494_v17, %v8952_v28  ;;  %v6513_v23 = vpop.f32.mrb[161].mxu1  ;;  %v2849_v41 = vpop.f32.mrb[7].mxu0 }
 0x3b9   : > { %v2497_v7 = vpop.f32.mrb[162].mxu1  ;;  %v3204_v23 = vmax.f32 %v3141_v27, 0.0  ;;  %v3147_v27 = vadd.f32 %v9193_v22, %v2845_v21 }
 0x3ba   : > { %v9196_v37 = vadd.f32 %v2497_v7, %v8955_v54  ;;  %v6514_v32 = vpop.f32.mrb[163].mxu1 }
 0x3bd   : > { %v2853_v60 = vpop.f32.mrb[8].mxu0 }
 0x3be   : > { %v3152_v28 = vadd.f32 %v9186_v36, %v2853_v60  ;;  %v2855_v46 = vpop.f32.mrb[9].mxu0  ;;  %v3206_v60 = vmax.f32 %v3143_v58, 0.0 }
 0x3bf   : > { %v3153_v44 = vadd.f32 %v9193_v22, %v2855_v46  ;;  %v2502_v49 = vpop.f32.mrb[164].mxu1  ;;  %v2857_v63 = vpop.f32.mrb[10].mxu0 }
 0x3c0   : > { %v3215_v54 = vmax.f32 %v3152_v28, 0.0  ;;  %v9205_v26 = vadd.f32 %v2502_v49, %v8962_v47  ;;  %v3155_v53 = vadd.f32 %v9186_v36, %v2857_v63  ;;  %v6517_v39 = vpop.f32.mrb[165].mxu1  ;;  %v2859_v17 = vpop.f32.mrb[11].mxu0  ;;  %v3207_v28 = vmax.f32 %v3144_v8, 0.0 }
 0x3c1   : > { %v3216_v33 = vmax.f32 %v3153_v44, 0.0  ;;  %v3156_v7 = vadd.f32 %v9193_v22, %v2859_v17  ;;  %v2505_v32 = vpop.f32.mrb[166].mxu1  ;;  %v3146_v63 = vadd.f32 %v9186_v36, %v2843_v2 }
 0x3c2   : > { %v3266_v56 = vmax.f32 %v3203_v43, %v3215_v54  ;;  %v3218_v15 = vmax.f32 %v3155_v53, 0.0  ;;  %v9210_v46 = vadd.f32 %v2505_v32, %v8965_v42  ;;  %v6518_v16 = vpop.f32.mrb[167].mxu1  ;;  %v3149_v43 = vadd.f32 %v9186_v36, %v2847_v50 }
 0x3c3   : > { %v3309_v0 = vmax.f32 %v3204_v23, %v3216_v33  ;;  %v3219_v47 = vmax.f32 %v3156_v7, 0.0  ;;  %v3150_v23 = vadd.f32 %v9193_v22, %v2849_v41  ;;  %v3209_v21 = vmax.f32 %v3146_v63, 0.0 }
 0x3c4   : > { %v3267_v49 = vmax.f32 %v3206_v60, %v3218_v15  ;;  %v3212_v16 = vmax.f32 %v3149_v43, 0.0 }
 0x3c5   : > { %v3310_v39 = vmax.f32 %v3207_v28, %v3219_v47  ;;  %v2863_v34 = vpop.f32.mrb[12].mxu0  ;;  %v3213_v47 = vmax.f32 %v3150_v23, 0.0 }
 0x3c6   : > { %v3270_v44 = vmax.f32 %v3266_v56, %v3267_v49  ;;  %v3158_v17 = vadd.f32 %v9186_v36, %v2863_v34  ;;  %v2865_v58 = vpop.f32.mrb[13].mxu0  ;;  %v3210_v34 = vmax.f32 %v3147_v27, 0.0 }
 0x3c7   : > { %v3313_v54 = vmax.f32 %v3309_v0, %v3310_v39  ;;  %v3159_v42 = vadd.f32 %v9193_v22, %v2865_v58  ;;  %v2510_v53 = vpop.f32.mrb[168].mxu1  ;;  %v2867_v8 = vpop.f32.mrb[14].mxu0 }
 0x3c8   : > { %v3221_v15 = vmax.f32 %v3158_v17, 0.0  ;;  %v9219_v2 = vadd.f32 %v2510_v53, %v8970_v12  ;;  %v6521_v33 = vpop.f32.mrb[169].mxu1  ;;  %v2869_v7 = vpop.f32.mrb[15].mxu0 }
 0x3c9   : > { %v3222_v32 = vmax.f32 %v3159_v42, 0.0  ;;  %v2513_v60 = vpop.f32.mrb[170].mxu1 }
 0x3ca   : > { %v3268_v56 = vsel %vm1585_vm5, %v3221_v15, -inf  ;;  %v9223_v0 = vadd.f32 %v2513_v60, %v8973_v29  ;;  %v6522_v50 = vpop.f32.mrb[171].mxu1  ;;  %v3161_v60 = vadd.f32 %v9186_v36, %v2867_v8 }
 0x3cb   : > { %v3269_v28 = vmax.f32 %v3209_v21, %v3268_v56  ;;  %v3311_v41 = vsel %vm2098_vm6, %v3222_v32, -inf  ;;  %v7220_v32 = vld [vmem:[%s9805_s3 + $0x184] ss:$12 sps:$4 sm:$0xff]  }
 0x3cc   : > { %v3312_v49 = vmax.f32 %v3210_v34, %v3311_v41  ;;  %3936 = vmatprep.subr.bf16.mxu0 %v7220_v32  ;;  %v3162_v34 = vadd.f32 %v9193_v22, %v2869_v7 }
 0x3cd   : > { %v3271_v12 = vmax.f32 %v3269_v28, %v3212_v16  ;;  %v2873_v39 = vpop.f32.mrb[16].mxu0 }
 0x3ce   : > { %v3314_v17 = vmax.f32 %v3312_v49, %v3213_v47  ;;  %v2875_v58 = vpop.f32.mrb[17].mxu0  ;;  %v3224_v49 = vmax.f32 %v3161_v60, 0.0 }
 0x3cf   : > { %v9226_v63 = vmax.f32 %v3270_v44, %v3271_v12  ;;  %v2518_v42 = vpop.f32.mrb[172].mxu1  ;;  %v2877_v27 = vpop.f32.mrb[18].mxu0  ;;  %v3164_v12 = vadd.f32 %v9186_v36, %v2873_v39 }
 0x3d0   : > { %v9228_v53 = vmax.f32 %v3313_v54, %v3314_v17  ;;  %v9231_v29 = vadd.f32 %v2518_v42, %v8985_v10  ;;  %v6525_v15 = vpop.f32.mrb[173].mxu1  ;;  %v2879_v43 = vpop.f32.mrb[19].mxu0  ;;  %v3225_v42 = vmax.f32 %v3162_v34, 0.0  ;;  %v3167_v39 = vadd.f32 %v9186_v36, %v2877_v27 }
 0x3d1   : > { %v2521_v33 = vpop.f32.mrb[174].mxu1  ;;  %v3165_v15 = vadd.f32 %v9193_v22, %v2875_v58  ;;  %v3273_v60 = vrot.slane %v9226_v63, 4  ;;  %v3168_v34 = vadd.f32 %v9193_v22, %v2879_v43 }
 0x3d2   : > { %v9234_v21 = vadd.f32 %v2521_v33, %v8994_v40  ;;  %v6526_v23 = vpop.f32.mrb[175].mxu1 }
 0x3d3   : > { %v3274_v61 = vmax.f32 %v9226_v63, %v3273_v60 }
 0x3d5   : > { %v2883_v44 = vpop.f32.mrb[20].mxu0 }
 0x3d6   : > { %v2885_v54 = vpop.f32.mrb[21].mxu0 }
 0x3d7   : > { %v2526_v10 = vpop.f32.mrb[176].mxu1  ;;  %v2887_v56 = vpop.f32.mrb[22].mxu0 }
 0x3d8   : > { %v9242_v50 = vadd.f32 %v2526_v10, %v9003_v19  ;;  %v3173_v40 = vadd.f32 %v9186_v36, %v2887_v56  ;;  %v6529_v16 = vpop.f32.mrb[177].mxu1  ;;  %v2889_v28 = vpop.f32.mrb[23].mxu0  ;;  %v3227_v10 = vmax.f32 %v3164_v12, 0.0 }
 0x3d9   : > { %v3174_v41 = vadd.f32 %v9193_v22, %v2889_v28  ;;  %v2529_v47 = vpop.f32.mrb[178].mxu1  ;;  %v3228_v28 = vmax.f32 %v3165_v15, 0.0 }
 0x3da   : > { %9873 = vst [vmem:[#allocation20_spill] sm:$0xff] %v9242_v50  ;;  %v3236_v17 = vmax.f32 %v3173_v40, 0.0  ;;  %v9248_v8 = vadd.f32 %v2529_v47, %v9012_v18  ;;  %v6530_v7 = vpop.f32.mrb[179].mxu1 }
 0x3db   : > { %v3237_v19 = vmax.f32 %v3174_v41, 0.0  ;;  %v3316_v7 = vrot.slane %v9228_v53, 4 }
 0x3dc   : > { %9874 = vst [vmem:[#allocation21_spill] sm:$0xff] %v9248_v8  ;;  %v3280_v33 = vmax.f32 %v3224_v49, %v3236_v17 }
 0x3dd   : > { %v3323_v23 = vmax.f32 %v3225_v42, %v3237_v19  ;;  %v2893_v32 = vpop.f32.mrb[24].mxu0  ;;  %v3170_v42 = vadd.f32 %v9186_v36, %v2883_v44 }
 0x3de   : > { %v3176_v56 = vadd.f32 %v9186_v36, %v2893_v32  ;;  %v2895_v16 = vpop.f32.mrb[25].mxu0  ;;  %v3171_v32 = vadd.f32 %v9193_v22, %v2885_v54 }
 0x3df   : > { %v3177_v18 = vadd.f32 %v9193_v22, %v2895_v16  ;;  %v2534_v40 = vpop.f32.mrb[180].mxu1  ;;  %v2897_v47 = vpop.f32.mrb[26].mxu0 }
 0x3e0   : > { %v3239_v58 = vmax.f32 %v3176_v56, 0.0  ;;  %v9257_v41 = vadd.f32 %v2534_v40, %v9021_v9  ;;  %v3179_v49 = vadd.f32 %v9186_v36, %v2897_v47  ;;  %v6533_v12 = vpop.f32.mrb[181].mxu1  ;;  %v2899_v17 = vpop.f32.mrb[27].mxu0  ;;  %v3230_v40 = vmax.f32 %v3167_v39, 0.0 }
 0x3e1   : > { %v3240_v15 = vmax.f32 %v3177_v18, 0.0  ;;  %v3180_v27 = vadd.f32 %v9193_v22, %v2899_v17  ;;  %v2537_v19 = vpop.f32.mrb[182].mxu1  ;;  %v3233_v18 = vmax.f32 %v3170_v42, 0.0 }
 0x3e2   : > { %9875 = vst [vmem:[#allocation22_spill] sm:$0xff] %v9257_v41  ;;  %v3281_v16 = vmax.f32 %v3227_v10, %v3239_v58  ;;  %v3242_v43 = vmax.f32 %v3179_v49, 0.0  ;;  %v9265_v56 = vadd.f32 %v2537_v19, %v9030_v6  ;;  %v6534_v9 = vpop.f32.mrb[183].mxu1  ;;  %v3231_v41 = vmax.f32 %v3168_v34, 0.0 }
 0x3e3   : > { %v3324_v47 = vmax.f32 %v3228_v28, %v3240_v15  ;;  %v3243_v12 = vmax.f32 %v3180_v27, 0.0  ;;  %v3317_v58 = vmax.f32 %v9228_v53, %v3316_v7  ;;  %v3234_v6 = vmax.f32 %v3171_v32, 0.0 }
 0x3e4   : > { %v3284_v8 = vmax.f32 %v3280_v33, %v3281_v16  ;;  %v3282_v44 = vsel %vm1585_vm5, %v3242_v43, -inf  ;;  %v3275_v34 = vrot.slane %v3274_v61, 2 }
 0x3e5   : > { %v3327_v17 = vmax.f32 %v3323_v23, %v3324_v47  ;;  %v3283_v50 = vmax.f32 %v3230_v40, %v3282_v44  ;;  %v3325_v54 = vsel %vm2098_vm6, %v3243_v12, -inf  ;;  %v2903_v10 = vpop.f32.mrb[28].mxu0  ;;  %v3318_v16 = vrot.slane %v3317_v58, 2 }
 0x3e6   : > { %v3326_v49 = vmax.f32 %v3231_v41, %v3325_v54  ;;  %v2905_v19 = vpop.f32.mrb[29].mxu0  ;;  %v3276_v7 = vmax.f32 %v3274_v61, %v3275_v34 }
 0x3e7   : > { %v3285_v39 = vmax.f32 %v3283_v50, %v3233_v18  ;;  %v2542_v28 = vpop.f32.mrb[184].mxu1  ;;  %v2907_v15 = vpop.f32.mrb[30].mxu0 }
 0x3e8   : > { %v3328_v27 = vmax.f32 %v3326_v49, %v3234_v6  ;;  %v9272_v63 = vadd.f32 %v2542_v28, %v9039_v5  ;;  %v6537_v33 = vpop.f32.mrb[185].mxu1  ;;  %v2909_v60 = vpop.f32.mrb[31].mxu0  ;;  %v3319_v5 = vmax.f32 %v3317_v58, %v3318_v16  ;;  %v3277_v28 = vrot.slane %v3276_v7, 1 }
 0x3e9   : > { %v3286_v23 = vmax.f32 %v3284_v8, %v3285_v39  ;;  %v2545_v42 = vpop.f32.mrb[186].mxu1 }
 0x3ea   : > { %v3329_v43 = vmax.f32 %v3327_v17, %v3328_v27  ;;  %v6538_v9 = vpop.f32.mrb[187].mxu1  ;;  %v3320_v34 = vrot.slane %v3319_v5, 1 }
 0x3eb   : > { %v3287_v40 = vrot.slane %v3286_v23, 4  ;;  %v3182_v9 = vadd.f32 %v9186_v36, %v2903_v10 }
 0x3ec   : > { %v3330_v53 = vrot.slane %v3329_v43, 4 }
 0x3ed   : > { %v3288_v41 = vmax.f32 %v3286_v23, %v3287_v40  ;;  %v2913_v32 = vpop.f32.mrb[32].mxu0  ;;  %v9294_v40 = vsub.s32 2, %v9161_v4 }
 0x3ee   : > { %v3331_v50 = vmax.f32 %v3329_v43, %v3330_v53  ;;  %v9275_v47 = vadd.f32 %v2913_v32, %v8563_v35  ;;  %v2915_v12 = vpop.f32.mrb[33].mxu0 }
 0x3ef   : > { %v3289_v44 = vrot.slane %v3288_v41, 2  ;;  %v9278_v18 = vadd.f32 %v2915_v12, %v8567_v25  ;;  %v2917_v8 = vpop.f32.mrb[34].mxu0  ;;  %v2974_v54 = vpop.f32.mrb[188].mxu1 }
 0x3f0   : > { %v3332_v6 = vrot.slane %v3331_v50, 2  ;;  %v9281_v17 = vadd.f32 %v2917_v8, %v8569_v45  ;;  %v9284_v61 = vadd.f32 %v2974_v54, %v9066_v52  ;;  %v2919_v49 = vpop.f32.mrb[35].mxu0  ;;  %v6549_v39 = vpop.f32.mrb[189].mxu1  ;;  %v3278_v45 = vmax.f32 %v3276_v7, %v3277_v28 }
 0x3f1   : > { %v3290_v35 = vmax.f32 %v3288_v41, %v3289_v44  ;;  %v9287_v27 = vadd.f32 %v2919_v49, %v8571_v31  ;;  %v2977_v58 = vpop.f32.mrb[190].mxu1  ;;  %v3321_v41 = vmax.f32 %v3319_v5, %v3320_v34  ;;  %v3185_v8 = vadd.f32 %v9186_v36, %v2907_v15 }
 0x3f2   : > { %v9290_v25 = vadd.f32 %v2977_v58, %v9072_v20  ;;  %v6550_v33 = vpop.f32.mrb[191].mxu1  ;;  %v3333_v42 = vmax.f32 %v3331_v50, %v3332_v6  ;;  %v3183_v20 = vadd.f32 %v9193_v22, %v2905_v19  ;;  %v3186_v19 = vadd.f32 %v9193_v22, %v2909_v60 }
 0x3f3   : > { %v3291_v23 = vrot.slane %v3290_v35, 1  ;;  %v3245_v28 = vmax.f32 %v3182_v9, 0.0  ;;  %v3248_v60 = vmax.f32 %v3185_v8, 0.0 }
 0x3f4   : > { %v3334_v52 = vrot.slane %v3333_v42, 1  ;;  %v3246_v58 = vmax.f32 %v3183_v20, 0.0 }
 0x3f5   : > { %v3292_v16 = vmax.f32 %v3290_v35, %v3291_v23  ;;  %v2923_v43 = vpop.f32.mrb[36].mxu0  ;;  %v9319_v23 = vrot.slane %v9179_v59, %v9294_v40 }
 0x3f6   : > { %v6663_v31 = vadd.f32 %v2923_v43, %v8581_v62  ;;  %v2925_v53 = vpop.f32.mrb[37].mxu0  ;;  %v3335_v50 = vmax.f32 %v3333_v42, %v3334_v52 }
 0x3f7   : > { %v6664_v32 = vadd.f32 %v2925_v53, %v8583_v3  ;;  %v2927_v12 = vpop.f32.mrb[38].mxu0  ;;  %v2982_v44 = vpop.f32.mrb[192].mxu1  ;;  %v9299_v7 = vadd.f32 %v3292_v16, %v3278_v45  ;;  %v3249_v45 = vmax.f32 %v3186_v19, 0.0  ;;  %v3188_v53 = vadd.f32 %v9275_v47, %v9186_v36 }
 0x3f8   : > { %v3194_v10 = vadd.f32 %v6663_v31, %v9186_v36  ;;  %v6665_v4 = vadd.f32 %v2927_v12, %v8585_v38  ;;  %v9305_v54 = vadd.f32 %v2982_v44, %v9099_v48  ;;  %v2929_v62 = vpop.f32.mrb[39].mxu0  ;;  %v6553_v5 = vpop.f32.mrb[193].mxu1  ;;  %v9310_v39 = vadd.f32 %v3335_v50, %v3321_v41 }
 0x3f9   : > { %v3195_v3 = vadd.f32 %v6664_v32, %v9193_v22  ;;  %v6666_v6 = vadd.f32 %v2929_v62, %v8587_v57  ;;  %v2985_v49 = vpop.f32.mrb[194].mxu1  ;;  %v3189_v41 = vadd.f32 %v9278_v18, %v9193_v22  ;;  %v3142_v44 = vadd.f32 %v9319_v23, %v9284_v61 }
 0x3fa   : > { %v3257_v15 = vmax.f32 %v3194_v10, 0.0  ;;  %v3197_v35 = vadd.f32 %v6665_v4, %v9186_v36  ;;  %v9314_v38 = vadd.f32 %v2985_v49, %v9108_v1  ;;  %v6554_v48 = vpop.f32.mrb[195].mxu1  ;;  %v3191_v47 = vadd.f32 %v9281_v17, %v9186_v36 }
 0x3fb   : > { %v3258_v33 = vmax.f32 %v3195_v3, 0.0  ;;  %v3198_v34 = vadd.f32 %v6666_v6, %v9193_v22  ;;  %v3192_v18 = vadd.f32 %v9287_v27, %v9193_v22  ;;  %v3145_v61 = vadd.f32 %v9319_v23, %v9290_v25 }
 0x3fc   : > { %v3294_v57 = vmax.f32 %v3245_v28, %v3257_v15  ;;  %v3260_v42 = vmax.f32 %v3197_v35, 0.0  ;;  %v3251_v49 = vmax.f32 %v3188_v53, 0.0  ;;  %v3252_v28 = vmax.f32 %v3189_v41, 0.0 }
 0x3fd   : > { %v3337_v16 = vmax.f32 %v3246_v58, %v3258_v33  ;;  %v3261_v43 = vmax.f32 %v3198_v34, 0.0  ;;  %v2933_v52 = vpop.f32.mrb[52].mxu0  ;;  %v3255_v48 = vmax.f32 %v3192_v18, 0.0  ;;  %v3208_v33 = vmax.f32 %v3145_v61, 0.0 }
 0x3fe   : > { %v3295_v9 = vmax.f32 %v3248_v60, %v3260_v42  ;;  %v3120_v1 = vadd.f32 %v2933_v52, %v9123_v11  ;;  %v2935_v31 = vpop.f32.mrb[53].mxu0 }
 0x3ff   : > { %v3338_v20 = vmax.f32 %v3249_v45, %v3261_v43  ;;  %v3121_v59 = vadd.f32 %v2935_v31, %v9129_v14  ;;  %v2937_v32 = vpop.f32.mrb[54].mxu0  ;;  %v2990_v12 = vpop.f32.mrb[196].mxu1 }
 0x400   : > { %v3298_v50 = vmax.f32 %v3294_v57, %v3295_v9  ;;  %v3200_v8 = vadd.f32 %v9186_v36, %v3120_v1  ;;  %v3074_v11 = vadd.f32 %v2990_v12, %v9135_v55  ;;  %v2938_v10 = vpop.f32.mrb[55].mxu0  ;;  %v6557_v4 = vpop.f32.mrb[197].mxu1  ;;  %v3205_v36 = vmax.f32 %v3142_v44, 0.0 }
 0x401   : > { %v3341_v62 = vmax.f32 %v3337_v16, %v3338_v20  ;;  %v3201_v14 = vadd.f32 %v9193_v22, %v3121_v59  ;;  %v2993_v5 = vpop.f32.mrb[198].mxu1  ;;  %v3254_v22 = vmax.f32 %v3191_v47, 0.0  ;;  %v3148_v9 = vadd.f32 %v9319_v23, %v9305_v54 }
 0x402   : > { %v3263_v19 = vmax.f32 %v3200_v8, 0.0  ;;  %v3154_v3 = vadd.f32 %v9319_v23, %v3074_v11  ;;  %v3077_v55 = vadd.f32 %v2993_v5, %v9144_v30  ;;  %v6558_v6 = vpop.f32.mrb[199].mxu1  ;;  %v3151_v12 = vadd.f32 %v9319_v23, %v9314_v38 }
 0x403   : > { %v3264_v15 = vmax.f32 %v3201_v14, 0.0 }
 0x404   : > { %v3296_v17 = vsel %vm1585_vm5, %v3263_v19, -inf  ;;  %v3217_v27 = vmax.f32 %v3154_v3, 0.0  ;;  %v3157_v35 = vadd.f32 %v9319_v23, %v3077_v55 }
 0x405   : > { %v3297_v58 = vmax.f32 %v3251_v49, %v3296_v17  ;;  %v3339_v25 = vsel %vm2098_vm6, %v3264_v15, -inf }
 0x406   : > { %v3340_v34 = vmax.f32 %v3252_v28, %v3339_v25  ;;  %v3352_v60 = vmax.f32 %v3205_v36, %v3217_v27  ;;  %v3220_v57 = vmax.f32 %v3157_v35, 0.0 }
 0x407   : > { %v3299_v30 = vmax.f32 %v3297_v58, %v3254_v22  ;;  %v2998_v42 = vpop.f32.mrb[200].mxu1 }
 0x408   : > { %v3342_v45 = vmax.f32 %v3340_v34, %v3255_v48  ;;  %v3353_v16 = vmax.f32 %v3208_v33, %v3220_v57  ;;  %v3080_v43 = vadd.f32 %v2998_v42, %v9164_v51  ;;  %v6561_v52 = vpop.f32.mrb[201].mxu1  ;;  %v3211_v51 = vmax.f32 %v3148_v9, 0.0  ;;  %v7224_v42 = vld [vmem:[%s9805_s3 + $0x19c] ss:$12 sps:$4 sm:$0xff]  }
 0x409   : > { %v3300_v1 = vmax.f32 %v3298_v50, %v3299_v30  ;;  %v3001_v31 = vpop.f32.mrb[202].mxu1  ;;  %v3214_v50 = vmax.f32 %v3151_v12, 0.0 }
 0x40a   : > { %v3343_v53 = vmax.f32 %v3341_v62, %v3342_v45  ;;  %v3356_v41 = vmax.f32 %v3352_v60, %v3353_v16  ;;  %v3160_v20 = vadd.f32 %v9319_v23, %v3080_v43  ;;  %v3083_v59 = vadd.f32 %v3001_v31, %v9170_v13  ;;  %v6562_v32 = vpop.f32.mrb[203].mxu1  ;;  %v7222_v31 = vld [vmem:[%s9805_s3 + $0x198] ss:$12 sps:$4 sm:$0xff]  }
 0x40b   : > { %v3301_v44 = vrot.slane %v3300_v1, 4 }
 0x40c   : > { %v3344_v8 = vrot.slane %v3343_v53, 4  ;;  %v3223_v11 = vmax.f32 %v3160_v20, 0.0  ;;  %v9876_v20 = vmov 0.0  }
 0x40d   : > { %v3302_v10 = vmax.f32 %v3300_v1, %v3301_v44  ;;  %v9877_v44 = vmov 0  }
 0x40e   : > { %v3354_v4 = vsel %vm955_vm2, %v3223_v11, -inf  ;;  %v3345_v54 = vmax.f32 %v3343_v53, %v3344_v8  ;;  %v7225_v53 = vld [vmem:[%s9805_s3 + $0x1a0] ss:$12 sps:$4 sm:$0xff]  }
 0x40f   : > { %v3303_v47 = vrot.slane %v3302_v10, 2  ;;  %v3355_v18 = vmax.f32 %v3211_v51, %v3354_v4  ;;  %v3006_v62 = vpop.f32.mrb[204].mxu1  ;;  %v7226_v4 = vld [vmem:[%s9805_s3 + $0x1b0] ss:$12 sps:$4 sm:$0xff]  }
 0x410   : > { %v3086_v14 = vadd.f32 %v3006_v62, %v9189_v24  ;;  %v6565_v5 = vpop.f32.mrb[205].mxu1  ;;  %v3346_v13 = vrot.slane %v3345_v54, 2 }
 0x411   : > { %v3304_v61 = vmax.f32 %v3302_v10, %v3303_v47  ;;  %v3357_v19 = vmax.f32 %v3355_v18, %v3214_v50  ;;  %v3009_v3 = vpop.f32.mrb[206].mxu1  ;;  %v7232_v47 = vld [vmem:[%s9805_s3 + $0x1cc] ss:$12 sps:$4 sm:$0xff]  }
 0x412   : > { %v3089_v38 = vadd.f32 %v3009_v3, %v9196_v37  ;;  %v6566_v55 = vpop.f32.mrb[207].mxu1  ;;  %v3347_v6 = vmax.f32 %v3345_v54, %v3346_v13  ;;  %v3163_v37 = vadd.f32 %v9319_v23, %v3083_v59  ;;  %v3166_v43 = vadd.f32 %v9319_v23, %v3086_v14  ;;  %v7228_v59 = vld [vmem:[%s9805_s3 + $0x1b4] ss:$12 sps:$4 sm:$0xff]  }
 0x413   : > { %v3305_v49 = vrot.slane %v3304_v61, 1  ;;  %v9353_v28 = vmax.f32 %v3356_v41, %v3357_v19  ;;  %v7233_v55 = vld [vmem:[%s9805_s3 + $0x1d0] ss:$12 sps:$4 sm:$0xff]  }
 0x414   : > { %v3348_v15 = vrot.slane %v3347_v6, 1  ;;  %v3226_v45 = vmax.f32 %v3163_v37, 0.0  ;;  %v3169_v8 = vadd.f32 %v9319_v23, %v3089_v38  ;;  %v3229_v11 = vmax.f32 %v3166_v43, 0.0  ;;  %v7230_v38 = vld [vmem:[%s9805_s3 + $0x1c8] ss:$12 sps:$4 sm:$0xff]  }
 0x415   : > { %v3306_v36 = vmax.f32 %v3304_v61, %v3305_v49  ;;  %v3359_v54 = vrot.slane %v9353_v28, 4  ;;  %v9878_v37 = vld [vmem:[#allocation20_spill] sm:$0xff]  ;;  %v7242_v43 = vld [vmem:[%s9805_s3 + $0x210] ss:$12 sps:$4 sm:$0xff]  }
 0x416   : > { %v3349_v17 = vmax.f32 %v3347_v6, %v3348_v15  ;;  %v3232_v14 = vmax.f32 %v3169_v8, 0.0  ;;  %v7246_v8 = vld [vmem:[%s9805_s3 + $0x228] ss:$12 sps:$4 sm:$0xff]  }
 0x417   : > { %v3014_v27 = vpop.f32.mrb[208].mxu1  ;;  %v3307_v35 = vadd.f32 %v3306_v36, %v9299_v7  ;;  %v7218_v7 = vld [vmem:[%s9805_s3 + $0x180] ss:$12 sps:$4 sm:$0xff]   ;;  %v3360_v6 = vmax.f32 %v9353_v28, %v3359_v54 }
 0x418   : > { %v3092_v24 = vadd.f32 %v3014_v27, %v9205_v26  ;;  %v6569_v22 = vpop.f32.mrb[209].mxu1  ;;  %v3350_v48 = vadd.f32 %v3349_v17, %v9310_v39  ;;  %v7221_v26 = vld [vmem:[%s9805_s3 + $0x188] ss:$12 sps:$4 sm:$0xff]   ;;  %v7234_v28 = vld [vmem:[%s9805_s3 + $0x1e0] ss:$12 sps:$4 sm:$0xff]  }
 0x419   : > { %v3017_v58 = vpop.f32.mrb[210].mxu1  ;;  %v3308_v25 = vmul.f32 0.33333334, %v3307_v35  ;;  %v3361_v22 = vrot.slane %v3360_v6, 2 }
 0x41a   : > { %v3095_v33 = vadd.f32 %v3017_v58, %v9210_v46  ;;  %v6570_v34 = vpop.f32.mrb[211].mxu1  ;;  %v3351_v60 = vmul.f32 0.33333334, %v3350_v48  ;;  %v3172_v50 = vadd.f32 %v9319_v23, %v3092_v24  ;;  %v7237_v24 = vld [vmem:[%s9805_s3 + $0x1e8] ss:$12 sps:$4 sm:$0xff]  }
 0x41b   : > { %v3395_v39 = vpack.c.bf16 %v3308_v25, %v3308_v25 }
 0x41c   : > { %v3175_v57 = vadd.f32 %v9319_v23, %v3095_v33  ;;  %v3396_v30 = vpack.c.bf16 %v3351_v60, %v3351_v60  ;;  %v3235_v49 = vmax.f32 %v3172_v50, 0.0  ;;  %v7238_v60 = vld [vmem:[%s9805_s3 + $0x1f8] ss:$12 sps:$4 sm:$0xff]  }
 0x41e   : > { %v3238_v46 = vmax.f32 %v3175_v57, 0.0  ;;  %3927 = vmatprep.mubr.bf16.mxu0 %v3396_v30  ;;  %4009 = vmatprep.mubr.bf16.mxu1 %v3396_v30  ;;  %v7241_v57 = vld [vmem:[%s9805_s3 + $0x200] ss:$12 sps:$4 sm:$0xff]   ;;  %v3362_v30 = vmax.f32 %v3360_v6, %v3361_v22 }
 0x41f   : > { %v3022_v16 = vpop.f32.mrb[212].mxu1  ;;  %3928 = vmatmul.mubr.bf16.vlgmr.msra.gmra.mrb[56].mxu0 %v3395_v39  ;;  %4010 = vmatmul.mubr.bf16.vlgmr.msra.gmra.mrb[232].mxu1 %v3395_v39  ;;  %v7244_v39 = vld [vmem:[%s9805_s3 + $0x214] ss:$12 sps:$4 sm:$0xff]  }
 0x420   : > { %v3366_v52 = vmax.f32 %v3226_v45, %v3238_v46  ;;  %v3098_v9 = vadd.f32 %v3022_v16, %v9219_v2  ;;  %v6573_v1 = vpop.f32.mrb[213].mxu1  ;;  %3937 = vmatpush1.bf16.msra.mxu0 %v7218_v7  ;;  %6592 = vmatpush3.bf16.msra.mxu1 %v7221_v26 }
 0x421   : > { %v3025_v41 = vpop.f32.mrb[214].mxu1  ;;  %3938 = vmatprep.subr.bf16.mxu0 %v7224_v42  ;;  %6593 = vmatprep.subr.bf16.mxu1 %v9876_v20  ;;  %v9879_v42 = vld [vmem:[#allocation21_spill] sm:$0xff] }
 0x422   : > { %v3178_v2 = vadd.f32 %v9319_v23, %v3098_v9  ;;  %v3101_v32 = vadd.f32 %v3025_v41, %v9223_v0  ;;  %v6574_v12 = vpop.f32.mrb[215].mxu1  ;;  %3968 = vmatprep.mubr.bf16.mxu0 %v9877_v44  ;;  %6607 = vmatprep.mubr.msk.bf16.mxu1 %vm7659_vm8, %v9876_v20  ;;  %v7229_v0 = vld [vmem:[%s9805_s3 + $0x1b8] ss:$12 sps:$4 sm:$0xff]  }
 0x423   : > { %v7248_v1 = vld [vmem:[%s9805_s3 + $0x22c] ss:$12 sps:$4 sm:$0xff]  }
 0x424   : > { %v3241_v51 = vmax.f32 %v3178_v2, 0.0  ;;  %v3181_v10 = vadd.f32 %v9319_v23, %v3101_v32  ;;  %3939 = vmatpush1.bf16.msra.mxu0 %v7222_v31  ;;  %6594 = vmatpush3.bf16.msra.mxu1 %v7225_v53  ;;  %v3363_v31 = vrot.slane %v3362_v30, 1  ;;  %v9880_v2 = vld [vmem:[#allocation22_spill] sm:$0xff] }
 0x425   : > { %3940 = vmatprep.subr.bf16.mxu0 %v7228_v59  ;;  %6595 = vmatprep.subr.bf16.mxu1 %v9876_v20 }
 0x426   : > { %v3367_v18 = vmax.f32 %v3229_v11, %v3241_v51  ;;  %v3244_v62 = vmax.f32 %v3181_v10, 0.0  ;;  %v7249_v11 = vld [vmem:[%s9805_s3 + $0x230] ss:$12 sps:$4 sm:$0xff]   ;;  %v3364_v10 = vmax.f32 %v3362_v30, %v3363_v31 }
 0x427   : > { %v3030_v5 = vpop.f32.mrb[216].mxu1  ;;  %v7259_v31 = vld [vmem:[#allocation8 + $0x48] ss:$12 sps:$4 sm:$0xff]  }
 0x428   : > { %v3370_v13 = vmax.f32 %v3366_v52, %v3367_v18  ;;  %v3368_v61 = vsel %vm955_vm2, %v3244_v62, -inf  ;;  %v3104_v19 = vadd.f32 %v3030_v5, %v9231_v29  ;;  %v6577_v3 = vpop.f32.mrb[217].mxu1  ;;  %3941 = vmatpush1.bf16.msra.mxu0 %v7226_v4  ;;  %6596 = vmatpush3.bf16.msra.mxu1 %v7229_v0  ;;  %v7236_v29 = vld [vmem:[%s9805_s3 + $0x1e4] ss:$12 sps:$4 sm:$0xff]  }
 0x429   : > { %v3369_v15 = vmax.f32 %v3232_v14, %v3368_v61  ;;  %v3033_v36 = vpop.f32.mrb[218].mxu1  ;;  %3942 = vmatprep.subr.bf16.mxu0 %v7232_v47  ;;  %6597 = vmatprep.subr.bf16.mxu1 %v9876_v20  ;;  %v7245_v52 = vld [vmem:[%s9805_s3 + $0x218] ss:$12 sps:$4 sm:$0xff]  }
 0x42a   : > { %v3107_v17 = vadd.f32 %v3033_v36, %v9234_v21  ;;  %v6578_v27 = vpop.f32.mrb[219].mxu1  ;;  %v7240_v21 = vld [vmem:[%s9805_s3 + $0x1fc] ss:$12 sps:$4 sm:$0xff]   ;;  %v3184_v59 = vadd.f32 %v9319_v23, %v3104_v19 }
 0x42b   : > { %v3371_v35 = vmax.f32 %v3369_v15, %v3235_v49 }
 0x42c   : > { %3943 = vmatpush1.bf16.msra.mxu0 %v7230_v38  ;;  %6598 = vmatpush3.bf16.msra.mxu1 %v7233_v55  ;;  %v3187_v0 = vadd.f32 %v9319_v23, %v3107_v17  ;;  %v3247_v62 = vmax.f32 %v3184_v59, 0.0  ;;  %v7292_v59 = vld [vmem:[#allocation8 + $0x110] ss:$12 sps:$4 sm:$0xff]  }
 0x42d   : > { %v3372_v48 = vmax.f32 %v3370_v13, %v3371_v35  ;;  %3944 = vmatprep.subr.bf16.mxu0 %v7236_v29  ;;  %6599 = vmatprep.subr.bf16.mxu1 %v9876_v20 }
 0x42e   : > { %v3250_v13 = vmax.f32 %v3187_v0, 0.0  ;;  %v7273_v0 = vld [vmem:[#allocation8 + $0xac] ss:$12 sps:$4 sm:$0xff]  }
 0x42f   : > { %v3373_v58 = vrot.slane %v3372_v48, 4  ;;  %v3038_v25 = vpop.f32.mrb[220].mxu1 }
 0x430   : > { %v3110_v33 = vadd.f32 %v3038_v25, %v9878_v37  ;;  %v6581_v34 = vpop.f32.mrb[221].mxu1  ;;  %3945 = vmatpush1.bf16.msra.mxu0 %v7234_v28  ;;  %6600 = vmatpush3.bf16.msra.mxu1 %v7237_v24 }
 0x431   : > { %v3374_v7 = vmax.f32 %v3372_v48, %v3373_v58  ;;  %v3041_v26 = vpop.f32.mrb[222].mxu1  ;;  %3946 = vmatprep.subr.bf16.mxu0 %v7240_v21  ;;  %6601 = vmatprep.subr.bf16.mxu1 %v9876_v20 }
 0x432   : > { %v3113_v45 = vadd.f32 %v3041_v26, %v9879_v42  ;;  %v6582_v46 = vpop.f32.mrb[223].mxu1  ;;  %v3190_v49 = vadd.f32 %v9319_v23, %v3110_v33  ;;  %v7255_v26 = vld [vmem:[#allocation8 + $0x1c] ss:$12 sps:$4 sm:$0xff]   ;;  %v7258_v42 = vld [vmem:[#allocation8 + $0x34] ss:$12 sps:$4 sm:$0xff]  }
 0x433   : > { %v3375_v16 = vrot.slane %v3374_v7, 2  ;;  %v7278_v46 = vld [vmem:[#allocation8 + $0x8] ss:$12 sps:$4 sm:$0xff]  }
 0x434   : > { %3947 = vmatpush1.bf16.msra.mxu0 %v7238_v60  ;;  %6602 = vmatpush3.bf16.msra.mxu1 %v7241_v57  ;;  %v3193_v17 = vadd.f32 %v9319_v23, %v3113_v45  ;;  %v3253_v35 = vmax.f32 %v3190_v49, 0.0  ;;  %v7277_v45 = vld [vmem:[#allocation8 + $0xc8] ss:$12 sps:$4 sm:$0xff]   ;;  %v7303_v49 = vld [vmem:[#allocation8 + $0x80] ss:$12 sps:$4 sm:$0xff]  }
 0x435   : > { %v3376_v9 = vmax.f32 %v3374_v7, %v3375_v16  ;;  %3948 = vmatprep.subr.bf16.mxu0 %v7244_v39  ;;  %6603 = vmatprep.subr.bf16.mxu1 %v9876_v20  ;;  %v7252_v7 = vld [vmem:[#allocation8 + $0x4] ss:$12 sps:$4 sm:$0xff]  }
 0x436   : > { %v3256_v24 = vmax.f32 %v3193_v17, 0.0  ;;  %v7253_v39 = vld [vmem:[#allocation8 + $0x18] ss:$12 sps:$4 sm:$0xff]   ;;  %v7256_v16 = vld [vmem:[#allocation8 + $0x30] ss:$12 sps:$4 sm:$0xff]  }
 0x437   : > { %v3046_v53 = vpop.f32.mrb[224].mxu1  ;;  %v3377_v41 = vrot.slane %v3376_v9, 1  ;;  %v7311_v17 = vld [vmem:[#allocation8 + $0x16c] ss:$12 sps:$4 sm:$0xff]  }
 0x438   : > { %v3116_v32 = vadd.f32 %v3046_v53, %v9880_v2  ;;  %v6585_v12 = vpop.f32.mrb[225].mxu1  ;;  %3949 = vmatpush1.bf16.msra.mxu0 %v7242_v43  ;;  %6604 = vmatpush3.bf16.msra.mxu1 %v7245_v52  ;;  %v7282_v43 = vld [vmem:[#allocation8 + $0xe0] ss:$12 sps:$4 sm:$0xff]   ;;  %v7264_v53 = vld [vmem:[#allocation8 + $0x64] ss:$12 sps:$4 sm:$0xff]  }
 0x439   : > { %v3049_v51 = vpop.f32.mrb[226].mxu1  ;;  %3950 = vmatprep.subr.bf16.mxu0 %v7248_v1  ;;  %6605 = vmatprep.subr.bf16.mxu1 %v9876_v20  ;;  %v3378_v4 = vmax.f32 %v3376_v9, %v3377_v41  ;;  %v7261_v52 = vld [vmem:[#allocation8 + $0x4c] ss:$12 sps:$4 sm:$0xff]   ;;  %v7293_v12 = vld [vmem:[#allocation8 + $0x50] ss:$12 sps:$4 sm:$0xff]  }
 0x43a   : > { %v3196_v54 = vadd.f32 %v9319_v23, %v3116_v32  ;;  %v3119_v50 = vadd.f32 %v3049_v51, %v9265_v56  ;;  %v6586_v47 = vpop.f32.mrb[227].mxu1  ;;  %v7283_v9 = vld [vmem:[#allocation8 + $0x20] ss:$12 sps:$4 sm:$0xff]   ;;  %v7287_v1 = vld [vmem:[#allocation8 + $0xf8] ss:$12 sps:$4 sm:$0xff]  }
 0x43b   : > { %v3379_v18 = vadd.f32 %v3378_v4, %v3364_v10  ;;  %v7288_v41 = vld [vmem:[#allocation8 + $0x38] ss:$12 sps:$4 sm:$0xff]   ;;  %v7262_v2 = vld [vmem:[#allocation8 + $0x60] ss:$12 sps:$4 sm:$0xff]   ;;  %v7267_v32 = vld [vmem:[#allocation8 + $0x7c] ss:$12 sps:$4 sm:$0xff]  }
 0x43c   : > { %v3259_v14 = vmax.f32 %v3196_v54, 0.0  ;;  %v3199_v5 = vadd.f32 %v9319_v23, %v3119_v50  ;;  %3951 = vmatpush1.bf16.msra.mxu0 %v7246_v8  ;;  %6606 = vmatpush3.bf16.msra.mxu1 %v7249_v11  ;;  %v7297_v8 = vld [vmem:[#allocation8 + $0x128] ss:$12 sps:$4 sm:$0xff]   ;;  %v7265_v11 = vld [vmem:[#allocation8 + $0x78] ss:$12 sps:$4 sm:$0xff]  }
 0x43d   : > { %4600 = vmatprep.subr.bf16.mxu0 %v7252_v7  ;;  %6269 = vmatprep.subr.bf16.mxu1 %v7277_v45  ;;  %v7270_v51 = vld [vmem:[#allocation8 + $0x94] ss:$12 sps:$4 sm:$0xff]   ;;  %v7268_v4 = vld [vmem:[#allocation8 + $0x90] ss:$12 sps:$4 sm:$0xff]  }
 0x43e   : > { %v3380_v61 = vmax.f32 %v3247_v62, %v3259_v14  ;;  %v3262_v19 = vmax.f32 %v3199_v5, 0.0  ;;  %v7298_v10 = vld [vmem:[#allocation8 + $0x68] ss:$12 sps:$4 sm:$0xff]   ;;  %v7276_v50 = vld [vmem:[#allocation8 + $0xc4] ss:$12 sps:$4 sm:$0xff]  }
 0x43f   : > { %v3054_v3 = vpop.f32.mrb[228].mxu1  ;;  %v7271_v54 = vld [vmem:[#allocation8 + $0xa8] ss:$12 sps:$4 sm:$0xff]   ;;  %v7274_v47 = vld [vmem:[#allocation8 + $0xc0] ss:$12 sps:$4 sm:$0xff]  }
 0x440   : > { %v3381_v38 = vmax.f32 %v3250_v13, %v3262_v19  ;;  %v3122_v55 = vadd.f32 %v3054_v3, %v9272_v63  ;;  %v6589_v6 = vpop.f32.mrb[229].mxu1  ;;  %v7279_v62 = vld [vmem:[#allocation8 + $0xd8] ss:$12 sps:$4 sm:$0xff]   ;;  %v7286_v14 = vld [vmem:[#allocation8 + $0xf4] ss:$12 sps:$4 sm:$0xff]  }
 0x441   : > { %v3057_v15 = vpop.f32.mrb[230].mxu1  ;;  %v7284_v5 = vld [vmem:[#allocation8 + $0xf0] ss:$12 sps:$4 sm:$0xff]   ;;  %v7291_v13 = vld [vmem:[#allocation8 + $0x10c] ss:$12 sps:$4 sm:$0xff]  }
 0x442   : > { %v3384_v56 = vmax.f32 %v3380_v61, %v3381_v38  ;;  %v3202_v36 = vadd.f32 %v9319_v23, %v3122_v55  ;;  %v6590_v29 = vpop.f32.mrb[231].mxu1  ;;  %v7250_v23 = vld [vmem:[#allocation8] ss:$12 sps:$4 sm:$0xff]   ;;  %v7289_v61 = vld [vmem:[#allocation8 + $0x108] ss:$12 sps:$4 sm:$0xff]  }
 0x443   : > { %v7296_v19 = vld [vmem:[#allocation8 + $0x124] ss:$12 sps:$4 sm:$0xff]   ;;  %v7294_v3 = vld [vmem:[#allocation8 + $0x120] ss:$12 sps:$4 sm:$0xff]   ;;  %v7301_v55 = vld [vmem:[#allocation8 + $0x13c] ss:$12 sps:$4 sm:$0xff]  }
 0x444   : > { %v3265_v27 = vmax.f32 %v3202_v36, 0.0  ;;  %v7299_v38 = vld [vmem:[#allocation8 + $0x138] ss:$12 sps:$4 sm:$0xff]   ;;  %v7302_v6 = vld [vmem:[#allocation8 + $0x140] ss:$12 sps:$4 sm:$0xff]  }
 0x445   : > { %v7306_v15 = vld [vmem:[#allocation8 + $0x154] ss:$12 sps:$4 sm:$0xff]   ;;  %v7304_v36 = vld [vmem:[#allocation8 + $0x150] ss:$12 sps:$4 sm:$0xff]   ;;  %v7308_v29 = vld [vmem:[#allocation8 + $0x98] ss:$12 sps:$4 sm:$0xff]  }
 0x446   : > { %v3382_v28 = vsel %vm955_vm2, %v3265_v27, -inf  ;;  %v7312_v27 = vld [vmem:[#allocation8 + $0x170] ss:$12 sps:$4 sm:$0xff]  }
 0x447   : > { %v3383_v22 = vmax.f32 %v3253_v35, %v3382_v28  ;;  %v7309_v35 = vld [vmem:[#allocation8 + $0x168] ss:$12 sps:$4 sm:$0xff]   ;;  %v7313_v28 = vld [vmem:[#allocation8 + $0xb0] ss:$12 sps:$4 sm:$0xff]  }
 0x449   : > { %v3385_v48 = vmax.f32 %v3383_v22, %v3256_v24  ;;  %v7316_v24 = vld [vmem:[#allocation8 + $0x184] ss:$12 sps:$4 sm:$0xff]  }
 0x44b   : > { %v3386_v21 = vmax.f32 %v3384_v56, %v3385_v48  ;;  %v7307_v56 = vld [vmem:[#allocation8 + $0x158] ss:$12 sps:$4 sm:$0xff]  }
 0x44d   : > { %v3387_v58 = vrot.slane %v3386_v21, 4 }
 0x44f   : > { %v3388_v63 = vmax.f32 %v3386_v21, %v3387_v58 }
 0x451   : > { %v3389_v25 = vrot.slane %v3388_v63, 2 }
 0x453   : > { %v3390_v37 = vmax.f32 %v3388_v63, %v3389_v25  ;;  %v3494_v25 = vld [vmem:[%s9806_s4] sm:$0x7] }
 0x455   : > { %v3391_v33 = vrot.slane %v3390_v37, 1 }
 0x457   : > { %v3392_v34 = vmax.f32 %v3390_v37, %v3391_v33  ;;  %v3891_v37 = vrot.slane %v3494_v25, %v9294_v40  ;;  %v9473_v33 = vld [vmem:[%s9807_s5] sm:$0x7] }
 0x459   : > { %v3393_v60 = vadd.f32 %v3392_v34, %v3379_v18  ;;  %v7281_v18 = vld [vmem:[#allocation8 + $0xdc] ss:$12 sps:$4 sm:$0xff]  }
 0x45a   : > { %v9881_v34 = vld [vmem:[#allocation18_spill] sm:$0xff] }
 0x45b   : > { %v3394_v57 = vmul.f32 0.33333334, %v3393_v60  ;;  %v3883_v60 = vrot.slane %v3494_v25, %v9881_v34  ;;  %v4062_v7 = vrot.slane %v9473_v33, %v9881_v34 }
 0x45d   : > { %v3397_v30 = vpack.c.bf16 %v3394_v57, %v3394_v57  ;;  %v9479_v57 = vld [vmem:[%s9808_s6] sm:$0x7] }
 0x45f   : > { %3969 = vmatmul.mubr.bf16.vlgmr.msra.gmra.mrb[56].mxu0 %v3397_v30  ;;  %6608 = vmatmul.mubr.bf16.vlgmr.msra.gmra.mrb[236].mxu1 %v3397_v30  ;;  %v9882_v30 = vld [vmem:[#allocation19_spill] sm:$0xff] }
 0x460   : > { %4601 = vmatpush1.bf16.msra.mxu0 %v7250_v23  ;;  %6270 = vmatpush3.bf16.msra.mxu1 %v7278_v46  ;;  %v3887_v23 = vrot.slane %v3494_v25, %v9882_v30  ;;  %v4066_v45 = vrot.slane %v9473_v33, %v9882_v30  ;;  %v7346_v25 = vld [vmem:[%s9813_s11] ss:$8 sps:$4 sm:$0xff]  }
 0x461   : > { %4602 = vmatprep.subr.bf16.mxu0 %v7255_v26  ;;  %6271 = vmatprep.subr.bf16.mxu1 %v7282_v43 }
 0x464   : > { %4603 = vmatpush1.bf16.msra.mxu0 %v7253_v39  ;;  %6272 = vmatpush3.bf16.msra.mxu1 %v7283_v9 }
 0x465   : > { %4604 = vmatprep.subr.bf16.mxu0 %v7258_v42  ;;  %6273 = vmatprep.subr.bf16.mxu1 %v7287_v1 }
 0x468   : > { %4605 = vmatpush1.bf16.msra.mxu0 %v7256_v16  ;;  %6274 = vmatpush3.bf16.msra.mxu1 %v7288_v41  ;;  %v4082_v16 = vrot.slane %v9479_v57, %v9881_v34 }
 0x469   : > { %4606 = vmatprep.subr.bf16.mxu0 %v7261_v52  ;;  %6275 = vmatprep.subr.bf16.mxu1 %v7292_v59 }
 0x46c   : > { %4607 = vmatpush1.bf16.msra.mxu0 %v7259_v31  ;;  %6276 = vmatpush3.bf16.msra.mxu1 %v7293_v12  ;;  %v4086_v31 = vrot.slane %v9479_v57, %v9882_v30 }
 0x46d   : > { %4608 = vmatprep.subr.bf16.mxu0 %v7264_v53  ;;  %6277 = vmatprep.subr.bf16.mxu1 %v7297_v8 }
 0x470   : > { %4609 = vmatpush1.bf16.msra.mxu0 %v7262_v2  ;;  %6278 = vmatpush3.bf16.msra.mxu1 %v7298_v10 }
 0x471   : > { %4610 = vmatprep.subr.bf16.mxu0 %v7267_v32  ;;  %6279 = vmatprep.subr.bf16.mxu1 %v7302_v6  ;;  %v7333_v6 = vld [vmem:[#allocation8 + $0x1e8] ss:$12 sps:$4 sm:$0xff]  }
 0x474   : > { %4611 = vmatpush1.bf16.msra.mxu0 %v7265_v11  ;;  %6280 = vmatpush3.bf16.msra.mxu1 %v7303_v49  ;;  %v4070_v49 = vrot.slane %v9473_v33, %v9294_v40  ;;  %v7351_v33 = vld [vmem:[%s9813_s11 + $0x14] ss:$8 sps:$4 sm:$0xff]  }
 0x475   : > { %4612 = vmatprep.subr.bf16.mxu0 %v7270_v51  ;;  %6281 = vmatprep.subr.bf16.mxu1 %v7307_v56  ;;  %v7334_v56 = vld [vmem:[#allocation8 + $0x1f8] ss:$12 sps:$4 sm:$0xff]  }
 0x478   : > { %4613 = vmatpush1.bf16.msra.mxu0 %v7268_v4  ;;  %6282 = vmatpush3.bf16.msra.mxu1 %v7308_v29 }
 0x479   : > { %4614 = vmatprep.subr.bf16.mxu0 %v7273_v0  ;;  %6283 = vmatprep.subr.bf16.mxu1 %v7312_v27  ;;  %v7314_v0 = vld [vmem:[#allocation8 + $0x180] ss:$12 sps:$4 sm:$0xff]  }
 0x47a   : > { %v7340_v27 = vld [vmem:[#allocation8 + $0x214] ss:$12 sps:$4 sm:$0xff]  }
 0x47c   : > { %4615 = vmatpush1.bf16.msra.mxu0 %v7271_v54  ;;  %6284 = vmatpush3.bf16.msra.mxu1 %v7313_v28  ;;  %v7317_v54 = vld [vmem:[#allocation8 + $0x188] ss:$12 sps:$4 sm:$0xff]   ;;  %v7341_v28 = vld [vmem:[#allocation8 + $0x218] ss:$12 sps:$4 sm:$0xff]  }
 0x47d   : > { %4616 = vmatprep.subr.bf16.mxu0 %v7276_v50  ;;  %6611 = vmatprep.subr.bf16.mxu1 %v9876_v20 }
 0x480   : > { %4617 = vmatpush1.bf16.msra.mxu0 %v7274_v47  ;;  %v7320_v47 = vld [vmem:[#allocation8 + $0x19c] ss:$12 sps:$4 sm:$0xff]  }
 0x481   : > { %4618 = vmatprep.subr.bf16.mxu0 %v7281_v18  ;;  %v7318_v18 = vld [vmem:[#allocation8 + $0x198] ss:$12 sps:$4 sm:$0xff]  }
 0x484   : > { %4619 = vmatpush1.bf16.msra.mxu0 %v7279_v62  ;;  %v7321_v62 = vld [vmem:[#allocation8 + $0x1a0] ss:$12 sps:$4 sm:$0xff]  }
 0x485   : > { %4620 = vmatprep.subr.bf16.mxu0 %v7286_v14  ;;  %v7324_v14 = vld [vmem:[#allocation8 + $0x1b4] ss:$12 sps:$4 sm:$0xff]  }
 0x488   : > { %4621 = vmatpush1.bf16.msra.mxu0 %v7284_v5  ;;  %v7322_v5 = vld [vmem:[#allocation8 + $0x1b0] ss:$12 sps:$4 sm:$0xff]  }
 0x489   : > { %4622 = vmatprep.subr.bf16.mxu0 %v7291_v13  ;;  %v7325_v13 = vld [vmem:[#allocation8 + $0x1b8] ss:$12 sps:$4 sm:$0xff]  }
 0x48c   : > { %4623 = vmatpush1.bf16.msra.mxu0 %v7289_v61  ;;  %v7328_v61 = vld [vmem:[#allocation8 + $0x1cc] ss:$12 sps:$4 sm:$0xff]  }
 0x48d   : > { %4624 = vmatprep.subr.bf16.mxu0 %v7296_v19  ;;  %v7326_v19 = vld [vmem:[#allocation8 + $0x1c8] ss:$12 sps:$4 sm:$0xff]  }
 0x490   : > { %4625 = vmatpush1.bf16.msra.mxu0 %v7294_v3  ;;  %v7329_v3 = vld [vmem:[#allocation8 + $0x1d0] ss:$12 sps:$4 sm:$0xff]  }
 0x491   : > { %4626 = vmatprep.subr.bf16.mxu0 %v7301_v55  ;;  %v7330_v55 = vld [vmem:[#allocation8 + $0x1e0] ss:$12 sps:$4 sm:$0xff]  }
 0x494   : > { %4627 = vmatpush1.bf16.msra.mxu0 %v7299_v38  ;;  %v7332_v38 = vld [vmem:[#allocation8 + $0x1e4] ss:$12 sps:$4 sm:$0xff]  }
 0x495   : > { %4628 = vmatprep.subr.bf16.mxu0 %v7306_v15  ;;  %v7336_v15 = vld [vmem:[#allocation8 + $0x1fc] ss:$12 sps:$4 sm:$0xff]  }
 0x498   : > { %4629 = vmatpush1.bf16.msra.mxu0 %v7304_v36  ;;  %v7337_v36 = vld [vmem:[#allocation8 + $0x200] ss:$12 sps:$4 sm:$0xff]  }
 0x499   : > { %4630 = vmatprep.subr.bf16.mxu0 %v7311_v17  ;;  %v4090_v17 = vrot.slane %v9479_v57, %v9294_v40  ;;  %v7354_v57 = vld [vmem:[%s9813_s11 + $0x24] ss:$8 sps:$4 sm:$0xff]  }
 0x49c   : > { %4631 = vmatpush1.bf16.msra.mxu0 %v7309_v35  ;;  %v7338_v35 = vld [vmem:[#allocation8 + $0x210] ss:$12 sps:$4 sm:$0xff]  }
 0x49d   : > { %4641 = vmatprep.subr.bf16.mxu0 %v7316_v24 }
 0x4f2   : > { %v6254_v22 = vpop.f32.mrb[232].mxu1 }
 0x4f3   : > { %v6255_v48 = vpop.f32.mrb[233].mxu1 }
 0x4f4   : > { %v6256_v21 = vadd.f32 %v6255_v48, %v6254_v22  ;;  %v6257_v58 = vpop.f32.mrb[234].mxu1  ;;  %v7344_v22 = vld [vmem:[#allocation8 + $0x22c] ss:$12 sps:$4 sm:$0xff]   ;;  %v7342_v48 = vld [vmem:[#allocation8 + $0x228] ss:$12 sps:$4 sm:$0xff]  }
 0x4f5   : > { %v6258_v63 = vpop.f32.mrb[235].mxu1 }
 0x4f6   : > { %v4012_v26 = vadd.f32 %v6256_v21, %v3891_v37  ;;  %v7345_v21 = vld [vmem:[#allocation8 + $0x230] ss:$12 sps:$4 sm:$0xff]  }
 0x4f7   : > { %v7348_v63 = vld [vmem:[%s9813_s11 + $0x4] ss:$8 sps:$4 sm:$0xff]  }
 0x532   : > { %v3970_v39 = vpop.f32.mrb[56].mxu0  ;;  %v4051_v42 = vpop.f32.mrb[236].mxu1 }
 0x533   : > { %v6667_v46 = vadd.f32 %v3970_v39, %v3883_v60  ;;  %v4052_v43 = vadd.f32 %v4051_v42, %v4012_v26  ;;  %v3972_v52 = vpop.f32.mrb[57].mxu0  ;;  %v6609_v9 = vpop.f32.mrb[237].mxu1  ;;  %v7349_v60 = vld [vmem:[%s9813_s11 + $0x10] ss:$8 sps:$4 sm:$0xff]   ;;  %v7360_v39 = vld [vmem:[%s9813_s11 + $0x44] ss:$8 sps:$4 sm:$0xff]  }
 0x534   : > { %v6668_v1 = vadd.f32 %v3972_v52, %v3887_v23  ;;  %v3974_v53 = vpop.f32.mrb[58].mxu0  ;;  %v4054_v41 = vpop.f32.mrb[238].mxu1  ;;  %v7352_v23 = vld [vmem:[%s9813_s11 + $0x20] ss:$8 sps:$4 sm:$0xff]   ;;  %v7355_v26 = vld [vmem:[%s9813_s11 + $0x30] ss:$8 sps:$4 sm:$0xff]  }
 0x535   : > { %v4074_v59 = vmul.f32 %v6667_v46, %v4062_v7  ;;  %v3975_v2 = vpop.f32.mrb[59].mxu0  ;;  %v6610_v32 = vpop.f32.mrb[239].mxu1  ;;  %v4076_v29 = vmul.f32 %v4070_v49, %v4052_v43  ;;  %v7357_v7 = vld [vmem:[%s9813_s11 + $0x34] ss:$8 sps:$4 sm:$0xff]   ;;  %v7358_v42 = vld [vmem:[%s9813_s11 + $0x40] ss:$8 sps:$4 sm:$0xff]  }
 0x536   : > { %v4075_v12 = vmul.f32 %v6668_v1, %v4066_v45  ;;  %v7363_v45 = vld [vmem:[%s9813_s11 + $0x54] ss:$8 sps:$4 sm:$0xff]   ;;  %v7361_v46 = vld [vmem:[%s9813_s11 + $0x50] ss:$8 sps:$4 sm:$0xff]   ;;  %v7366_v43 = vld [vmem:[%s9813_s11 + $0x64] ss:$8 sps:$4 sm:$0xff]  }
 0x537   : > { %v4094_v8 = vadd.f32 %v4082_v16, %v4074_v59  ;;  %v4096_v24 = vadd.f32 %v4090_v17, %v4076_v29  ;;  %v7364_v16 = vld [vmem:[%s9813_s11 + $0x60] ss:$8 sps:$4 sm:$0xff]   ;;  %v7369_v52 = vld [vmem:[%s9813_s11 + $0x74] ss:$8 sps:$4 sm:$0xff]   ;;  %v7372_v41 = vld [vmem:[%s9813_s11 + $0x84] ss:$8 sps:$4 sm:$0xff]  }
 0x538   : > { %v4095_v11 = vadd.f32 %v4086_v31, %v4075_v12  ;;  %v7373_v9 = vld [vmem:[#allocation9 + $0x40] sm:$0xff]   ;;  %v7378_v53 = vld [vmem:[#allocation9 + $0x48] sm:$0xff]   ;;  %v7383_v2 = vld [vmem:[#allocation9 + $0x50] sm:$0xff]  }
 0x539   : > { %v4097_v51 = vmax.f32 %v4094_v8, 0.0  ;;  %v4099_v58 = vmax.f32 %v4096_v24, 0.0  ;;  %v7374_v1 = vld [vmem:[#allocation9] sm:$0xff]   ;;  %v7379_v59 = vld [vmem:[#allocation9 + $0x8] sm:$0xff]   ;;  %v7384_v8 = vld [vmem:[#allocation9 + $0x10] sm:$0xff]  }
 0x53a   : > { %v4098_v10 = vmax.f32 %v4095_v11, 0.0  ;;  %v7367_v31 = vld [vmem:[%s9813_s11 + $0x70] ss:$8 sps:$4 sm:$0xff]   ;;  %v7370_v32 = vld [vmem:[%s9813_s11 + $0x80] ss:$8 sps:$4 sm:$0xff]  }
 0x53b   : > { %v4100_v50 = vpack.c.bf16 %v4097_v51, %v4097_v51  ;;  %v4102_v37 = vpack.c.bf16 %v4099_v58, %v4099_v58  ;;  %v7377_v12 = vld [vmem:[%s9813_s11 + $0x94] ss:$8 sps:$4 sm:$0xff]   ;;  %v7388_v11 = vld [vmem:[#allocation9 + $0x58] sm:$0xff]  }
 0x53c   : > { %v4101_v4 = vpack.c.bf16 %v4098_v10, %v4098_v10  ;;  %v7375_v51 = vld [vmem:[%s9813_s11 + $0x90] ss:$8 sps:$4 sm:$0xff]   ;;  %v7382_v10 = vld [vmem:[%s9813_s11 + $0xa4] ss:$8 sps:$4 sm:$0xff]   ;;  %v7407_v49 = vld [vmem:[%s9813_s11 + $0xf4] ss:$8 sps:$4 sm:$0xff]  }
 0x53d   : > { %v7412_v29 = vld [vmem:[%s9813_s11 + $0x104] ss:$8 sps:$4 sm:$0xff]  }
 0x53e   : > { %4632 = vmatprep.mubr.bf16.mxu0 %v4101_v4  ;;  %4714 = vmatprep.mubr.bf16.mxu1 %v4101_v4  ;;  %v7389_v4 = vld [vmem:[#allocation9 + $0x18] sm:$0xff]  }
 0x53f   : > { %4633 = vmatmul.mubr.bf16.vlgmr.msra.gmra.mrb[60].mxu0 %v4100_v50  ;;  %4715 = vmatmul.mubr.bf16.vlgmr.msra.gmra.mrb[240].mxu1 %v4100_v50  ;;  %v7387_v50 = vld [vmem:[%s9813_s11 + $0xb4] ss:$8 sps:$4 sm:$0xff]  }
 0x540   : > { %4642 = vmatpush1.bf16.msra.mxu0 %v7314_v0  ;;  %6612 = vmatpush3.bf16.msra.mxu1 %v7317_v54  ;;  %v7393_v0 = vld [vmem:[#allocation9 + $0x60] sm:$0xff]   ;;  %v7380_v54 = vld [vmem:[%s9813_s11 + $0xa0] ss:$8 sps:$4 sm:$0xff]  }
 0x541   : > { %4643 = vmatprep.subr.bf16.mxu0 %v7320_v47  ;;  %6613 = vmatprep.subr.bf16.mxu1 %v9876_v20  ;;  %v7394_v47 = vld [vmem:[#allocation9 + $0x20] sm:$0xff]  }
 0x542   : > { %4673 = vmatprep.mubr.bf16.mxu0 %v9877_v44  ;;  %6627 = vmatprep.mubr.msk.bf16.mxu1 %vm7659_vm8, %v9876_v20 }
 0x544   : > { %4644 = vmatpush1.bf16.msra.mxu0 %v7318_v18  ;;  %6614 = vmatpush3.bf16.msra.mxu1 %v7321_v62  ;;  %v7385_v18 = vld [vmem:[%s9813_s11 + $0xb0] ss:$8 sps:$4 sm:$0xff]   ;;  %v7392_v62 = vld [vmem:[%s9813_s11 + $0xc4] ss:$8 sps:$4 sm:$0xff]  }
 0x545   : > { %4645 = vmatprep.subr.bf16.mxu0 %v7324_v14  ;;  %6615 = vmatprep.subr.bf16.mxu1 %v9876_v20  ;;  %v7390_v14 = vld [vmem:[%s9813_s11 + $0xc0] ss:$8 sps:$4 sm:$0xff]  }
 0x548   : > { %4646 = vmatpush1.bf16.msra.mxu0 %v7322_v5  ;;  %6616 = vmatpush3.bf16.msra.mxu1 %v7325_v13  ;;  %v7395_v5 = vld [vmem:[%s9813_s11 + $0xd0] ss:$8 sps:$4 sm:$0xff]   ;;  %v7397_v13 = vld [vmem:[%s9813_s11 + $0xd4] ss:$8 sps:$4 sm:$0xff]  }
 0x549   : > { %4647 = vmatprep.subr.bf16.mxu0 %v7328_v61  ;;  %6617 = vmatprep.subr.bf16.mxu1 %v9876_v20  ;;  %v7398_v61 = vld [vmem:[#allocation9 + $0x68] sm:$0xff]  }
 0x54c   : > { %4648 = vmatpush1.bf16.msra.mxu0 %v7326_v19  ;;  %6618 = vmatpush3.bf16.msra.mxu1 %v7329_v3  ;;  %v7399_v19 = vld [vmem:[#allocation9 + $0x28] sm:$0xff]   ;;  %v7402_v3 = vld [vmem:[%s9813_s11 + $0xe4] ss:$8 sps:$4 sm:$0xff]  }
 0x54d   : > { %4649 = vmatprep.subr.bf16.mxu0 %v7332_v38  ;;  %6619 = vmatprep.subr.bf16.mxu1 %v9876_v20  ;;  %v7403_v38 = vld [vmem:[#allocation9 + $0x70] sm:$0xff]  }
 0x550   : > { %4650 = vmatpush1.bf16.msra.mxu0 %v7330_v55  ;;  %6620 = vmatpush3.bf16.msra.mxu1 %v7333_v6  ;;  %v7400_v55 = vld [vmem:[%s9813_s11 + $0xe0] ss:$8 sps:$4 sm:$0xff]  }
 0x551   : > { %4651 = vmatprep.subr.bf16.mxu0 %v7336_v15  ;;  %6621 = vmatprep.subr.bf16.mxu1 %v9876_v20  ;;  %v7404_v6 = vld [vmem:[#allocation9 + $0x30] sm:$0xff]   ;;  %v7408_v15 = vld [vmem:[#allocation9 + $0x78] sm:$0xff]  }
 0x554   : > { %4652 = vmatpush1.bf16.msra.mxu0 %v7334_v56  ;;  %6622 = vmatpush3.bf16.msra.mxu1 %v7337_v36  ;;  %v7405_v56 = vld [vmem:[%s9813_s11 + $0xf0] ss:$8 sps:$4 sm:$0xff]  }
 0x555   : > { %4653 = vmatprep.subr.bf16.mxu0 %v7340_v27  ;;  %6623 = vmatprep.subr.bf16.mxu1 %v9876_v20  ;;  %v7409_v36 = vld [vmem:[#allocation9 + $0x38] sm:$0xff]  }
 0x558   : > { %4654 = vmatpush1.bf16.msra.mxu0 %v7338_v35  ;;  %6624 = vmatpush3.bf16.msra.mxu1 %v7341_v28 }
 0x559   : > { %4655 = vmatprep.subr.bf16.mxu0 %v7344_v22  ;;  %6625 = vmatprep.subr.bf16.mxu1 %v9876_v20  ;;  %v4199_v22 = vld [vmem:[%s9810_s8] sm:$0x7] }
 0x55a   : > { %v4588_v58 = vrot.slane %v4199_v22, %v9881_v34 }
 0x55c   : > { %4656 = vmatpush1.bf16.msra.mxu0 %v7342_v48  ;;  %6626 = vmatpush3.bf16.msra.mxu1 %v7345_v21  ;;  %v4596_v48 = vrot.slane %v4199_v22, %v9294_v40  ;;  %v9611_v21 = vld [vmem:[%s9883_s2] sm:$0x7] }
 0x55d   : > { %5108 = vmatprep.subr.bf16.mxu1 %v7348_v63  ;;  %6300 = vmatprep.subr.bf16.mxu0 %v7373_v9  ;;  %v9617_v63 = vld [vmem:[%s9884_s17] sm:$0x7]  ;;  %s6160_s17 = sshll.u32 %s7777_s0, 4  ;;  %s7568_s0 = scalar_lea.vmem %s9760_s12, 16 }
 0x55e   : > { %p7569_p10 = scmp.ne.s32.totalorder %s9760_s12, %s7568_s0 }
 0x55f   : > { %4674 = vmatmul.mubr.bf16.vlgmr.msra.gmra.mrb[60].mxu0 %v4102_v37  ;;  %6628 = vmatmul.mubr.bf16.vlgmr.msra.gmra.mrb[244].mxu1 %v4102_v37  ;;  %v4767_v37 = vrot.slane %v9611_v21, %v9881_v34 }
 0x560   : > { %5109 = vmatpush1.bf16.msra.mxu1 %v7346_v25  ;;  %6301 = vmatpush3.bf16.msra.mxu0 %v7374_v1  ;;  %v4592_v25 = vrot.slane %v4199_v22, %v9882_v30  ;;  %v7443_v22 = vld [vmem:[%s9885_s15 + $0x8] sm:$0xff]   ;;  %p7570_p3 = pnand %p7569_p10, %p7901_p5 }
 0x561   : > { %5110 = vmatprep.subr.bf16.mxu1 %v7351_v33  ;;  %6302 = vmatprep.subr.bf16.mxu0 %v7378_v53 }
 0x562   : > { %p7571_p7 = pneg %p7570_p3 }
 0x564   : > { %5111 = vmatpush1.bf16.msra.mxu1 %v7349_v60  ;;  %6303 = vmatpush3.bf16.msra.mxu0 %v7379_v59 }
 0x565   : > { %5112 = vmatprep.subr.bf16.mxu1 %v7354_v57  ;;  %6304 = vmatprep.subr.bf16.mxu0 %v7383_v2 }
 0x568   : > { %5113 = vmatpush1.bf16.msra.mxu1 %v7352_v23  ;;  %6305 = vmatpush3.bf16.msra.mxu0 %v7384_v8  ;;  %v4771_v23 = vrot.slane %v9611_v21, %v9882_v30  ;;  %v7410_v8 = vld [vmem:[%s9813_s11 + $0x100] ss:$8 sps:$4 sm:$0xff]  }
 0x569   : > { %5114 = vmatprep.subr.bf16.mxu1 %v7357_v7  ;;  %6306 = vmatprep.subr.bf16.mxu0 %v7388_v11  ;;  %v7413_v11 = vld [vmem:[#allocation9 + $0x80] sm:$0xff]  }
 0x56c   : > { %5115 = vmatpush1.bf16.msra.mxu1 %v7355_v26  ;;  %6307 = vmatpush3.bf16.msra.mxu0 %v7389_v4  ;;  %v4787_v26 = vrot.slane %v9617_v63, %v9881_v34  ;;  %v7414_v4 = vld [vmem:[%s9813_s11 + $0x110] ss:$8 sps:$4 sm:$0xff]  }
 0x56d   : > { %5116 = vmatprep.subr.bf16.mxu1 %v7360_v39  ;;  %6308 = vmatprep.subr.bf16.mxu0 %v7393_v0  ;;  %v7417_v0 = vld [vmem:[#allocation9 + $0x88] sm:$0xff]  }
 0x570   : > { %5117 = vmatpush1.bf16.msra.mxu1 %v7358_v42  ;;  %6309 = vmatpush3.bf16.msra.mxu0 %v7394_v47  ;;  %v7421_v47 = vld [vmem:[#allocation9 + $0x90] sm:$0xff]  }
 0x571   : > { %5118 = vmatprep.subr.bf16.mxu1 %v7363_v45  ;;  %6310 = vmatprep.subr.bf16.mxu0 %v7398_v61  ;;  %v7429_v61 = vld [vmem:[#allocation9 + $0xa0] sm:$0xff]  }
 0x574   : > { %5119 = vmatpush1.bf16.msra.mxu1 %v7361_v46  ;;  %6311 = vmatpush3.bf16.msra.mxu0 %v7399_v19  ;;  %v4775_v19 = vrot.slane %v9611_v21, %v9294_v40  ;;  %v7446_v21 = vld [vmem:[%s9885_s15 + $0x20] sm:$0xff]  }
 0x575   : > { %5120 = vmatprep.subr.bf16.mxu1 %v7366_v43  ;;  %6312 = vmatprep.subr.bf16.mxu0 %v7403_v38  ;;  %v7430_v38 = vld [vmem:[%s9813_s11 + $0x150] ss:$8 sps:$4 sm:$0xff]  }
 0x578   : > { %5121 = vmatpush1.bf16.msra.mxu1 %v7364_v16  ;;  %6313 = vmatpush3.bf16.msra.mxu0 %v7404_v6  ;;  %v4791_v16 = vrot.slane %v9617_v63, %v9882_v30 }
 0x579   : > { %5122 = vmatprep.subr.bf16.mxu1 %v7369_v52  ;;  %6314 = vmatprep.subr.bf16.mxu0 %v7408_v15  ;;  %v7436_v15 = vld [vmem:[%s9813_s11 + $0x164] ss:$8 sps:$4 sm:$0xff]  }
 0x57c   : > { %5123 = vmatpush1.bf16.msra.mxu1 %v7367_v31  ;;  %6315 = vmatpush3.bf16.msra.mxu0 %v7409_v36  ;;  %v7437_v36 = vld [vmem:[#allocation9 + $0xb0] sm:$0xff]  }
 0x57d   : > { %5124 = vmatprep.subr.bf16.mxu1 %v7372_v41  ;;  %6631 = vmatprep.subr.bf16.mxu0 %v9876_v20 }
 0x580   : > { %5125 = vmatpush1.bf16.msra.mxu1 %v7370_v32 }
 0x581   : > { %5126 = vmatprep.subr.bf16.mxu1 %v7377_v12 }
 0x584   : > { %5127 = vmatpush1.bf16.msra.mxu1 %v7375_v51 }
 0x585   : > { %5128 = vmatprep.subr.bf16.mxu1 %v7382_v10  ;;  %v7416_v10 = vld [vmem:[%s9813_s11 + $0x114] ss:$8 sps:$4 sm:$0xff]  }
 0x588   : > { %5129 = vmatpush1.bf16.msra.mxu1 %v7380_v54  ;;  %v7420_v54 = vld [vmem:[%s9813_s11 + $0x124] ss:$8 sps:$4 sm:$0xff]  }
 0x589   : > { %5130 = vmatprep.subr.bf16.mxu1 %v7387_v50  ;;  %v7418_v50 = vld [vmem:[%s9813_s11 + $0x120] ss:$8 sps:$4 sm:$0xff]  }
 0x58c   : > { %5131 = vmatpush1.bf16.msra.mxu1 %v7385_v18  ;;  %v7424_v18 = vld [vmem:[%s9813_s11 + $0x134] ss:$8 sps:$4 sm:$0xff]  }
 0x58d   : > { %5132 = vmatprep.subr.bf16.mxu1 %v7392_v62  ;;  %v7422_v62 = vld [vmem:[%s9813_s11 + $0x130] ss:$8 sps:$4 sm:$0xff]  }
 0x590   : > { %5133 = vmatpush1.bf16.msra.mxu1 %v7390_v14  ;;  %v7425_v14 = vld [vmem:[#allocation9 + $0x98] sm:$0xff]  }
 0x591   : > { %5134 = vmatprep.subr.bf16.mxu1 %v7397_v13  ;;  %v7426_v13 = vld [vmem:[%s9813_s11 + $0x140] ss:$8 sps:$4 sm:$0xff]  }
 0x594   : > { %5135 = vmatpush1.bf16.msra.mxu1 %v7395_v5  ;;  %v7428_v5 = vld [vmem:[%s9813_s11 + $0x144] ss:$8 sps:$4 sm:$0xff]  }
 0x595   : > { %5136 = vmatprep.subr.bf16.mxu1 %v7402_v3  ;;  %v7432_v3 = vld [vmem:[%s9813_s11 + $0x154] ss:$8 sps:$4 sm:$0xff]  }
 0x598   : > { %5137 = vmatpush1.bf16.msra.mxu1 %v7400_v55  ;;  %v7433_v55 = vld [vmem:[#allocation9 + $0xa8] sm:$0xff]  }
 0x599   : > { %5138 = vmatprep.subr.bf16.mxu1 %v7407_v49  ;;  %v4795_v49 = vrot.slane %v9617_v63, %v9294_v40  ;;  %v7440_v40 = vld [vmem:[%s9813_s11 + $0x174] ss:$8 sps:$4 sm:$0xff]  }
 0x59a   : > { %v7448_v63 = vld [vmem:[%s9885_s15 + $0x30] sm:$0xff]  }
 0x59c   : > { %5139 = vmatpush1.bf16.msra.mxu1 %v7405_v56  ;;  %v7434_v56 = vld [vmem:[%s9813_s11 + $0x160] ss:$8 sps:$4 sm:$0xff]  }
 0x59d   : > { %5149 = vmatprep.subr.bf16.mxu1 %v7412_v29 }
 0x612   : > { %v6285_v17 = vpop.f32.mrb[240].mxu1 }
 0x613   : > { %v6286_v27 = vpop.f32.mrb[241].mxu1 }
 0x614   : > { %v6287_v35 = vadd.f32 %v6286_v27, %v6285_v17  ;;  %v6288_v28 = vpop.f32.mrb[242].mxu1  ;;  %v7438_v17 = vld [vmem:[%s9813_s11 + $0x170] ss:$8 sps:$4 sm:$0xff]  }
 0x615   : > { %v6289_v24 = vpop.f32.mrb[243].mxu1  ;;  %v7441_v27 = vld [vmem:[#allocation9 + $0xb8] sm:$0xff]   ;;  %v7442_v28 = vld [vmem:[%s9885_s15] sm:$0xff]  }
 0x616   : > { %v4717_v33 = vadd.f32 %v6287_v35, %v4596_v48  ;;  %v7445_v48 = vld [vmem:[%s9885_s15 + $0x18] sm:$0xff]  }
 0x632   : > { %v4675_v60 = vpop.f32.mrb[60].mxu0  ;;  %v4756_v57 = vpop.f32.mrb[244].mxu1 }
 0x633   : > { %v6669_v7 = vadd.f32 %v4675_v60, %v4588_v58  ;;  %v4757_v39 = vadd.f32 %v4756_v57, %v4717_v33  ;;  %v4677_v42 = vpop.f32.mrb[61].mxu0  ;;  %v6629_v45 = vpop.f32.mrb[245].mxu1  ;;  %v7447_v58 = vld [vmem:[%s9885_s15 + $0x28] sm:$0xff]   ;;  %v7452_v60 = vld [vmem:[%s9885_s15 + $0x50] sm:$0xff]   ;;  %v7453_v57 = vld [vmem:[%s9885_s15 + $0x58] sm:$0xff]  }
 0x634   : > { %v6670_v46 = vadd.f32 %v4677_v42, %v4592_v25  ;;  %v4679_v43 = vpop.f32.mrb[62].mxu0  ;;  %v4759_v52 = vpop.f32.mrb[246].mxu1  ;;  %v7449_v25 = vld [vmem:[%s9885_s15 + $0x38] sm:$0xff]   ;;  %v7451_v33 = vld [vmem:[%s9885_s15 + $0x48] sm:$0xff]   ;;  %v4856_v45 = vld [vmem:[%s9886_s7] sm:$0x3] }
 0x635   : > { %v4779_v9 = vmul.f32 %v6669_v7, %v4767_v37  ;;  %v4680_v1 = vpop.f32.mrb[63].mxu0  ;;  %v6630_v31 = vpop.f32.mrb[247].mxu1  ;;  %v4781_v6 = vmul.f32 %v4775_v19, %v4757_v39  ;;  %v7450_v37 = vld [vmem:[%s9885_s15 + $0x40] sm:$0xff]   ;;  %v5105_v43 = vrot.slane %v4856_v45, %v9882_v30 }
 0x636   : > { %v4780_v53 = vmul.f32 %v6670_v46, %v4771_v23  ;;  %v5190_v46 = vld [vmem:[%s9887_s26] sm:$0x3]  ;;  %s9758_s26 = scalar_lea.hbm %s9890_s24, %s6160_s17 }
 0x637   : > { %v4799_v41 = vadd.f32 %v4787_v26, %v4779_v9  ;;  %v4801_v29 = vadd.f32 %v4795_v49, %v4781_v6  ;;  %v5195_v52 = vrot.slane %v5190_v46, %v9881_v34  ;;  %v5199_v31 = vrot.slane %v5190_v46, %v9882_v30 }
 0x638   : > { %v4800_v59 = vadd.f32 %v4791_v16, %v4780_v53  ;;  %v5101_v16 = vrot.slane %v4856_v45, %v9881_v34 }
 0x639   : > { %v4802_v2 = vmax.f32 %v4799_v41, 0.0  ;;  %v4804_v35 = vmax.f32 %v4801_v29, 0.0 }
 0x63a   : > { %v4803_v32 = vmax.f32 %v4800_v59, 0.0 }
 0x63b   : > { %v4805_v51 = vpack.c.bf16 %v4802_v2, %v4802_v2  ;;  %v4807_v24 = vpack.c.bf16 %v4804_v35, %v4804_v35 }
 0x63c   : > { %v4806_v12 = vpack.c.bf16 %v4803_v32, %v4803_v32 }
 0x63e   : > { %5140 = vmatprep.mubr.bf16.mxu1 %v4806_v12  ;;  %5470 = vmatprep.mubr.bf16.mxu0 %v4806_v12 }
 0x63f   : > { %5141 = vmatmul.mubr.bf16.vlgmr.msra.gmra.mrb[248].mxu1 %v4805_v51  ;;  %5471 = vmatmul.mubr.bf16.vlgmr.msra.gmra.mrb[64].mxu0 %v4805_v51 }
 0x640   : > { %5150 = vmatpush1.bf16.msra.mxu1 %v7410_v8  ;;  %6632 = vmatpush3.bf16.msra.mxu0 %v7413_v11 }
 0x641   : > { %5151 = vmatprep.subr.bf16.mxu1 %v7416_v10  ;;  %6633 = vmatprep.subr.bf16.mxu0 %v9876_v20 }
 0x642   : > { %5181 = vmatprep.mubr.bf16.mxu1 %v9877_v44  ;;  %6647 = vmatprep.mubr.msk.bf16.mxu0 %vm7659_vm8, %v9876_v20 }
 0x644   : > { %5152 = vmatpush1.bf16.msra.mxu1 %v7414_v4  ;;  %6634 = vmatpush3.bf16.msra.mxu0 %v7417_v0 }
 0x645   : > { %5153 = vmatprep.subr.bf16.mxu1 %v7420_v54  ;;  %6635 = vmatprep.subr.bf16.mxu0 %v9876_v20 }
 0x648   : > { %5154 = vmatpush1.bf16.msra.mxu1 %v7418_v50  ;;  %6636 = vmatpush3.bf16.msra.mxu0 %v7421_v47 }
 0x649   : > { %5155 = vmatprep.subr.bf16.mxu1 %v7424_v18  ;;  %6637 = vmatprep.subr.bf16.mxu0 %v9876_v20 }
 0x64c   : > { %5156 = vmatpush1.bf16.msra.mxu1 %v7422_v62  ;;  %6638 = vmatpush3.bf16.msra.mxu0 %v7425_v14 }
 0x64d   : > { %5157 = vmatprep.subr.bf16.mxu1 %v7428_v5  ;;  %6639 = vmatprep.subr.bf16.mxu0 %v9876_v20 }
 0x650   : > { %5158 = vmatpush1.bf16.msra.mxu1 %v7426_v13  ;;  %6640 = vmatpush3.bf16.msra.mxu0 %v7429_v61 }
 0x651   : > { %5159 = vmatprep.subr.bf16.mxu1 %v7432_v3  ;;  %6641 = vmatprep.subr.bf16.mxu0 %v9876_v20 }
 0x654   : > { %5160 = vmatpush1.bf16.msra.mxu1 %v7430_v38  ;;  %6642 = vmatpush3.bf16.msra.mxu0 %v7433_v55 }
 0x655   : > { %5161 = vmatprep.subr.bf16.mxu1 %v7436_v15  ;;  %6643 = vmatprep.subr.bf16.mxu0 %v9876_v20 }
 0x658   : > { %5162 = vmatpush1.bf16.msra.mxu1 %v7434_v56  ;;  %6644 = vmatpush3.bf16.msra.mxu0 %v7437_v36 }
 0x659   : > { %5163 = vmatprep.subr.bf16.mxu1 %v7440_v40  ;;  %6645 = vmatprep.subr.bf16.mxu0 %v9876_v20  ;;  %v7444_v20 = vld [vmem:[%s9885_s15 + $0x10] sm:$0xff]  }
 0x65c   : > { %5164 = vmatpush1.bf16.msra.mxu1 %v7438_v17  ;;  %6646 = vmatpush3.bf16.msra.mxu0 %v7441_v27 }
 0x65d   : > { %5594 = vmatprep.subr.bf16.mxu0 %v9877_v44 }
 0x65f   : > { %5182 = vmatmul.mubr.bf16.vlgmr.msra.gmra.mrb[248].mxu1 %v4807_v24  ;;  %6648 = vmatmul.mubr.bf16.vlgmr.msra.gmra.mrb[68].mxu0 %v4807_v24 }
 0x660   : > { %5595 = vmatpush1.bf16.msra.mxu0 %v7442_v28 }
 0x661   : > { %5596 = vmatprep.subr.bf16.mxu0 %v9877_v44 }
 0x664   : > { %5597 = vmatpush1.bf16.msra.mxu0 %v7443_v22 }
 0x665   : > { %5598 = vmatprep.subr.bf16.mxu0 %v9877_v44 }
 0x668   : > { %5599 = vmatpush1.bf16.msra.mxu0 %v7444_v20 }
 0x669   : > { %5600 = vmatprep.subr.bf16.mxu0 %v9877_v44 }
 0x66c   : > { %5601 = vmatpush1.bf16.msra.mxu0 %v7445_v48 }
 0x66d   : > { %5602 = vmatprep.subr.bf16.mxu0 %v9877_v44 }
 0x670   : > { %5603 = vmatpush1.bf16.msra.mxu0 %v7446_v21 }
 0x671   : > { %5604 = vmatprep.subr.bf16.mxu0 %v9877_v44 }
 0x674   : > { %5605 = vmatpush1.bf16.msra.mxu0 %v7447_v58 }
 0x675   : > { %5606 = vmatprep.subr.bf16.mxu0 %v9877_v44 }
 0x678   : > { %5607 = vmatpush1.bf16.msra.mxu0 %v7448_v63 }
 0x679   : > { %5608 = vmatprep.subr.bf16.mxu0 %v9877_v44 }
 0x67c   : > { %5609 = vmatpush1.bf16.msra.mxu0 %v7449_v25 }
 0x67d   : > { %5610 = vmatprep.subr.bf16.mxu0 %v9877_v44 }
 0x680   : > { %5611 = vmatpush1.bf16.msra.mxu0 %v7450_v37 }
 0x681   : > { %5612 = vmatprep.subr.bf16.mxu0 %v9877_v44 }
 0x684   : > { %5613 = vmatpush1.bf16.msra.mxu0 %v7451_v33 }
 0x685   : > { %5614 = vmatprep.subr.bf16.mxu0 %v9877_v44 }
 0x688   : > { %5615 = vmatpush1.bf16.msra.mxu0 %v7452_v60 }
 0x689   : > { %5616 = vmatprep.subr.bf16.mxu0 %v9877_v44  ;;  %v5204_v44 = vld [vmem:[%s9888_s21] sm:$0x3]  ;;  %s7572_s21 = sshll.u32 %s7660_s1, 4  ;;  %s7573_s21 = int_to_ptr.vmem [resolvable:$false] %s7572_s21 }
 0x68a   : > { %v5209_v41 = vrot.slane %v5204_v44, %v9881_v34  ;;  %v5213_v8 = vrot.slane %v5204_v44, %v9882_v30  ;;  %v5634_v30 = vld [vmem:[%s9889_s14] sm:$0x1]  ;;  %s7574_s2 = scalar_lea.vmem %s7573_s21, 32  ;;  %p7575_p12 = scmp.lt.s32.totalorder %s9760_s12, %s7573_s21 }
 0x68b   : > { %p7576_p2 = scmp.lt.s32.totalorder %s7574_s2, %s7568_s0 }
 0x68c   : > { %5617 = vmatpush1.bf16.msra.mxu0 %v7453_v57 }
 0x68d   : > { %p7577_p1 = por %p7576_p2, %p7575_p12 }
 0x68f   : > { %p7578_p4 = pnand %p7577_p1, %p7571_p7 }
 0x712   : > { %v6316_v23 = vpop.f32.mrb[64].mxu0 }
 0x713   : > { %v6317_v7 = vpop.f32.mrb[65].mxu0 }
 0x714   : > { %v6318_v26 = vadd.f32 %v6317_v7, %v6316_v23  ;;  %v6319_v39 = vpop.f32.mrb[66].mxu0 }
 0x715   : > { %v6320_v42 = vpop.f32.mrb[67].mxu0 }
 0x732   : > { %v5183_v9 = vpop.f32.mrb[248].mxu1  ;;  %v5512_v1 = vpop.f32.mrb[68].mxu0 }
 0x733   : > { %v6671_v53 = vadd.f32 %v5183_v9, %v5101_v16  ;;  %v5513_v59 = vadd.f32 %v6318_v26, %v5512_v1  ;;  %v5185_v2 = vpop.f32.mrb[249].mxu1  ;;  %v6649_v32 = vpop.f32.mrb[69].mxu0 }
 0x734   : > { %v6672_v12 = vadd.f32 %v5185_v2, %v5105_v43  ;;  %v5187_v11 = vpop.f32.mrb[250].mxu1  ;;  %v5515_v51 = vpop.f32.mrb[70].mxu0 }
 0x735   : > { %v5202_v10 = vmul.f32 %v6671_v53, %v5195_v52  ;;  %v5188_v4 = vpop.f32.mrb[251].mxu1  ;;  %v6650_v0 = vpop.f32.mrb[71].mxu0 }
 0x736   : > { %v5203_v54 = vmul.f32 %v6672_v12, %v5199_v31 }
 0x737   : > { %v5216_v50 = vadd.f32 %v5209_v41, %v5202_v10 }
 0x738   : > { %v5217_v47 = vadd.f32 %v5213_v8, %v5203_v54 }
 0x739   : > { %v5218_v18 = vmax.f32 %v5216_v50, 0.0 }
 0x73a   : > { %v5219_v62 = vmax.f32 %v5217_v47, 0.0 }
 0x73b   : > { %v5220_v14 = vpack.c.bf16 %v5218_v18, %v5218_v18 }
 0x73c   : > { %v5221_v34 = vpack.c.bf16 %v5219_v62, %v5219_v62 }
 0x73e   : > { %6159 = vmatprep.mubr.msk.bf16.mxu0 %vm5590_vm9, %v5221_v34 }
 0x73f   : > { %5627 = vmatmul.mubr.bf16.vlgmr.msra.gmra.mrb[72].mxu0 %v5220_v14 }
 0x812   : > { %v5628_v5 = vpop.f32.mrb[72].mxu0 }
 0x813   : > { %v5629_v13 = vadd.f32 %v5628_v5, %v5513_v59  ;;  %v5630_v61 = vpop.f32.mrb[73].mxu0 }
 0x814   : > { %v5631_v19 = vpop.f32.mrb[74].mxu0 }
 0x815   : > { %v5635_v3 = vadd.f32 %v5634_v30, %v5629_v13  ;;  %v5632_v38 = vpop.f32.mrb[75].mxu0 }
 0x817   : > { %5636 = vst [vmem:[%s636_s19] sm:$0x1] %v5635_v3 }
 0x818   : > { %7581 = shalt.err (!%p7578_p4)
}
 0x819   : > { %s7582_s22 = scalar_lea.hbm %s9758_s26, 16  ;;  %s7586_s17 = scalar_lea.hbm %s9890_s24, 32 }
 0x81a   : > { %p7583_p9 = scmp.ne.s32.totalorder %s9758_s26, %s7582_s22  ;;  %p7587_p8 = scmp.lt.u32.totalorder %s9758_s26, %s9890_s24 }
 0x81b   : > { %p7588_p13 = scmp.lt.u32.totalorder %s7586_s17, %s7582_s22  ;;  %p7590_p10 = scmp.lt.u32.totalorder %s7582_s22, %s9758_s26 }
 0x81c   : > { %p7584_p0 = pnand %p7583_p9, %p7901_p5 }
 0x81d   : > { %p7589_p6 = por %p7588_p13, %p7587_p8 }
 0x81e   : > { %p7585_p11 = pneg %p7584_p0 }
 0x81f   : > { %p7591_p3 = por %p7590_p10, %p7589_p6 }
 0x821   : > { %p7592_p7 = pnand %p7591_p3, %p7585_p11 }
 0x823   : > { %7595 = shalt.err (!%p7592_p7)
}
 0x824   : > { %6854 = dma.vmem_to_hbm [thread:$0]  (%p7901_p5), %s9760_s12, 16, %s9758_s26, %s5638_s23  }
 0x825 PF: > { %s9891_s10 = sld [smem:[#allocation16_spill]]  ;;  %s9892_s0 = sld [smem:[#allocation17_spill]] }
 0x826   : > { %p9894_p2 = scmp.ge.s32.totalorder %s7642_s30, 2 }
 0x82b   : > { %s5662_s1 = sand.u32 1, %s9891_s10   ;;  %p9893_p12 = scmp.ne.s32.totalorder %s9892_s0, 0 }
 0x82c   : > { %s5663_s21 = scalar_lea.sflag [#allocation5], %s5662_s1 }
 0x82d   : > { %p6871_p1 = pnand %p9894_p2, %p9893_p12 }
 0x82f   : > { %7625 = dma.done.wait (!%p6871_p1), %s5663_s21, 16  }
 0x830   : > { %7627 = vsyncadd (!%p6871_p1), %s5663_s21, 4294967280  ;;  %s9895_s2 = smov %s7897_s27  ;;  %p33_p4 = scmp.ge.s32.totalorder %s7887_s9, 4  }
 0x831   : > { %s9896_s27 = smov %s7634_s28  ;;  %s9897_s28 = smov %s7638_s29 }
 0x832   : > { %s9898_s29 = smov %s9895_s2  ;;  %s9899_s30 = smov %s7887_s9 }
 0x833   :  { %35 = sbr.rel (!%p33_p4) target bundleno = 20 (0x14), region = 153 }
 0x83a   :  { %5667 = vsyncpa [#allocation4], 1 }
 0x83b   :  { %5669 = vsyncpa [#allocation4 + $0x1], 1 }
 0x83c   :  { %5670 = vsyncpa [#allocation7], 1 }
 0x83d   :  { %5671 = vsyncpa [#allocation10], 1 }
 0x83e   :  { %5672 = vsyncpa [#allocation5], 1 }
 0x83f   :  { %5674 = vsyncpa [#allocation5 + $0x1], 1 }

</bundles_post_ra>
